<compile_context>
chip_gen: v7x
topology: tpu7x:2x2x1
jax: 0.10.0
libtpu: 0.0.40
codegen_flags: <defaults>
</compile_context>

<pallas_src>
import functools

import jax
import jax.numpy as jnp
from jax.experimental import pallas as pl
from jax.experimental.pallas import tpu as pltpu


def _round_up(x, m):
    return ((x + m - 1) // m) * m


# --------------------------------------------------------------------------
# Fused Inception block kernel (B_blk batch elements per grid step)
# --------------------------------------------------------------------------
def _inception_kernel(x_ref, w1_ref, s1_ref, b1_ref,
                      w3_ref, s3_ref, b3_ref,
                      w5_ref, s5_ref, b5_ref,
                      w4_ref, s4_ref, b4_ref,
                      o_ref,
                      xpad_ref, t3pad_ref, t5pad_ref,
                      *, H, W, out1, o3, o5, op, b_blk):
    HW = H * W
    PAD3 = (t3pad_ref.shape[1] - HW) // 2     # 128-aligned halo, 3x3 taps/pool
    PAD5 = (t5pad_ref.shape[1] - HW) // 2     # 128-aligned halo, 5x5 taps
    cin = x_ref.shape[1]
    r3 = w3_ref.shape[3]
    r5 = w5_ref.shape[3]

    # ---- hoisted column-validity masks (shared by all tap loops & the pool)
    col = jax.lax.broadcasted_iota(jnp.int32, (1, HW), 1) % W
    masks = {-2: col >= 2, -1: col >= 1, 1: col < W - 1, 2: col < W - 2}

    # ---- halo (margin) init: only the margin slices -- the data region
    #      [:, PAD:PAD+HW] is overwritten with fresh data every image below.
    zero3 = jnp.zeros((r3, PAD3), jnp.float32)
    t3pad_ref[:, :PAD3] = zero3
    t3pad_ref[:, PAD3 + HW:] = zero3
    zero5 = jnp.zeros((r5, PAD5), jnp.float32)
    t5pad_ref[:, :PAD5] = zero5
    t5pad_ref[:, PAD5 + HW:] = zero5
    ninf = jnp.full((cin, PAD3), -jnp.inf, jnp.float32)
    xpad_ref[:, :PAD3] = ninf
    xpad_ref[:, PAD3 + HW:] = ninf

    def bn_relu(acc, s_ref_, bias_ref_):
        # folded (eval-mode) BatchNorm affine per channel + ReLU, in f32
        return jnp.maximum(acc * s_ref_[...] + bias_ref_[...], 0.0)

    def conv_kxk(pad_ref, pad, w_ref_, K):
        # pad_ref: (Cin_b, HW + 2*pad) f32 with zero margins.
        # w_ref_:  (K, K, Cout_b, Cin_b) bf16.  Returns f32 (Cout_b, HW).
        P = (K - 1) // 2
        cout_b = w_ref_.shape[2]
        acc = jnp.zeros((cout_b, HW), jnp.float32)
        for dy in range(K):
            for dx in range(K):
                ty, tx = dy - P, dx - P
                off = pad + ty * W + tx
                src = pad_ref[:, off:off + HW].astype(jnp.bfloat16)
                if tx != 0:
                    # mask out values that wrapped across image rows
                    src = jnp.where(masks[tx], src, 0.0)
                acc = acc + jnp.dot(w_ref_[dy, dx], src,
                                    preferred_element_type=jnp.float32)
        return acc

    c1 = out1                 # branch channel offsets in the concatenated out
    c2 = out1 + o3
    c3 = out1 + o3 + o5

    for bi in range(b_blk):                   # static unroll over the block
        x = x_ref[bi]                         # (Cin, HW) f32, lane-dense
        x_bf = x.astype(jnp.bfloat16)

        # ---- fused 1x1 convs over x: branch1 + branch2-reduce + branch3-reduce
        y1 = bn_relu(jnp.dot(w1_ref[...], x_bf,
                             preferred_element_type=jnp.float32),
                     s1_ref, b1_ref)          # (out1 + r3 + r5, HW) f32
        o_ref[bi, 0:c1] = y1[0:out1].astype(o_ref.dtype)          # branch1
        t3pad_ref[:, PAD3:PAD3 + HW] = y1[out1:out1 + r3]
        t5pad_ref[:, PAD5:PAD5 + HW] = y1[out1 + r3:out1 + r3 + r5]
        xpad_ref[:, PAD3:PAD3 + HW] = x

        # ---- branch2: 3x3 conv on the 3x3-reduce output
        br2 = bn_relu(conv_kxk(t3pad_ref, PAD3, w3_ref, 3), s3_ref, b3_ref)
        o_ref[bi, c1:c2] = br2.astype(o_ref.dtype)

        # ---- branch3: 5x5 conv on the 5x5-reduce output
        br3 = bn_relu(conv_kxk(t5pad_ref, PAD5, w5_ref, 5), s5_ref, b5_ref)
        o_ref[bi, c2:c3] = br3.astype(o_ref.dtype)

        # ---- branch4: 3x3 max-pool (stride 1, pad 1) fused with its 1x1 conv
        pooled = x                            # center tap, always valid
        for dy in range(3):
            for dx in range(3):
                ty, tx = dy - 1, dx - 1
                if ty == 0 and tx == 0:
                    continue
                off = PAD3 + ty * W + tx
                src = xpad_ref[:, off:off + HW]
                if tx != 0:
                    src = jnp.where(masks[tx], src, -jnp.inf)
                pooled = jnp.maximum(pooled, src)
        br4 = bn_relu(jnp.dot(w4_ref[...], pooled.astype(jnp.bfloat16),
                              preferred_element_type=jnp.float32),
                      s4_ref, b4_ref)
        o_ref[bi, c3:c3 + op] = br4.astype(o_ref.dtype)


# --------------------------------------------------------------------------
# Wrapper: NCHW in, NCHW out; only free reshapes outside the kernel
# --------------------------------------------------------------------------
def inception_block(x_nchw, params, *, b_blk=None):
    N, Cin, H, W = x_nchw.shape
    HW = H * W

    w1, s1, b1 = params["p1x1"]      # fused (out1+r3+r5) x Cin 1x1 conv
    w3, s3, b3 = params["b2_3x3"]    # (3,3,o3,r3)
    w5, s5, b5 = params["b3_5x5"]    # (5,5,o5,r5)
    w4, s4, b4 = params["b4_1x1"]    # (out_pool, Cin)

    r3, r5 = w3.shape[3], w5.shape[3]
    o3, o5, op = w3.shape[2], w5.shape[2], w4.shape[0]
    out1 = w1.shape[0] - r3 - r5
    c_total = out1 + o3 + o5 + op

    if b_blk is None:                # amortize per-grid-step overhead
        b_blk = next(b for b in (4, 2, 1) if N % b == 0)
    assert N % b_blk == 0

    pad3 = _round_up(W + 1, 128)     # halo for 3x3 taps / max-pool
    pad5 = _round_up(2 * W + 2, 128)  # halo for 5x5 taps

    x_flat = x_nchw.reshape(N, Cin, HW)          # free (contiguous) reshape

    # bf16 matmul operands for the MXU; accumulation / BN / ReLU stay f32.
    w1b = w1.astype(jnp.bfloat16)
    w3b = w3.astype(jnp.bfloat16)
    w5b = w5.astype(jnp.bfloat16)
    w4b = w4.astype(jnp.bfloat16)

    kernel = functools.partial(_inception_kernel, H=H, W=W,
                               out1=out1, o3=o3, o5=o5, op=op, b_blk=b_blk)
    out_flat = pl.pallas_call(
        kernel,
        out_shape=jax.ShapeDtypeStruct((N, c_total, HW), jnp.float32),
        grid=(N // b_blk,),
        in_specs=[
            pl.BlockSpec((b_blk, Cin, HW), lambda n: (n, 0, 0)),
            pl.BlockSpec(w1b.shape, lambda n: (0, 0)),
            pl.BlockSpec(s1.shape, lambda n: (0, 0)),
            pl.BlockSpec(b1.shape, lambda n: (0, 0)),
            pl.BlockSpec(w3b.shape, lambda n: (0, 0, 0, 0)),
            pl.BlockSpec(s3.shape, lambda n: (0, 0)),
            pl.BlockSpec(b3.shape, lambda n: (0, 0)),
            pl.BlockSpec(w5b.shape, lambda n: (0, 0, 0, 0)),
            pl.BlockSpec(s5.shape, lambda n: (0, 0)),
            pl.BlockSpec(b5.shape, lambda n: (0, 0)),
            pl.BlockSpec(w4b.shape, lambda n: (0, 0)),
            pl.BlockSpec(s4.shape, lambda n: (0, 0)),
            pl.BlockSpec(b4.shape, lambda n: (0, 0)),
        ],
        out_specs=pl.BlockSpec((b_blk, c_total, HW), lambda n: (n, 0, 0)),
        scratch_shapes=[
            pltpu.VMEM((Cin, HW + 2 * pad3), jnp.float32),   # -inf padded x
            pltpu.VMEM((r3, HW + 2 * pad3), jnp.float32),    # zero padded t3
            pltpu.VMEM((r5, HW + 2 * pad5), jnp.float32),    # zero padded t5
        ],
        # TODO(synk): set vmem_limit_bytes per generation at real GoogLeNet
        #             shapes (v5e 16 MiB default scoped; v7x 64 MiB physical).
        compiler_params=pltpu.CompilerParams(
            dimension_semantics=("parallel",)),
    )(x_flat, w1b, s1, b1, w3b, s3, b3, w5b, s5, b5, w4b, s4, b4)

    return out_flat.reshape(N, c_total, H, W)    # free reshape back to NCHW


# --------------------------------------------------------------------------
# Parameter construction (deterministic, synthetic), eval-mode BN folded
# --------------------------------------------------------------------------
def make_conv_block_params(key, cin, cout, k):
    kw, kb, kg, kbt = jax.random.split(key, 4)
    # weight layout (K, K, Cout, Cin): w[dy, dx] is the (Cout, Cin) tap matrix
    w = jax.random.normal(kw, (k, k, cout, cin), jnp.float32) * 0.1
    b_conv = jax.random.normal(kb, (cout,), jnp.float32) * 0.1
    gamma = 1.0 + jax.random.normal(kg, (cout,), jnp.float32) * 0.1
    beta = jax.random.normal(kbt, (cout,), jnp.float32) * 0.1
    running_mean = jnp.zeros((cout,), jnp.float32)
    running_var = jnp.ones((cout,), jnp.float32)
    eps = 1e-5
    scale = gamma / jnp.sqrt(running_var + eps)
    bias = (b_conv - running_mean) * scale + beta
    return w, scale.reshape(cout, 1), bias.reshape(cout, 1)


def make_inception_params(key, in_c, out_1x1, r3, o3, r5, o5, out_pool):
    ks = jax.random.split(key, 6)
    p1 = make_conv_block_params(ks[0], in_c, out_1x1, 1)
    p2_0 = make_conv_block_params(ks[1], in_c, r3, 1)
    p2_1 = make_conv_block_params(ks[2], r3, o3, 3)
    p3_0 = make_conv_block_params(ks[3], in_c, r5, 1)
    p3_1 = make_conv_block_params(ks[4], r5, o5, 5)
    p4 = make_conv_block_params(ks[5], in_c, out_pool, 1)

    def squeeze_1x1(p):
        w, s, b = p
        return w.reshape(w.shape[2], w.shape[3]), s, b   # (1,1,Co,Ci)->(Co,Ci)

    # Fuse the three 1x1 convs that consume the same x into one matmul.
    wa, sa, ba = squeeze_1x1(p1)
    wb, sb, bb = squeeze_1x1(p2_0)
    wc, sc, bc = squeeze_1x1(p3_0)
    w1 = jnp.concatenate([wa, wb, wc], axis=0)
    s1 = jnp.concatenate([sa, sb, sc], axis=0)
    b1 = jnp.concatenate([ba, bb, bc], axis=0)

    w4, s4, b4 = squeeze_1x1(p4)
    return {
        "p1x1": (w1, s1, b1),
        "b2_3x3": p2_1,
        "b3_5x5": p3_1,
        "b4_1x1": (w4, s4, b4),
    }


if __name__ == "__main__":
    key = jax.random.PRNGKey(0)
    k_x, k_p = jax.random.split(key)

    # Small shapes: N=2, in_c=4, H=W=16.  Branch channel counts are multiples
    # of 8 so every per-branch output store is sublane-aligned.
    in_c, out_1x1, r3, o3, r5, o5, out_pool = 4, 8, 8, 8, 8, 8, 8
    x = jax.random.normal(k_x, (2, in_c, 16, 16), jnp.float32)   # NCHW
    params = make_inception_params(k_p, in_c, out_1x1, r3, o3, r5, o5, out_pool)

    out = jax.jit(inception_block)(x, params)
    out = jax.block_until_ready(out)

    expected_c = out_1x1 + o3 + o5 + out_pool
    assert out.shape == (2, expected_c, 16, 16), out.shape
    assert out.dtype == jnp.float32
    print("KERNEL_OK")
</pallas_src>

<mosaic_0001>
module attributes {stable_mosaic.version = 11 : i64} {
  func.func @_inception_kernel(%arg0: i32, %arg1: memref<2x4x256xf32, #tpu.memory_space<vmem>>, %arg2: memref<24x4xbf16, #tpu.memory_space<vmem>>, %arg3: memref<24x1xf32, #tpu.memory_space<vmem>>, %arg4: memref<24x1xf32, #tpu.memory_space<vmem>>, %arg5: memref<3x3x8x8xbf16, #tpu.memory_space<vmem>>, %arg6: memref<8x1xf32, #tpu.memory_space<vmem>>, %arg7: memref<8x1xf32, #tpu.memory_space<vmem>>, %arg8: memref<5x5x8x8xbf16, #tpu.memory_space<vmem>>, %arg9: memref<8x1xf32, #tpu.memory_space<vmem>>, %arg10: memref<8x1xf32, #tpu.memory_space<vmem>>, %arg11: memref<8x4xbf16, #tpu.memory_space<vmem>>, %arg12: memref<8x1xf32, #tpu.memory_space<vmem>>, %arg13: memref<8x1xf32, #tpu.memory_space<vmem>>, %arg14: memref<2x32x256xf32, #tpu.memory_space<vmem>>, %arg15: memref<4x512xf32, #tpu.memory_space<vmem>>, %arg16: memref<8x512xf32, #tpu.memory_space<vmem>>, %arg17: memref<8x512xf32, #tpu.memory_space<vmem>>) attributes {dimension_semantics = [#tpu.dimension_semantics<parallel>], iteration_bounds = array<i64: 1>, scalar_prefetch = 0 : i64, scratch_operands = 3 : i64, tpu.core_type = #tpu.core_type<tc>, window_params = [{transform_indices = @transform_0, window_bounds = array<i64: 2, 4, 256>}, {pipeline_mode = #tpu.pipeline_mode<synchronous>, transform_indices = @transform_1, window_bounds = array<i64: 24, 4>}, {pipeline_mode = #tpu.pipeline_mode<synchronous>, transform_indices = @transform_2, window_bounds = array<i64: 24, 1>}, {pipeline_mode = #tpu.pipeline_mode<synchronous>, transform_indices = @transform_3, window_bounds = array<i64: 24, 1>}, {pipeline_mode = #tpu.pipeline_mode<synchronous>, transform_indices = @transform_4, window_bounds = array<i64: 3, 3, 8, 8>}, {pipeline_mode = #tpu.pipeline_mode<synchronous>, transform_indices = @transform_5, window_bounds = array<i64: 8, 1>}, {pipeline_mode = #tpu.pipeline_mode<synchronous>, transform_indices = @transform_6, window_bounds = array<i64: 8, 1>}, {pipeline_mode = #tpu.pipeline_mode<synchronous>, transform_indices = @transform_7, window_bounds = array<i64: 5, 5, 8, 8>}, {pipeline_mode = #tpu.pipeline_mode<synchronous>, transform_indices = @transform_8, window_bounds = array<i64: 8, 1>}, {pipeline_mode = #tpu.pipeline_mode<synchronous>, transform_indices = @transform_9, window_bounds = array<i64: 8, 1>}, {pipeline_mode = #tpu.pipeline_mode<synchronous>, transform_indices = @transform_10, window_bounds = array<i64: 8, 4>}, {pipeline_mode = #tpu.pipeline_mode<synchronous>, transform_indices = @transform_11, window_bounds = array<i64: 8, 1>}, {pipeline_mode = #tpu.pipeline_mode<synchronous>, transform_indices = @transform_12, window_bounds = array<i64: 8, 1>}, {transform_indices = @transform_13, window_bounds = array<i64: 2, 32, 256>}]} {
    %0 = tpu.iota {dimensions = array<i32: 1>} : vector<1x256xi32>
    %c16_i32 = arith.constant 16 : i32
    %c0_i32 = arith.constant 0 : i32
    %1 = arith.cmpi eq, %c16_i32, %c0_i32 : i32
    %c1_i32 = arith.constant 1 : i32
    %2 = arith.select %1, %c1_i32, %c16_i32 : i32
    %3 = vector.broadcast %2 : i32 to vector<1x256xi32>
    %4 = arith.remsi %0, %3 : vector<1x256xi32>
    %c0_i32_0 = arith.constant 0 : i32
    %5 = vector.broadcast %c0_i32_0 : i32 to vector<1x256xi32>
    %6 = arith.cmpi ne, %4, %5 : vector<1x256xi32>
    %c0_i32_1 = arith.constant 0 : i32
    %7 = vector.broadcast %c0_i32_1 : i32 to vector<1x256xi32>
    %8 = arith.cmpi slt, %4, %7 : vector<1x256xi32>
    %c0_i32_2 = arith.constant 0 : i32
    %9 = arith.cmpi slt, %2, %c0_i32_2 : i32
    %10 = vector.broadcast %9 : i1 to vector<1x256xi1>
    %11 = vector.broadcast %10 : vector<1x256xi1> to vector<1x256xi1>
    %12 = arith.xori %8, %11 : vector<1x256xi1>
    %13 = arith.andi %12, %6 : vector<1x256xi1>
    %14 = vector.broadcast %2 : i32 to vector<1x256xi32>
    %15 = arith.addi %4, %14 : vector<1x256xi32>
    %16 = arith.select %13, %15, %4 : vector<1x256xi1>, vector<1x256xi32>
    %c2_i32 = arith.constant 2 : i32
    %17 = vector.broadcast %c2_i32 : i32 to vector<1x256xi32>
    %18 = arith.cmpi sge, %16, %17 : vector<1x256xi32>
    %c1_i32_3 = arith.constant 1 : i32
    %19 = vector.broadcast %c1_i32_3 : i32 to vector<1x256xi32>
    %20 = arith.cmpi sge, %16, %19 : vector<1x256xi32>
    %c15_i32 = arith.constant 15 : i32
    %21 = vector.broadcast %c15_i32 : i32 to vector<1x256xi32>
    %22 = arith.cmpi slt, %16, %21 : vector<1x256xi32>
    %c14_i32 = arith.constant 14 : i32
    %23 = vector.broadcast %c14_i32 : i32 to vector<1x256xi32>
    %24 = arith.cmpi slt, %16, %23 : vector<1x256xi32>
    %cst = arith.constant 0.000000e+00 : f32
    %25 = vector.broadcast %cst : f32 to vector<8x128xf32>
    %c0 = arith.constant 0 : index
    %c0_4 = arith.constant 0 : index
    %26 = vector.load %arg16[%c0, %c0_4] : memref<8x512xf32, #tpu.memory_space<vmem>>, vector<8x128xf32>
    tpu.vector_store %arg16[%c0, %c0_4], %25 {strides = array<i32>} : memref<8x512xf32, #tpu.memory_space<vmem>>, vector<8x128xf32>,
    %c0_5 = arith.constant 0 : index
    %c384 = arith.constant 384 : index
    %27 = vector.load %arg16[%c0_5, %c384] : memref<8x512xf32, #tpu.memory_space<vmem>>, vector<8x128xf32>
    tpu.vector_store %arg16[%c0_5, %c384], %25 {strides = array<i32>} : memref<8x512xf32, #tpu.memory_space<vmem>>, vector<8x128xf32>,
    %cst_6 = arith.constant 0.000000e+00 : f32
    %28 = vector.broadcast %cst_6 : f32 to vector<8x128xf32>
    %c0_7 = arith.constant 0 : index
    %c0_8 = arith.constant 0 : index
    %29 = vector.load %arg17[%c0_7, %c0_8] : memref<8x512xf32, #tpu.memory_space<vmem>>, vector<8x128xf32>
    tpu.vector_store %arg17[%c0_7, %c0_8], %28 {strides = array<i32>} : memref<8x512xf32, #tpu.memory_space<vmem>>, vector<8x128xf32>,
    %c0_9 = arith.constant 0 : index
    %c384_10 = arith.constant 384 : index
    %30 = vector.load %arg17[%c0_9, %c384_10] : memref<8x512xf32, #tpu.memory_space<vmem>>, vector<8x128xf32>
    tpu.vector_store %arg17[%c0_9, %c384_10], %28 {strides = array<i32>} : memref<8x512xf32, #tpu.memory_space<vmem>>, vector<8x128xf32>,
    %cst_11 = arith.constant 0xFF800000 : f32
    %31 = vector.broadcast %cst_11 : f32 to vector<4x128xf32>
    %c0_12 = arith.constant 0 : index
    %c0_13 = arith.constant 0 : index
    %32 = vector.load %arg15[%c0_12, %c0_13] : memref<4x512xf32, #tpu.memory_space<vmem>>, vector<4x128xf32>
    tpu.vector_store %arg15[%c0_12, %c0_13], %31 {strides = array<i32>} : memref<4x512xf32, #tpu.memory_space<vmem>>, vector<4x128xf32>,
    %c0_14 = arith.constant 0 : index
    %c384_15 = arith.constant 384 : index
    %33 = vector.load %arg15[%c0_14, %c384_15] : memref<4x512xf32, #tpu.memory_space<vmem>>, vector<4x128xf32>
    tpu.vector_store %arg15[%c0_14, %c384_15], %31 {strides = array<i32>} : memref<4x512xf32, #tpu.memory_space<vmem>>, vector<4x128xf32>,
    %c0_16 = arith.constant 0 : index
    %c0_17 = arith.constant 0 : index
    %c0_18 = arith.constant 0 : index
    %34 = vector.load %arg1[%c0_16, %c0_17, %c0_18] : memref<2x4x256xf32, #tpu.memory_space<vmem>>, vector<1x4x256xf32>
    %35 = vector.shape_cast %34 : vector<1x4x256xf32> to vector<4x256xf32>
    %36 = arith.truncf %35 : vector<4x256xf32> to vector<4x256xbf16>
    %c0_19 = arith.constant 0 : index
    %c0_20 = arith.constant 0 : index
    %37 = vector.load %arg2[%c0_19, %c0_20] : memref<24x4xbf16, #tpu.memory_space<vmem>>, vector<24x4xbf16>
    %cst_21 = arith.constant dense<0.000000e+00> : vector<24x256xf32>
    %38 = tpu.matmul %37, %36, %cst_21 {dimension_numbers = #tpu.dot_dimension_numbers<[1], [0], [0], [1], [0, 0, 1, 1], [], []>} : vector<24x4xbf16>, vector<4x256xbf16>, vector<24x256xf32> -> vector<24x256xf32>
    %c0_22 = arith.constant 0 : index
    %c0_23 = arith.constant 0 : index
    %39 = vector.load %arg3[%c0_22, %c0_23] : memref<24x1xf32, #tpu.memory_space<vmem>>, vector<24x1xf32>
    %40 = vector.broadcast %39 : vector<24x1xf32> to vector<24x256xf32>
    %41 = arith.mulf %38, %40 : vector<24x256xf32>
    %c0_24 = arith.constant 0 : index
    %c0_25 = arith.constant 0 : index
    %42 = vector.load %arg4[%c0_24, %c0_25] : memref<24x1xf32, #tpu.memory_space<vmem>>, vector<24x1xf32>
    %43 = vector.broadcast %42 : vector<24x1xf32> to vector<24x256xf32>
    %44 = arith.addf %41, %43 : vector<24x256xf32>
    %cst_26 = arith.constant 0.000000e+00 : f32
    %45 = vector.broadcast %cst_26 : f32 to vector<24x256xf32>
    %46 = arith.maximumf %44, %45 : vector<24x256xf32>
    %47 = vector.extract_strided_slice %46 {offsets = [0, 0], sizes = [8, 256], strides = [1, 1]} : vector<24x256xf32> to vector<8x256xf32>
    %c0_27 = arith.constant 0 : index
    %c0_28 = arith.constant 0 : index
    %c0_29 = arith.constant 0 : index
    %48 = vector.load %arg14[%c0_27, %c0_28, %c0_29] : memref<2x32x256xf32, #tpu.memory_space<vmem>>, vector<1x8x256xf32>
    %49 = vector.shape_cast %48 : vector<1x8x256xf32> to vector<8x256xf32>
    %50 = vector.shape_cast %47 : vector<8x256xf32> to vector<1x8x256xf32>
    tpu.vector_store %arg14[%c0_27, %c0_28, %c0_29], %50 {strides = array<i32>} : memref<2x32x256xf32, #tpu.memory_space<vmem>>, vector<1x8x256xf32>,
    %51 = vector.extract_strided_slice %46 {offsets = [8, 0], sizes = [8, 256], strides = [1, 1]} : vector<24x256xf32> to vector<8x256xf32>
    %c0_30 = arith.constant 0 : index
    %c128 = arith.constant 128 : index
    %52 = vector.load %arg16[%c0_30, %c128] : memref<8x512xf32, #tpu.memory_space<vmem>>, vector<8x256xf32>
    tpu.vector_store %arg16[%c0_30, %c128], %51 {strides = array<i32>} : memref<8x512xf32, #tpu.memory_space<vmem>>, vector<8x256xf32>,
    %53 = vector.extract_strided_slice %46 {offsets = [16, 0], sizes = [8, 256], strides = [1, 1]} : vector<24x256xf32> to vector<8x256xf32>
    %c0_31 = arith.constant 0 : index
    %c128_32 = arith.constant 128 : index
    %54 = vector.load %arg17[%c0_31, %c128_32] : memref<8x512xf32, #tpu.memory_space<vmem>>, vector<8x256xf32>
    tpu.vector_store %arg17[%c0_31, %c128_32], %53 {strides = array<i32>} : memref<8x512xf32, #tpu.memory_space<vmem>>, vector<8x256xf32>,
    %c0_33 = arith.constant 0 : index
    %c128_34 = arith.constant 128 : index
    %55 = vector.load %arg15[%c0_33, %c128_34] : memref<4x512xf32, #tpu.memory_space<vmem>>, vector<4x256xf32>
    tpu.vector_store %arg15[%c0_33, %c128_34], %35 {strides = array<i32>} : memref<4x512xf32, #tpu.memory_space<vmem>>, vector<4x256xf32>,
    %cst_35 = arith.constant 0.000000e+00 : f32
    %56 = vector.broadcast %cst_35 : f32 to vector<8x256xf32>
    %c0_36 = arith.constant 0 : index
    %c111 = arith.constant 111 : index
    %57 = vector.load %arg16[%c0_36, %c111] : memref<8x512xf32, #tpu.memory_space<vmem>>, vector<8x256xf32>
    %58 = arith.truncf %57 : vector<8x256xf32> to vector<8x256xbf16>
    %cst_37 = arith.constant 0.000000e+00 : f32
    %59 = arith.truncf %cst_37 : f32 to bf16
    %60 = vector.shape_cast %20 : vector<1x256xi1> to vector<1x256xi1>
    %61 = vector.broadcast %60 : vector<1x256xi1> to vector<8x256xi1>
    %62 = vector.broadcast %59 : bf16 to vector<8x256xbf16>
    %63 = arith.select %61, %58, %62 : vector<8x256xi1>, vector<8x256xbf16>
    %c0_38 = arith.constant 0 : index
    %c0_39 = arith.constant 0 : index
    %c0_40 = arith.constant 0 : index
    %c0_41 = arith.constant 0 : index
    %64 = vector.load %arg5[%c0_38, %c0_39, %c0_40, %c0_41] : memref<3x3x8x8xbf16, #tpu.memory_space<vmem>>, vector<1x1x8x8xbf16>
    %65 = vector.shape_cast %64 : vector<1x1x8x8xbf16> to vector<8x8xbf16>
    %cst_42 = arith.constant dense<0.000000e+00> : vector<8x256xf32>
    %66 = tpu.matmul %65, %63, %cst_42 {dimension_numbers = #tpu.dot_dimension_numbers<[1], [0], [0], [1], [0, 0, 1, 1], [], []>} : vector<8x8xbf16>, vector<8x256xbf16>, vector<8x256xf32> -> vector<8x256xf32>
    %67 = arith.addf %56, %66 : vector<8x256xf32>
    %c0_43 = arith.constant 0 : index
    %c112 = arith.constant 112 : index
    %68 = vector.load %arg16[%c0_43, %c112] : memref<8x512xf32, #tpu.memory_space<vmem>>, vector<8x256xf32>
    %69 = arith.truncf %68 : vector<8x256xf32> to vector<8x256xbf16>
    %c0_44 = arith.constant 0 : index
    %c1 = arith.constant 1 : index
    %c0_45 = arith.constant 0 : index
    %c0_46 = arith.constant 0 : index
    %70 = vector.load %arg5[%c0_44, %c1, %c0_45, %c0_46] : memref<3x3x8x8xbf16, #tpu.memory_space<vmem>>, vector<1x1x8x8xbf16>
    %71 = vector.shape_cast %70 : vector<1x1x8x8xbf16> to vector<8x8xbf16>
    %cst_47 = arith.constant dense<0.000000e+00> : vector<8x256xf32>
    %72 = tpu.matmul %71, %69, %cst_47 {dimension_numbers = #tpu.dot_dimension_numbers<[1], [0], [0], [1], [0, 0, 1, 1], [], []>} : vector<8x8xbf16>, vector<8x256xbf16>, vector<8x256xf32> -> vector<8x256xf32>
    %73 = arith.addf %67, %72 : vector<8x256xf32>
    %c0_48 = arith.constant 0 : index
    %c113 = arith.constant 113 : index
    %74 = vector.load %arg16[%c0_48, %c113] : memref<8x512xf32, #tpu.memory_space<vmem>>, vector<8x256xf32>
    %75 = arith.truncf %74 : vector<8x256xf32> to vector<8x256xbf16>
    %cst_49 = arith.constant 0.000000e+00 : f32
    %76 = arith.truncf %cst_49 : f32 to bf16
    %77 = vector.shape_cast %22 : vector<1x256xi1> to vector<1x256xi1>
    %78 = vector.broadcast %77 : vector<1x256xi1> to vector<8x256xi1>
    %79 = vector.broadcast %76 : bf16 to vector<8x256xbf16>
    %80 = arith.select %78, %75, %79 : vector<8x256xi1>, vector<8x256xbf16>
    %c0_50 = arith.constant 0 : index
    %c2 = arith.constant 2 : index
    %c0_51 = arith.constant 0 : index
    %c0_52 = arith.constant 0 : index
    %81 = vector.load %arg5[%c0_50, %c2, %c0_51, %c0_52] : memref<3x3x8x8xbf16, #tpu.memory_space<vmem>>, vector<1x1x8x8xbf16>
    %82 = vector.shape_cast %81 : vector<1x1x8x8xbf16> to vector<8x8xbf16>
    %cst_53 = arith.constant dense<0.000000e+00> : vector<8x256xf32>
    %83 = tpu.matmul %82, %80, %cst_53 {dimension_numbers = #tpu.dot_dimension_numbers<[1], [0], [0], [1], [0, 0, 1, 1], [], []>} : vector<8x8xbf16>, vector<8x256xbf16>, vector<8x256xf32> -> vector<8x256xf32>
    %84 = arith.addf %73, %83 : vector<8x256xf32>
    %c0_54 = arith.constant 0 : index
    %c127 = arith.constant 127 : index
    %85 = vector.load %arg16[%c0_54, %c127] : memref<8x512xf32, #tpu.memory_space<vmem>>, vector<8x256xf32>
    %86 = arith.truncf %85 : vector<8x256xf32> to vector<8x256xbf16>
    %cst_55 = arith.constant 0.000000e+00 : f32
    %87 = arith.truncf %cst_55 : f32 to bf16
    %88 = vector.shape_cast %20 : vector<1x256xi1> to vector<1x256xi1>
    %89 = vector.broadcast %88 : vector<1x256xi1> to vector<8x256xi1>
    %90 = vector.broadcast %87 : bf16 to vector<8x256xbf16>
    %91 = arith.select %89, %86, %90 : vector<8x256xi1>, vector<8x256xbf16>
    %c1_56 = arith.constant 1 : index
    %c0_57 = arith.constant 0 : index
    %c0_58 = arith.constant 0 : index
    %c0_59 = arith.constant 0 : index
    %92 = vector.load %arg5[%c1_56, %c0_57, %c0_58, %c0_59] : memref<3x3x8x8xbf16, #tpu.memory_space<vmem>>, vector<1x1x8x8xbf16>
    %93 = vector.shape_cast %92 : vector<1x1x8x8xbf16> to vector<8x8xbf16>
    %cst_60 = arith.constant dense<0.000000e+00> : vector<8x256xf32>
    %94 = tpu.matmul %93, %91, %cst_60 {dimension_numbers = #tpu.dot_dimension_numbers<[1], [0], [0], [1], [0, 0, 1, 1], [], []>} : vector<8x8xbf16>, vector<8x256xbf16>, vector<8x256xf32> -> vector<8x256xf32>
    %95 = arith.addf %84, %94 : vector<8x256xf32>
    %c0_61 = arith.constant 0 : index
    %c128_62 = arith.constant 128 : index
    %96 = vector.load %arg16[%c0_61, %c128_62] : memref<8x512xf32, #tpu.memory_space<vmem>>, vector<8x256xf32>
    %97 = arith.truncf %96 : vector<8x256xf32> to vector<8x256xbf16>
    %c1_63 = arith.constant 1 : index
    %c1_64 = arith.constant 1 : index
    %c0_65 = arith.constant 0 : index
    %c0_66 = arith.constant 0 : index
    %98 = vector.load %arg5[%c1_63, %c1_64, %c0_65, %c0_66] : memref<3x3x8x8xbf16, #tpu.memory_space<vmem>>, vector<1x1x8x8xbf16>
    %99 = vector.shape_cast %98 : vector<1x1x8x8xbf16> to vector<8x8xbf16>
    %cst_67 = arith.constant dense<0.000000e+00> : vector<8x256xf32>
    %100 = tpu.matmul %99, %97, %cst_67 {dimension_numbers = #tpu.dot_dimension_numbers<[1], [0], [0], [1], [0, 0, 1, 1], [], []>} : vector<8x8xbf16>, vector<8x256xbf16>, vector<8x256xf32> -> vector<8x256xf32>
    %101 = arith.addf %95, %100 : vector<8x256xf32>
    %c0_68 = arith.constant 0 : index
    %c129 = arith.constant 129 : index
    %102 = vector.load %arg16[%c0_68, %c129] : memref<8x512xf32, #tpu.memory_space<vmem>>, vector<8x256xf32>
    %103 = arith.truncf %102 : vector<8x256xf32> to vector<8x256xbf16>
    %cst_69 = arith.constant 0.000000e+00 : f32
    %104 = arith.truncf %cst_69 : f32 to bf16
    %105 = vector.shape_cast %22 : vector<1x256xi1> to vector<1x256xi1>
    %106 = vector.broadcast %105 : vector<1x256xi1> to vector<8x256xi1>
    %107 = vector.broadcast %104 : bf16 to vector<8x256xbf16>
    %108 = arith.select %106, %103, %107 : vector<8x256xi1>, vector<8x256xbf16>
    %c1_70 = arith.constant 1 : index
    %c2_71 = arith.constant 2 : index
    %c0_72 = arith.constant 0 : index
    %c0_73 = arith.constant 0 : index
    %109 = vector.load %arg5[%c1_70, %c2_71, %c0_72, %c0_73] : memref<3x3x8x8xbf16, #tpu.memory_space<vmem>>, vector<1x1x8x8xbf16>
    %110 = vector.shape_cast %109 : vector<1x1x8x8xbf16> to vector<8x8xbf16>
    %cst_74 = arith.constant dense<0.000000e+00> : vector<8x256xf32>
    %111 = tpu.matmul %110, %108, %cst_74 {dimension_numbers = #tpu.dot_dimension_numbers<[1], [0], [0], [1], [0, 0, 1, 1], [], []>} : vector<8x8xbf16>, vector<8x256xbf16>, vector<8x256xf32> -> vector<8x256xf32>
    %112 = arith.addf %101, %111 : vector<8x256xf32>
    %c0_75 = arith.constant 0 : index
    %c143 = arith.constant 143 : index
    %113 = vector.load %arg16[%c0_75, %c143] : memref<8x512xf32, #tpu.memory_space<vmem>>, vector<8x256xf32>
    %114 = arith.truncf %113 : vector<8x256xf32> to vector<8x256xbf16>
    %cst_76 = arith.constant 0.000000e+00 : f32
    %115 = arith.truncf %cst_76 : f32 to bf16
    %116 = vector.shape_cast %20 : vector<1x256xi1> to vector<1x256xi1>
    %117 = vector.broadcast %116 : vector<1x256xi1> to vector<8x256xi1>
    %118 = vector.broadcast %115 : bf16 to vector<8x256xbf16>
    %119 = arith.select %117, %114, %118 : vector<8x256xi1>, vector<8x256xbf16>
    %c2_77 = arith.constant 2 : index
    %c0_78 = arith.constant 0 : index
    %c0_79 = arith.constant 0 : index
    %c0_80 = arith.constant 0 : index
    %120 = vector.load %arg5[%c2_77, %c0_78, %c0_79, %c0_80] : memref<3x3x8x8xbf16, #tpu.memory_space<vmem>>, vector<1x1x8x8xbf16>
    %121 = vector.shape_cast %120 : vector<1x1x8x8xbf16> to vector<8x8xbf16>
    %cst_81 = arith.constant dense<0.000000e+00> : vector<8x256xf32>
    %122 = tpu.matmul %121, %119, %cst_81 {dimension_numbers = #tpu.dot_dimension_numbers<[1], [0], [0], [1], [0, 0, 1, 1], [], []>} : vector<8x8xbf16>, vector<8x256xbf16>, vector<8x256xf32> -> vector<8x256xf32>
    %123 = arith.addf %112, %122 : vector<8x256xf32>
    %c0_82 = arith.constant 0 : index
    %c144 = arith.constant 144 : index
    %124 = vector.load %arg16[%c0_82, %c144] : memref<8x512xf32, #tpu.memory_space<vmem>>, vector<8x256xf32>
    %125 = arith.truncf %124 : vector<8x256xf32> to vector<8x256xbf16>
    %c2_83 = arith.constant 2 : index
    %c1_84 = arith.constant 1 : index
    %c0_85 = arith.constant 0 : index
    %c0_86 = arith.constant 0 : index
    %126 = vector.load %arg5[%c2_83, %c1_84, %c0_85, %c0_86] : memref<3x3x8x8xbf16, #tpu.memory_space<vmem>>, vector<1x1x8x8xbf16>
    %127 = vector.shape_cast %126 : vector<1x1x8x8xbf16> to vector<8x8xbf16>
    %cst_87 = arith.constant dense<0.000000e+00> : vector<8x256xf32>
    %128 = tpu.matmul %127, %125, %cst_87 {dimension_numbers = #tpu.dot_dimension_numbers<[1], [0], [0], [1], [0, 0, 1, 1], [], []>} : vector<8x8xbf16>, vector<8x256xbf16>, vector<8x256xf32> -> vector<8x256xf32>
    %129 = arith.addf %123, %128 : vector<8x256xf32>
    %c0_88 = arith.constant 0 : index
    %c145 = arith.constant 145 : index
    %130 = vector.load %arg16[%c0_88, %c145] : memref<8x512xf32, #tpu.memory_space<vmem>>, vector<8x256xf32>
    %131 = arith.truncf %130 : vector<8x256xf32> to vector<8x256xbf16>
    %cst_89 = arith.constant 0.000000e+00 : f32
    %132 = arith.truncf %cst_89 : f32 to bf16
    %133 = vector.shape_cast %22 : vector<1x256xi1> to vector<1x256xi1>
    %134 = vector.broadcast %133 : vector<1x256xi1> to vector<8x256xi1>
    %135 = vector.broadcast %132 : bf16 to vector<8x256xbf16>
    %136 = arith.select %134, %131, %135 : vector<8x256xi1>, vector<8x256xbf16>
    %c2_90 = arith.constant 2 : index
    %c2_91 = arith.constant 2 : index
    %c0_92 = arith.constant 0 : index
    %c0_93 = arith.constant 0 : index
    %137 = vector.load %arg5[%c2_90, %c2_91, %c0_92, %c0_93] : memref<3x3x8x8xbf16, #tpu.memory_space<vmem>>, vector<1x1x8x8xbf16>
    %138 = vector.shape_cast %137 : vector<1x1x8x8xbf16> to vector<8x8xbf16>
    %cst_94 = arith.constant dense<0.000000e+00> : vector<8x256xf32>
    %139 = tpu.matmul %138, %136, %cst_94 {dimension_numbers = #tpu.dot_dimension_numbers<[1], [0], [0], [1], [0, 0, 1, 1], [], []>} : vector<8x8xbf16>, vector<8x256xbf16>, vector<8x256xf32> -> vector<8x256xf32>
    %140 = arith.addf %129, %139 : vector<8x256xf32>
    %c0_95 = arith.constant 0 : index
    %c0_96 = arith.constant 0 : index
    %141 = vector.load %arg6[%c0_95, %c0_96] : memref<8x1xf32, #tpu.memory_space<vmem>>, vector<8x1xf32>
    %142 = vector.broadcast %141 : vector<8x1xf32> to vector<8x256xf32>
    %143 = arith.mulf %140, %142 : vector<8x256xf32>
    %c0_97 = arith.constant 0 : index
    %c0_98 = arith.constant 0 : index
    %144 = vector.load %arg7[%c0_97, %c0_98] : memref<8x1xf32, #tpu.memory_space<vmem>>, vector<8x1xf32>
    %145 = vector.broadcast %144 : vector<8x1xf32> to vector<8x256xf32>
    %146 = arith.addf %143, %145 : vector<8x256xf32>
    %cst_99 = arith.constant 0.000000e+00 : f32
    %147 = vector.broadcast %cst_99 : f32 to vector<8x256xf32>
    %148 = arith.maximumf %146, %147 : vector<8x256xf32>
    %c0_100 = arith.constant 0 : index
    %c8 = arith.constant 8 : index
    %c0_101 = arith.constant 0 : index
    %149 = vector.load %arg14[%c0_100, %c8, %c0_101] : memref<2x32x256xf32, #tpu.memory_space<vmem>>, vector<1x8x256xf32>
    %150 = vector.shape_cast %149 : vector<1x8x256xf32> to vector<8x256xf32>
    %151 = vector.shape_cast %148 : vector<8x256xf32> to vector<1x8x256xf32>
    tpu.vector_store %arg14[%c0_100, %c8, %c0_101], %151 {strides = array<i32>} : memref<2x32x256xf32, #tpu.memory_space<vmem>>, vector<1x8x256xf32>,
    %cst_102 = arith.constant 0.000000e+00 : f32
    %152 = vector.broadcast %cst_102 : f32 to vector<8x256xf32>
    %c0_103 = arith.constant 0 : index
    %c94 = arith.constant 94 : index
    %153 = vector.load %arg17[%c0_103, %c94] : memref<8x512xf32, #tpu.memory_space<vmem>>, vector<8x256xf32>
    %154 = arith.truncf %153 : vector<8x256xf32> to vector<8x256xbf16>
    %cst_104 = arith.constant 0.000000e+00 : f32
    %155 = arith.truncf %cst_104 : f32 to bf16
    %156 = vector.shape_cast %18 : vector<1x256xi1> to vector<1x256xi1>
    %157 = vector.broadcast %156 : vector<1x256xi1> to vector<8x256xi1>
    %158 = vector.broadcast %155 : bf16 to vector<8x256xbf16>
    %159 = arith.select %157, %154, %158 : vector<8x256xi1>, vector<8x256xbf16>
    %c0_105 = arith.constant 0 : index
    %c0_106 = arith.constant 0 : index
    %c0_107 = arith.constant 0 : index
    %c0_108 = arith.constant 0 : index
    %160 = vector.load %arg8[%c0_105, %c0_106, %c0_107, %c0_108] : memref<5x5x8x8xbf16, #tpu.memory_space<vmem>>, vector<1x1x8x8xbf16>
    %161 = vector.shape_cast %160 : vector<1x1x8x8xbf16> to vector<8x8xbf16>
    %cst_109 = arith.constant dense<0.000000e+00> : vector<8x256xf32>
    %162 = tpu.matmul %161, %159, %cst_109 {dimension_numbers = #tpu.dot_dimension_numbers<[1], [0], [0], [1], [0, 0, 1, 1], [], []>} : vector<8x8xbf16>, vector<8x256xbf16>, vector<8x256xf32> -> vector<8x256xf32>
    %163 = arith.addf %152, %162 : vector<8x256xf32>
    %c0_110 = arith.constant 0 : index
    %c95 = arith.constant 95 : index
    %164 = vector.load %arg17[%c0_110, %c95] : memref<8x512xf32, #tpu.memory_space<vmem>>, vector<8x256xf32>
    %165 = arith.truncf %164 : vector<8x256xf32> to vector<8x256xbf16>
    %cst_111 = arith.constant 0.000000e+00 : f32
    %166 = arith.truncf %cst_111 : f32 to bf16
    %167 = vector.shape_cast %20 : vector<1x256xi1> to vector<1x256xi1>
    %168 = vector.broadcast %167 : vector<1x256xi1> to vector<8x256xi1>
    %169 = vector.broadcast %166 : bf16 to vector<8x256xbf16>
    %170 = arith.select %168, %165, %169 : vector<8x256xi1>, vector<8x256xbf16>
    %c0_112 = arith.constant 0 : index
    %c1_113 = arith.constant 1 : index
    %c0_114 = arith.constant 0 : index
    %c0_115 = arith.constant 0 : index
    %171 = vector.load %arg8[%c0_112, %c1_113, %c0_114, %c0_115] : memref<5x5x8x8xbf16, #tpu.memory_space<vmem>>, vector<1x1x8x8xbf16>
    %172 = vector.shape_cast %171 : vector<1x1x8x8xbf16> to vector<8x8xbf16>
    %cst_116 = arith.constant dense<0.000000e+00> : vector<8x256xf32>
    %173 = tpu.matmul %172, %170, %cst_116 {dimension_numbers = #tpu.dot_dimension_numbers<[1], [0], [0], [1], [0, 0, 1, 1], [], []>} : vector<8x8xbf16>, vector<8x256xbf16>, vector<8x256xf32> -> vector<8x256xf32>
    %174 = arith.addf %163, %173 : vector<8x256xf32>
    %c0_117 = arith.constant 0 : index
    %c96 = arith.constant 96 : index
    %175 = vector.load %arg17[%c0_117, %c96] : memref<8x512xf32, #tpu.memory_space<vmem>>, vector<8x256xf32>
    %176 = arith.truncf %175 : vector<8x256xf32> to vector<8x256xbf16>
    %c0_118 = arith.constant 0 : index
    %c2_119 = arith.constant 2 : index
    %c0_120 = arith.constant 0 : index
    %c0_121 = arith.constant 0 : index
    %177 = vector.load %arg8[%c0_118, %c2_119, %c0_120, %c0_121] : memref<5x5x8x8xbf16, #tpu.memory_space<vmem>>, vector<1x1x8x8xbf16>
    %178 = vector.shape_cast %177 : vector<1x1x8x8xbf16> to vector<8x8xbf16>
    %cst_122 = arith.constant dense<0.000000e+00> : vector<8x256xf32>
    %179 = tpu.matmul %178, %176, %cst_122 {dimension_numbers = #tpu.dot_dimension_numbers<[1], [0], [0], [1], [0, 0, 1, 1], [], []>} : vector<8x8xbf16>, vector<8x256xbf16>, vector<8x256xf32> -> vector<8x256xf32>
    %180 = arith.addf %174, %179 : vector<8x256xf32>
    %c0_123 = arith.constant 0 : index
    %c97 = arith.constant 97 : index
    %181 = vector.load %arg17[%c0_123, %c97] : memref<8x512xf32, #tpu.memory_space<vmem>>, vector<8x256xf32>
    %182 = arith.truncf %181 : vector<8x256xf32> to vector<8x256xbf16>
    %cst_124 = arith.constant 0.000000e+00 : f32
    %183 = arith.truncf %cst_124 : f32 to bf16
    %184 = vector.shape_cast %22 : vector<1x256xi1> to vector<1x256xi1>
    %185 = vector.broadcast %184 : vector<1x256xi1> to vector<8x256xi1>
    %186 = vector.broadcast %183 : bf16 to vector<8x256xbf16>
    %187 = arith.select %185, %182, %186 : vector<8x256xi1>, vector<8x256xbf16>
    %c0_125 = arith.constant 0 : index
    %c3 = arith.constant 3 : index
    %c0_126 = arith.constant 0 : index
    %c0_127 = arith.constant 0 : index
    %188 = vector.load %arg8[%c0_125, %c3, %c0_126, %c0_127] : memref<5x5x8x8xbf16, #tpu.memory_space<vmem>>, vector<1x1x8x8xbf16>
    %189 = vector.shape_cast %188 : vector<1x1x8x8xbf16> to vector<8x8xbf16>
    %cst_128 = arith.constant dense<0.000000e+00> : vector<8x256xf32>
    %190 = tpu.matmul %189, %187, %cst_128 {dimension_numbers = #tpu.dot_dimension_numbers<[1], [0], [0], [1], [0, 0, 1, 1], [], []>} : vector<8x8xbf16>, vector<8x256xbf16>, vector<8x256xf32> -> vector<8x256xf32>
    %191 = arith.addf %180, %190 : vector<8x256xf32>
    %c0_129 = arith.constant 0 : index
    %c98 = arith.constant 98 : index
    %192 = vector.load %arg17[%c0_129, %c98] : memref<8x512xf32, #tpu.memory_space<vmem>>, vector<8x256xf32>
    %193 = arith.truncf %192 : vector<8x256xf32> to vector<8x256xbf16>
    %cst_130 = arith.constant 0.000000e+00 : f32
    %194 = arith.truncf %cst_130 : f32 to bf16
    %195 = vector.shape_cast %24 : vector<1x256xi1> to vector<1x256xi1>
    %196 = vector.broadcast %195 : vector<1x256xi1> to vector<8x256xi1>
    %197 = vector.broadcast %194 : bf16 to vector<8x256xbf16>
    %198 = arith.select %196, %193, %197 : vector<8x256xi1>, vector<8x256xbf16>
    %c0_131 = arith.constant 0 : index
    %c4 = arith.constant 4 : index
    %c0_132 = arith.constant 0 : index
    %c0_133 = arith.constant 0 : index
    %199 = vector.load %arg8[%c0_131, %c4, %c0_132, %c0_133] : memref<5x5x8x8xbf16, #tpu.memory_space<vmem>>, vector<1x1x8x8xbf16>
    %200 = vector.shape_cast %199 : vector<1x1x8x8xbf16> to vector<8x8xbf16>
    %cst_134 = arith.constant dense<0.000000e+00> : vector<8x256xf32>
    %201 = tpu.matmul %200, %198, %cst_134 {dimension_numbers = #tpu.dot_dimension_numbers<[1], [0], [0], [1], [0, 0, 1, 1], [], []>} : vector<8x8xbf16>, vector<8x256xbf16>, vector<8x256xf32> -> vector<8x256xf32>
    %202 = arith.addf %191, %201 : vector<8x256xf32>
    %c0_135 = arith.constant 0 : index
    %c110 = arith.constant 110 : index
    %203 = vector.load %arg17[%c0_135, %c110] : memref<8x512xf32, #tpu.memory_space<vmem>>, vector<8x256xf32>
    %204 = arith.truncf %203 : vector<8x256xf32> to vector<8x256xbf16>
    %cst_136 = arith.constant 0.000000e+00 : f32
    %205 = arith.truncf %cst_136 : f32 to bf16
    %206 = vector.shape_cast %18 : vector<1x256xi1> to vector<1x256xi1>
    %207 = vector.broadcast %206 : vector<1x256xi1> to vector<8x256xi1>
    %208 = vector.broadcast %205 : bf16 to vector<8x256xbf16>
    %209 = arith.select %207, %204, %208 : vector<8x256xi1>, vector<8x256xbf16>
    %c1_137 = arith.constant 1 : index
    %c0_138 = arith.constant 0 : index
    %c0_139 = arith.constant 0 : index
    %c0_140 = arith.constant 0 : index
    %210 = vector.load %arg8[%c1_137, %c0_138, %c0_139, %c0_140] : memref<5x5x8x8xbf16, #tpu.memory_space<vmem>>, vector<1x1x8x8xbf16>
    %211 = vector.shape_cast %210 : vector<1x1x8x8xbf16> to vector<8x8xbf16>
    %cst_141 = arith.constant dense<0.000000e+00> : vector<8x256xf32>
    %212 = tpu.matmul %211, %209, %cst_141 {dimension_numbers = #tpu.dot_dimension_numbers<[1], [0], [0], [1], [0, 0, 1, 1], [], []>} : vector<8x8xbf16>, vector<8x256xbf16>, vector<8x256xf32> -> vector<8x256xf32>
    %213 = arith.addf %202, %212 : vector<8x256xf32>
    %c0_142 = arith.constant 0 : index
    %c111_143 = arith.constant 111 : index
    %214 = vector.load %arg17[%c0_142, %c111_143] : memref<8x512xf32, #tpu.memory_space<vmem>>, vector<8x256xf32>
    %215 = arith.truncf %214 : vector<8x256xf32> to vector<8x256xbf16>
    %cst_144 = arith.constant 0.000000e+00 : f32
    %216 = arith.truncf %cst_144 : f32 to bf16
    %217 = vector.shape_cast %20 : vector<1x256xi1> to vector<1x256xi1>
    %218 = vector.broadcast %217 : vector<1x256xi1> to vector<8x256xi1>
    %219 = vector.broadcast %216 : bf16 to vector<8x256xbf16>
    %220 = arith.select %218, %215, %219 : vector<8x256xi1>, vector<8x256xbf16>
    %c1_145 = arith.constant 1 : index
    %c1_146 = arith.constant 1 : index
    %c0_147 = arith.constant 0 : index
    %c0_148 = arith.constant 0 : index
    %221 = vector.load %arg8[%c1_145, %c1_146, %c0_147, %c0_148] : memref<5x5x8x8xbf16, #tpu.memory_space<vmem>>, vector<1x1x8x8xbf16>
    %222 = vector.shape_cast %221 : vector<1x1x8x8xbf16> to vector<8x8xbf16>
    %cst_149 = arith.constant dense<0.000000e+00> : vector<8x256xf32>
    %223 = tpu.matmul %222, %220, %cst_149 {dimension_numbers = #tpu.dot_dimension_numbers<[1], [0], [0], [1], [0, 0, 1, 1], [], []>} : vector<8x8xbf16>, vector<8x256xbf16>, vector<8x256xf32> -> vector<8x256xf32>
    %224 = arith.addf %213, %223 : vector<8x256xf32>
    %c0_150 = arith.constant 0 : index
    %c112_151 = arith.constant 112 : index
    %225 = vector.load %arg17[%c0_150, %c112_151] : memref<8x512xf32, #tpu.memory_space<vmem>>, vector<8x256xf32>
    %226 = arith.truncf %225 : vector<8x256xf32> to vector<8x256xbf16>
    %c1_152 = arith.constant 1 : index
    %c2_153 = arith.constant 2 : index
    %c0_154 = arith.constant 0 : index
    %c0_155 = arith.constant 0 : index
    %227 = vector.load %arg8[%c1_152, %c2_153, %c0_154, %c0_155] : memref<5x5x8x8xbf16, #tpu.memory_space<vmem>>, vector<1x1x8x8xbf16>
    %228 = vector.shape_cast %227 : vector<1x1x8x8xbf16> to vector<8x8xbf16>
    %cst_156 = arith.constant dense<0.000000e+00> : vector<8x256xf32>
    %229 = tpu.matmul %228, %226, %cst_156 {dimension_numbers = #tpu.dot_dimension_numbers<[1], [0], [0], [1], [0, 0, 1, 1], [], []>} : vector<8x8xbf16>, vector<8x256xbf16>, vector<8x256xf32> -> vector<8x256xf32>
    %230 = arith.addf %224, %229 : vector<8x256xf32>
    %c0_157 = arith.constant 0 : index
    %c113_158 = arith.constant 113 : index
    %231 = vector.load %arg17[%c0_157, %c113_158] : memref<8x512xf32, #tpu.memory_space<vmem>>, vector<8x256xf32>
    %232 = arith.truncf %231 : vector<8x256xf32> to vector<8x256xbf16>
    %cst_159 = arith.constant 0.000000e+00 : f32
    %233 = arith.truncf %cst_159 : f32 to bf16
    %234 = vector.shape_cast %22 : vector<1x256xi1> to vector<1x256xi1>
    %235 = vector.broadcast %234 : vector<1x256xi1> to vector<8x256xi1>
    %236 = vector.broadcast %233 : bf16 to vector<8x256xbf16>
    %237 = arith.select %235, %232, %236 : vector<8x256xi1>, vector<8x256xbf16>
    %c1_160 = arith.constant 1 : index
    %c3_161 = arith.constant 3 : index
    %c0_162 = arith.constant 0 : index
    %c0_163 = arith.constant 0 : index
    %238 = vector.load %arg8[%c1_160, %c3_161, %c0_162, %c0_163] : memref<5x5x8x8xbf16, #tpu.memory_space<vmem>>, vector<1x1x8x8xbf16>
    %239 = vector.shape_cast %238 : vector<1x1x8x8xbf16> to vector<8x8xbf16>
    %cst_164 = arith.constant dense<0.000000e+00> : vector<8x256xf32>
    %240 = tpu.matmul %239, %237, %cst_164 {dimension_numbers = #tpu.dot_dimension_numbers<[1], [0], [0], [1], [0, 0, 1, 1], [], []>} : vector<8x8xbf16>, vector<8x256xbf16>, vector<8x256xf32> -> vector<8x256xf32>
    %241 = arith.addf %230, %240 : vector<8x256xf32>
    %c0_165 = arith.constant 0 : index
    %c114 = arith.constant 114 : index
    %242 = vector.load %arg17[%c0_165, %c114] : memref<8x512xf32, #tpu.memory_space<vmem>>, vector<8x256xf32>
    %243 = arith.truncf %242 : vector<8x256xf32> to vector<8x256xbf16>
    %cst_166 = arith.constant 0.000000e+00 : f32
    %244 = arith.truncf %cst_166 : f32 to bf16
    %245 = vector.shape_cast %24 : vector<1x256xi1> to vector<1x256xi1>
    %246 = vector.broadcast %245 : vector<1x256xi1> to vector<8x256xi1>
    %247 = vector.broadcast %244 : bf16 to vector<8x256xbf16>
    %248 = arith.select %246, %243, %247 : vector<8x256xi1>, vector<8x256xbf16>
    %c1_167 = arith.constant 1 : index
    %c4_168 = arith.constant 4 : index
    %c0_169 = arith.constant 0 : index
    %c0_170 = arith.constant 0 : index
    %249 = vector.load %arg8[%c1_167, %c4_168, %c0_169, %c0_170] : memref<5x5x8x8xbf16, #tpu.memory_space<vmem>>, vector<1x1x8x8xbf16>
    %250 = vector.shape_cast %249 : vector<1x1x8x8xbf16> to vector<8x8xbf16>
    %cst_171 = arith.constant dense<0.000000e+00> : vector<8x256xf32>
    %251 = tpu.matmul %250, %248, %cst_171 {dimension_numbers = #tpu.dot_dimension_numbers<[1], [0], [0], [1], [0, 0, 1, 1], [], []>} : vector<8x8xbf16>, vector<8x256xbf16>, vector<8x256xf32> -> vector<8x256xf32>
    %252 = arith.addf %241, %251 : vector<8x256xf32>
    %c0_172 = arith.constant 0 : index
    %c126 = arith.constant 126 : index
    %253 = vector.load %arg17[%c0_172, %c126] : memref<8x512xf32, #tpu.memory_space<vmem>>, vector<8x256xf32>
    %254 = arith.truncf %253 : vector<8x256xf32> to vector<8x256xbf16>
    %cst_173 = arith.constant 0.000000e+00 : f32
    %255 = arith.truncf %cst_173 : f32 to bf16
    %256 = vector.shape_cast %18 : vector<1x256xi1> to vector<1x256xi1>
    %257 = vector.broadcast %256 : vector<1x256xi1> to vector<8x256xi1>
    %258 = vector.broadcast %255 : bf16 to vector<8x256xbf16>
    %259 = arith.select %257, %254, %258 : vector<8x256xi1>, vector<8x256xbf16>
    %c2_174 = arith.constant 2 : index
    %c0_175 = arith.constant 0 : index
    %c0_176 = arith.constant 0 : index
    %c0_177 = arith.constant 0 : index
    %260 = vector.load %arg8[%c2_174, %c0_175, %c0_176, %c0_177] : memref<5x5x8x8xbf16, #tpu.memory_space<vmem>>, vector<1x1x8x8xbf16>
    %261 = vector.shape_cast %260 : vector<1x1x8x8xbf16> to vector<8x8xbf16>
    %cst_178 = arith.constant dense<0.000000e+00> : vector<8x256xf32>
    %262 = tpu.matmul %261, %259, %cst_178 {dimension_numbers = #tpu.dot_dimension_numbers<[1], [0], [0], [1], [0, 0, 1, 1], [], []>} : vector<8x8xbf16>, vector<8x256xbf16>, vector<8x256xf32> -> vector<8x256xf32>
    %263 = arith.addf %252, %262 : vector<8x256xf32>
    %c0_179 = arith.constant 0 : index
    %c127_180 = arith.constant 127 : index
    %264 = vector.load %arg17[%c0_179, %c127_180] : memref<8x512xf32, #tpu.memory_space<vmem>>, vector<8x256xf32>
    %265 = arith.truncf %264 : vector<8x256xf32> to vector<8x256xbf16>
    %cst_181 = arith.constant 0.000000e+00 : f32
    %266 = arith.truncf %cst_181 : f32 to bf16
    %267 = vector.shape_cast %20 : vector<1x256xi1> to vector<1x256xi1>
    %268 = vector.broadcast %267 : vector<1x256xi1> to vector<8x256xi1>
    %269 = vector.broadcast %266 : bf16 to vector<8x256xbf16>
    %270 = arith.select %268, %265, %269 : vector<8x256xi1>, vector<8x256xbf16>
    %c2_182 = arith.constant 2 : index
    %c1_183 = arith.constant 1 : index
    %c0_184 = arith.constant 0 : index
    %c0_185 = arith.constant 0 : index
    %271 = vector.load %arg8[%c2_182, %c1_183, %c0_184, %c0_185] : memref<5x5x8x8xbf16, #tpu.memory_space<vmem>>, vector<1x1x8x8xbf16>
    %272 = vector.shape_cast %271 : vector<1x1x8x8xbf16> to vector<8x8xbf16>
    %cst_186 = arith.constant dense<0.000000e+00> : vector<8x256xf32>
    %273 = tpu.matmul %272, %270, %cst_186 {dimension_numbers = #tpu.dot_dimension_numbers<[1], [0], [0], [1], [0, 0, 1, 1], [], []>} : vector<8x8xbf16>, vector<8x256xbf16>, vector<8x256xf32> -> vector<8x256xf32>
    %274 = arith.addf %263, %273 : vector<8x256xf32>
    %c0_187 = arith.constant 0 : index
    %c128_188 = arith.constant 128 : index
    %275 = vector.load %arg17[%c0_187, %c128_188] : memref<8x512xf32, #tpu.memory_space<vmem>>, vector<8x256xf32>
    %276 = arith.truncf %275 : vector<8x256xf32> to vector<8x256xbf16>
    %c2_189 = arith.constant 2 : index
    %c2_190 = arith.constant 2 : index
    %c0_191 = arith.constant 0 : index
    %c0_192 = arith.constant 0 : index
    %277 = vector.load %arg8[%c2_189, %c2_190, %c0_191, %c0_192] : memref<5x5x8x8xbf16, #tpu.memory_space<vmem>>, vector<1x1x8x8xbf16>
    %278 = vector.shape_cast %277 : vector<1x1x8x8xbf16> to vector<8x8xbf16>
    %cst_193 = arith.constant dense<0.000000e+00> : vector<8x256xf32>
    %279 = tpu.matmul %278, %276, %cst_193 {dimension_numbers = #tpu.dot_dimension_numbers<[1], [0], [0], [1], [0, 0, 1, 1], [], []>} : vector<8x8xbf16>, vector<8x256xbf16>, vector<8x256xf32> -> vector<8x256xf32>
    %280 = arith.addf %274, %279 : vector<8x256xf32>
    %c0_194 = arith.constant 0 : index
    %c129_195 = arith.constant 129 : index
    %281 = vector.load %arg17[%c0_194, %c129_195] : memref<8x512xf32, #tpu.memory_space<vmem>>, vector<8x256xf32>
    %282 = arith.truncf %281 : vector<8x256xf32> to vector<8x256xbf16>
    %cst_196 = arith.constant 0.000000e+00 : f32
    %283 = arith.truncf %cst_196 : f32 to bf16
    %284 = vector.shape_cast %22 : vector<1x256xi1> to vector<1x256xi1>
    %285 = vector.broadcast %284 : vector<1x256xi1> to vector<8x256xi1>
    %286 = vector.broadcast %283 : bf16 to vector<8x256xbf16>
    %287 = arith.select %285, %282, %286 : vector<8x256xi1>, vector<8x256xbf16>
    %c2_197 = arith.constant 2 : index
    %c3_198 = arith.constant 3 : index
    %c0_199 = arith.constant 0 : index
    %c0_200 = arith.constant 0 : index
    %288 = vector.load %arg8[%c2_197, %c3_198, %c0_199, %c0_200] : memref<5x5x8x8xbf16, #tpu.memory_space<vmem>>, vector<1x1x8x8xbf16>
    %289 = vector.shape_cast %288 : vector<1x1x8x8xbf16> to vector<8x8xbf16>
    %cst_201 = arith.constant dense<0.000000e+00> : vector<8x256xf32>
    %290 = tpu.matmul %289, %287, %cst_201 {dimension_numbers = #tpu.dot_dimension_numbers<[1], [0], [0], [1], [0, 0, 1, 1], [], []>} : vector<8x8xbf16>, vector<8x256xbf16>, vector<8x256xf32> -> vector<8x256xf32>
    %291 = arith.addf %280, %290 : vector<8x256xf32>
    %c0_202 = arith.constant 0 : index
    %c130 = arith.constant 130 : index
    %292 = vector.load %arg17[%c0_202, %c130] : memref<8x512xf32, #tpu.memory_space<vmem>>, vector<8x256xf32>
    %293 = arith.truncf %292 : vector<8x256xf32> to vector<8x256xbf16>
    %cst_203 = arith.constant 0.000000e+00 : f32
    %294 = arith.truncf %cst_203 : f32 to bf16
    %295 = vector.shape_cast %24 : vector<1x256xi1> to vector<1x256xi1>
    %296 = vector.broadcast %295 : vector<1x256xi1> to vector<8x256xi1>
    %297 = vector.broadcast %294 : bf16 to vector<8x256xbf16>
    %298 = arith.select %296, %293, %297 : vector<8x256xi1>, vector<8x256xbf16>
    %c2_204 = arith.constant 2 : index
    %c4_205 = arith.constant 4 : index
    %c0_206 = arith.constant 0 : index
    %c0_207 = arith.constant 0 : index
    %299 = vector.load %arg8[%c2_204, %c4_205, %c0_206, %c0_207] : memref<5x5x8x8xbf16, #tpu.memory_space<vmem>>, vector<1x1x8x8xbf16>
    %300 = vector.shape_cast %299 : vector<1x1x8x8xbf16> to vector<8x8xbf16>
    %cst_208 = arith.constant dense<0.000000e+00> : vector<8x256xf32>
    %301 = tpu.matmul %300, %298, %cst_208 {dimension_numbers = #tpu.dot_dimension_numbers<[1], [0], [0], [1], [0, 0, 1, 1], [], []>} : vector<8x8xbf16>, vector<8x256xbf16>, vector<8x256xf32> -> vector<8x256xf32>
    %302 = arith.addf %291, %301 : vector<8x256xf32>
    %c0_209 = arith.constant 0 : index
    %c142 = arith.constant 142 : index
    %303 = vector.load %arg17[%c0_209, %c142] : memref<8x512xf32, #tpu.memory_space<vmem>>, vector<8x256xf32>
    %304 = arith.truncf %303 : vector<8x256xf32> to vector<8x256xbf16>
    %cst_210 = arith.constant 0.000000e+00 : f32
    %305 = arith.truncf %cst_210 : f32 to bf16
    %306 = vector.shape_cast %18 : vector<1x256xi1> to vector<1x256xi1>
    %307 = vector.broadcast %306 : vector<1x256xi1> to vector<8x256xi1>
    %308 = vector.broadcast %305 : bf16 to vector<8x256xbf16>
    %309 = arith.select %307, %304, %308 : vector<8x256xi1>, vector<8x256xbf16>
    %c3_211 = arith.constant 3 : index
    %c0_212 = arith.constant 0 : index
    %c0_213 = arith.constant 0 : index
    %c0_214 = arith.constant 0 : index
    %310 = vector.load %arg8[%c3_211, %c0_212, %c0_213, %c0_214] : memref<5x5x8x8xbf16, #tpu.memory_space<vmem>>, vector<1x1x8x8xbf16>
    %311 = vector.shape_cast %310 : vector<1x1x8x8xbf16> to vector<8x8xbf16>
    %cst_215 = arith.constant dense<0.000000e+00> : vector<8x256xf32>
    %312 = tpu.matmul %311, %309, %cst_215 {dimension_numbers = #tpu.dot_dimension_numbers<[1], [0], [0], [1], [0, 0, 1, 1], [], []>} : vector<8x8xbf16>, vector<8x256xbf16>, vector<8x256xf32> -> vector<8x256xf32>
    %313 = arith.addf %302, %312 : vector<8x256xf32>
    %c0_216 = arith.constant 0 : index
    %c143_217 = arith.constant 143 : index
    %314 = vector.load %arg17[%c0_216, %c143_217] : memref<8x512xf32, #tpu.memory_space<vmem>>, vector<8x256xf32>
    %315 = arith.truncf %314 : vector<8x256xf32> to vector<8x256xbf16>
    %cst_218 = arith.constant 0.000000e+00 : f32
    %316 = arith.truncf %cst_218 : f32 to bf16
    %317 = vector.shape_cast %20 : vector<1x256xi1> to vector<1x256xi1>
    %318 = vector.broadcast %317 : vector<1x256xi1> to vector<8x256xi1>
    %319 = vector.broadcast %316 : bf16 to vector<8x256xbf16>
    %320 = arith.select %318, %315, %319 : vector<8x256xi1>, vector<8x256xbf16>
    %c3_219 = arith.constant 3 : index
    %c1_220 = arith.constant 1 : index
    %c0_221 = arith.constant 0 : index
    %c0_222 = arith.constant 0 : index
    %321 = vector.load %arg8[%c3_219, %c1_220, %c0_221, %c0_222] : memref<5x5x8x8xbf16, #tpu.memory_space<vmem>>, vector<1x1x8x8xbf16>
    %322 = vector.shape_cast %321 : vector<1x1x8x8xbf16> to vector<8x8xbf16>
    %cst_223 = arith.constant dense<0.000000e+00> : vector<8x256xf32>
    %323 = tpu.matmul %322, %320, %cst_223 {dimension_numbers = #tpu.dot_dimension_numbers<[1], [0], [0], [1], [0, 0, 1, 1], [], []>} : vector<8x8xbf16>, vector<8x256xbf16>, vector<8x256xf32> -> vector<8x256xf32>
    %324 = arith.addf %313, %323 : vector<8x256xf32>
    %c0_224 = arith.constant 0 : index
    %c144_225 = arith.constant 144 : index
    %325 = vector.load %arg17[%c0_224, %c144_225] : memref<8x512xf32, #tpu.memory_space<vmem>>, vector<8x256xf32>
    %326 = arith.truncf %325 : vector<8x256xf32> to vector<8x256xbf16>
    %c3_226 = arith.constant 3 : index
    %c2_227 = arith.constant 2 : index
    %c0_228 = arith.constant 0 : index
    %c0_229 = arith.constant 0 : index
    %327 = vector.load %arg8[%c3_226, %c2_227, %c0_228, %c0_229] : memref<5x5x8x8xbf16, #tpu.memory_space<vmem>>, vector<1x1x8x8xbf16>
    %328 = vector.shape_cast %327 : vector<1x1x8x8xbf16> to vector<8x8xbf16>
    %cst_230 = arith.constant dense<0.000000e+00> : vector<8x256xf32>
    %329 = tpu.matmul %328, %326, %cst_230 {dimension_numbers = #tpu.dot_dimension_numbers<[1], [0], [0], [1], [0, 0, 1, 1], [], []>} : vector<8x8xbf16>, vector<8x256xbf16>, vector<8x256xf32> -> vector<8x256xf32>
    %330 = arith.addf %324, %329 : vector<8x256xf32>
    %c0_231 = arith.constant 0 : index
    %c145_232 = arith.constant 145 : index
    %331 = vector.load %arg17[%c0_231, %c145_232] : memref<8x512xf32, #tpu.memory_space<vmem>>, vector<8x256xf32>
    %332 = arith.truncf %331 : vector<8x256xf32> to vector<8x256xbf16>
    %cst_233 = arith.constant 0.000000e+00 : f32
    %333 = arith.truncf %cst_233 : f32 to bf16
    %334 = vector.shape_cast %22 : vector<1x256xi1> to vector<1x256xi1>
    %335 = vector.broadcast %334 : vector<1x256xi1> to vector<8x256xi1>
    %336 = vector.broadcast %333 : bf16 to vector<8x256xbf16>
    %337 = arith.select %335, %332, %336 : vector<8x256xi1>, vector<8x256xbf16>
    %c3_234 = arith.constant 3 : index
    %c3_235 = arith.constant 3 : index
    %c0_236 = arith.constant 0 : index
    %c0_237 = arith.constant 0 : index
    %338 = vector.load %arg8[%c3_234, %c3_235, %c0_236, %c0_237] : memref<5x5x8x8xbf16, #tpu.memory_space<vmem>>, vector<1x1x8x8xbf16>
    %339 = vector.shape_cast %338 : vector<1x1x8x8xbf16> to vector<8x8xbf16>
    %cst_238 = arith.constant dense<0.000000e+00> : vector<8x256xf32>
    %340 = tpu.matmul %339, %337, %cst_238 {dimension_numbers = #tpu.dot_dimension_numbers<[1], [0], [0], [1], [0, 0, 1, 1], [], []>} : vector<8x8xbf16>, vector<8x256xbf16>, vector<8x256xf32> -> vector<8x256xf32>
    %341 = arith.addf %330, %340 : vector<8x256xf32>
    %c0_239 = arith.constant 0 : index
    %c146 = arith.constant 146 : index
    %342 = vector.load %arg17[%c0_239, %c146] : memref<8x512xf32, #tpu.memory_space<vmem>>, vector<8x256xf32>
    %343 = arith.truncf %342 : vector<8x256xf32> to vector<8x256xbf16>
    %cst_240 = arith.constant 0.000000e+00 : f32
    %344 = arith.truncf %cst_240 : f32 to bf16
    %345 = vector.shape_cast %24 : vector<1x256xi1> to vector<1x256xi1>
    %346 = vector.broadcast %345 : vector<1x256xi1> to vector<8x256xi1>
    %347 = vector.broadcast %344 : bf16 to vector<8x256xbf16>
    %348 = arith.select %346, %343, %347 : vector<8x256xi1>, vector<8x256xbf16>
    %c3_241 = arith.constant 3 : index
    %c4_242 = arith.constant 4 : index
    %c0_243 = arith.constant 0 : index
    %c0_244 = arith.constant 0 : index
    %349 = vector.load %arg8[%c3_241, %c4_242, %c0_243, %c0_244] : memref<5x5x8x8xbf16, #tpu.memory_space<vmem>>, vector<1x1x8x8xbf16>
    %350 = vector.shape_cast %349 : vector<1x1x8x8xbf16> to vector<8x8xbf16>
    %cst_245 = arith.constant dense<0.000000e+00> : vector<8x256xf32>
    %351 = tpu.matmul %350, %348, %cst_245 {dimension_numbers = #tpu.dot_dimension_numbers<[1], [0], [0], [1], [0, 0, 1, 1], [], []>} : vector<8x8xbf16>, vector<8x256xbf16>, vector<8x256xf32> -> vector<8x256xf32>
    %352 = arith.addf %341, %351 : vector<8x256xf32>
    %c0_246 = arith.constant 0 : index
    %c158 = arith.constant 158 : index
    %353 = vector.load %arg17[%c0_246, %c158] : memref<8x512xf32, #tpu.memory_space<vmem>>, vector<8x256xf32>
    %354 = arith.truncf %353 : vector<8x256xf32> to vector<8x256xbf16>
    %cst_247 = arith.constant 0.000000e+00 : f32
    %355 = arith.truncf %cst_247 : f32 to bf16
    %356 = vector.shape_cast %18 : vector<1x256xi1> to vector<1x256xi1>
    %357 = vector.broadcast %356 : vector<1x256xi1> to vector<8x256xi1>
    %358 = vector.broadcast %355 : bf16 to vector<8x256xbf16>
    %359 = arith.select %357, %354, %358 : vector<8x256xi1>, vector<8x256xbf16>
    %c4_248 = arith.constant 4 : index
    %c0_249 = arith.constant 0 : index
    %c0_250 = arith.constant 0 : index
    %c0_251 = arith.constant 0 : index
    %360 = vector.load %arg8[%c4_248, %c0_249, %c0_250, %c0_251] : memref<5x5x8x8xbf16, #tpu.memory_space<vmem>>, vector<1x1x8x8xbf16>
    %361 = vector.shape_cast %360 : vector<1x1x8x8xbf16> to vector<8x8xbf16>
    %cst_252 = arith.constant dense<0.000000e+00> : vector<8x256xf32>
    %362 = tpu.matmul %361, %359, %cst_252 {dimension_numbers = #tpu.dot_dimension_numbers<[1], [0], [0], [1], [0, 0, 1, 1], [], []>} : vector<8x8xbf16>, vector<8x256xbf16>, vector<8x256xf32> -> vector<8x256xf32>
    %363 = arith.addf %352, %362 : vector<8x256xf32>
    %c0_253 = arith.constant 0 : index
    %c159 = arith.constant 159 : index
    %364 = vector.load %arg17[%c0_253, %c159] : memref<8x512xf32, #tpu.memory_space<vmem>>, vector<8x256xf32>
    %365 = arith.truncf %364 : vector<8x256xf32> to vector<8x256xbf16>
    %cst_254 = arith.constant 0.000000e+00 : f32
    %366 = arith.truncf %cst_254 : f32 to bf16
    %367 = vector.shape_cast %20 : vector<1x256xi1> to vector<1x256xi1>
    %368 = vector.broadcast %367 : vector<1x256xi1> to vector<8x256xi1>
    %369 = vector.broadcast %366 : bf16 to vector<8x256xbf16>
    %370 = arith.select %368, %365, %369 : vector<8x256xi1>, vector<8x256xbf16>
    %c4_255 = arith.constant 4 : index
    %c1_256 = arith.constant 1 : index
    %c0_257 = arith.constant 0 : index
    %c0_258 = arith.constant 0 : index
    %371 = vector.load %arg8[%c4_255, %c1_256, %c0_257, %c0_258] : memref<5x5x8x8xbf16, #tpu.memory_space<vmem>>, vector<1x1x8x8xbf16>
    %372 = vector.shape_cast %371 : vector<1x1x8x8xbf16> to vector<8x8xbf16>
    %cst_259 = arith.constant dense<0.000000e+00> : vector<8x256xf32>
    %373 = tpu.matmul %372, %370, %cst_259 {dimension_numbers = #tpu.dot_dimension_numbers<[1], [0], [0], [1], [0, 0, 1, 1], [], []>} : vector<8x8xbf16>, vector<8x256xbf16>, vector<8x256xf32> -> vector<8x256xf32>
    %374 = arith.addf %363, %373 : vector<8x256xf32>
    %c0_260 = arith.constant 0 : index
    %c160 = arith.constant 160 : index
    %375 = vector.load %arg17[%c0_260, %c160] : memref<8x512xf32, #tpu.memory_space<vmem>>, vector<8x256xf32>
    %376 = arith.truncf %375 : vector<8x256xf32> to vector<8x256xbf16>
    %c4_261 = arith.constant 4 : index
    %c2_262 = arith.constant 2 : index
    %c0_263 = arith.constant 0 : index
    %c0_264 = arith.constant 0 : index
    %377 = vector.load %arg8[%c4_261, %c2_262, %c0_263, %c0_264] : memref<5x5x8x8xbf16, #tpu.memory_space<vmem>>, vector<1x1x8x8xbf16>
    %378 = vector.shape_cast %377 : vector<1x1x8x8xbf16> to vector<8x8xbf16>
    %cst_265 = arith.constant dense<0.000000e+00> : vector<8x256xf32>
    %379 = tpu.matmul %378, %376, %cst_265 {dimension_numbers = #tpu.dot_dimension_numbers<[1], [0], [0], [1], [0, 0, 1, 1], [], []>} : vector<8x8xbf16>, vector<8x256xbf16>, vector<8x256xf32> -> vector<8x256xf32>
    %380 = arith.addf %374, %379 : vector<8x256xf32>
    %c0_266 = arith.constant 0 : index
    %c161 = arith.constant 161 : index
    %381 = vector.load %arg17[%c0_266, %c161] : memref<8x512xf32, #tpu.memory_space<vmem>>, vector<8x256xf32>
    %382 = arith.truncf %381 : vector<8x256xf32> to vector<8x256xbf16>
    %cst_267 = arith.constant 0.000000e+00 : f32
    %383 = arith.truncf %cst_267 : f32 to bf16
    %384 = vector.shape_cast %22 : vector<1x256xi1> to vector<1x256xi1>
    %385 = vector.broadcast %384 : vector<1x256xi1> to vector<8x256xi1>
    %386 = vector.broadcast %383 : bf16 to vector<8x256xbf16>
    %387 = arith.select %385, %382, %386 : vector<8x256xi1>, vector<8x256xbf16>
    %c4_268 = arith.constant 4 : index
    %c3_269 = arith.constant 3 : index
    %c0_270 = arith.constant 0 : index
    %c0_271 = arith.constant 0 : index
    %388 = vector.load %arg8[%c4_268, %c3_269, %c0_270, %c0_271] : memref<5x5x8x8xbf16, #tpu.memory_space<vmem>>, vector<1x1x8x8xbf16>
    %389 = vector.shape_cast %388 : vector<1x1x8x8xbf16> to vector<8x8xbf16>
    %cst_272 = arith.constant dense<0.000000e+00> : vector<8x256xf32>
    %390 = tpu.matmul %389, %387, %cst_272 {dimension_numbers = #tpu.dot_dimension_numbers<[1], [0], [0], [1], [0, 0, 1, 1], [], []>} : vector<8x8xbf16>, vector<8x256xbf16>, vector<8x256xf32> -> vector<8x256xf32>
    %391 = arith.addf %380, %390 : vector<8x256xf32>
    %c0_273 = arith.constant 0 : index
    %c162 = arith.constant 162 : index
    %392 = vector.load %arg17[%c0_273, %c162] : memref<8x512xf32, #tpu.memory_space<vmem>>, vector<8x256xf32>
    %393 = arith.truncf %392 : vector<8x256xf32> to vector<8x256xbf16>
    %cst_274 = arith.constant 0.000000e+00 : f32
    %394 = arith.truncf %cst_274 : f32 to bf16
    %395 = vector.shape_cast %24 : vector<1x256xi1> to vector<1x256xi1>
    %396 = vector.broadcast %395 : vector<1x256xi1> to vector<8x256xi1>
    %397 = vector.broadcast %394 : bf16 to vector<8x256xbf16>
    %398 = arith.select %396, %393, %397 : vector<8x256xi1>, vector<8x256xbf16>
    %c4_275 = arith.constant 4 : index
    %c4_276 = arith.constant 4 : index
    %c0_277 = arith.constant 0 : index
    %c0_278 = arith.constant 0 : index
    %399 = vector.load %arg8[%c4_275, %c4_276, %c0_277, %c0_278] : memref<5x5x8x8xbf16, #tpu.memory_space<vmem>>, vector<1x1x8x8xbf16>
    %400 = vector.shape_cast %399 : vector<1x1x8x8xbf16> to vector<8x8xbf16>
    %cst_279 = arith.constant dense<0.000000e+00> : vector<8x256xf32>
    %401 = tpu.matmul %400, %398, %cst_279 {dimension_numbers = #tpu.dot_dimension_numbers<[1], [0], [0], [1], [0, 0, 1, 1], [], []>} : vector<8x8xbf16>, vector<8x256xbf16>, vector<8x256xf32> -> vector<8x256xf32>
    %402 = arith.addf %391, %401 : vector<8x256xf32>
    %c0_280 = arith.constant 0 : index
    %c0_281 = arith.constant 0 : index
    %403 = vector.load %arg9[%c0_280, %c0_281] : memref<8x1xf32, #tpu.memory_space<vmem>>, vector<8x1xf32>
    %404 = vector.broadcast %403 : vector<8x1xf32> to vector<8x256xf32>
    %405 = arith.mulf %402, %404 : vector<8x256xf32>
    %c0_282 = arith.constant 0 : index
    %c0_283 = arith.constant 0 : index
    %406 = vector.load %arg10[%c0_282, %c0_283] : memref<8x1xf32, #tpu.memory_space<vmem>>, vector<8x1xf32>
    %407 = vector.broadcast %406 : vector<8x1xf32> to vector<8x256xf32>
    %408 = arith.addf %405, %407 : vector<8x256xf32>
    %cst_284 = arith.constant 0.000000e+00 : f32
    %409 = vector.broadcast %cst_284 : f32 to vector<8x256xf32>
    %410 = arith.maximumf %408, %409 : vector<8x256xf32>
    %c0_285 = arith.constant 0 : index
    %c16 = arith.constant 16 : index
    %c0_286 = arith.constant 0 : index
    %411 = vector.load %arg14[%c0_285, %c16, %c0_286] : memref<2x32x256xf32, #tpu.memory_space<vmem>>, vector<1x8x256xf32>
    %412 = vector.shape_cast %411 : vector<1x8x256xf32> to vector<8x256xf32>
    %413 = vector.shape_cast %410 : vector<8x256xf32> to vector<1x8x256xf32>
    tpu.vector_store %arg14[%c0_285, %c16, %c0_286], %413 {strides = array<i32>} : memref<2x32x256xf32, #tpu.memory_space<vmem>>, vector<1x8x256xf32>,
    %c0_287 = arith.constant 0 : index
    %c111_288 = arith.constant 111 : index
    %414 = vector.load %arg15[%c0_287, %c111_288] : memref<4x512xf32, #tpu.memory_space<vmem>>, vector<4x256xf32>
    %cst_289 = arith.constant 0xFF800000 : f32
    %415 = vector.shape_cast %20 : vector<1x256xi1> to vector<1x256xi1>
    %416 = vector.broadcast %415 : vector<1x256xi1> to vector<4x256xi1>
    %417 = vector.broadcast %cst_289 : f32 to vector<4x256xf32>
    %418 = arith.select %416, %414, %417 : vector<4x256xi1>, vector<4x256xf32>
    %419 = arith.maximumf %35, %418 : vector<4x256xf32>
    %c0_290 = arith.constant 0 : index
    %c112_291 = arith.constant 112 : index
    %420 = vector.load %arg15[%c0_290, %c112_291] : memref<4x512xf32, #tpu.memory_space<vmem>>, vector<4x256xf32>
    %421 = arith.maximumf %419, %420 : vector<4x256xf32>
    %c0_292 = arith.constant 0 : index
    %c113_293 = arith.constant 113 : index
    %422 = vector.load %arg15[%c0_292, %c113_293] : memref<4x512xf32, #tpu.memory_space<vmem>>, vector<4x256xf32>
    %cst_294 = arith.constant 0xFF800000 : f32
    %423 = vector.shape_cast %22 : vector<1x256xi1> to vector<1x256xi1>
    %424 = vector.broadcast %423 : vector<1x256xi1> to vector<4x256xi1>
    %425 = vector.broadcast %cst_294 : f32 to vector<4x256xf32>
    %426 = arith.select %424, %422, %425 : vector<4x256xi1>, vector<4x256xf32>
    %427 = arith.maximumf %421, %426 : vector<4x256xf32>
    %c0_295 = arith.constant 0 : index
    %c127_296 = arith.constant 127 : index
    %428 = vector.load %arg15[%c0_295, %c127_296] : memref<4x512xf32, #tpu.memory_space<vmem>>, vector<4x256xf32>
    %cst_297 = arith.constant 0xFF800000 : f32
    %429 = vector.shape_cast %20 : vector<1x256xi1> to vector<1x256xi1>
    %430 = vector.broadcast %429 : vector<1x256xi1> to vector<4x256xi1>
    %431 = vector.broadcast %cst_297 : f32 to vector<4x256xf32>
    %432 = arith.select %430, %428, %431 : vector<4x256xi1>, vector<4x256xf32>
    %433 = arith.maximumf %427, %432 : vector<4x256xf32>
    %c0_298 = arith.constant 0 : index
    %c129_299 = arith.constant 129 : index
    %434 = vector.load %arg15[%c0_298, %c129_299] : memref<4x512xf32, #tpu.memory_space<vmem>>, vector<4x256xf32>
    %cst_300 = arith.constant 0xFF800000 : f32
    %435 = vector.shape_cast %22 : vector<1x256xi1> to vector<1x256xi1>
    %436 = vector.broadcast %435 : vector<1x256xi1> to vector<4x256xi1>
    %437 = vector.broadcast %cst_300 : f32 to vector<4x256xf32>
    %438 = arith.select %436, %434, %437 : vector<4x256xi1>, vector<4x256xf32>
    %439 = arith.maximumf %433, %438 : vector<4x256xf32>
    %c0_301 = arith.constant 0 : index
    %c143_302 = arith.constant 143 : index
    %440 = vector.load %arg15[%c0_301, %c143_302] : memref<4x512xf32, #tpu.memory_space<vmem>>, vector<4x256xf32>
    %cst_303 = arith.constant 0xFF800000 : f32
    %441 = vector.shape_cast %20 : vector<1x256xi1> to vector<1x256xi1>
    %442 = vector.broadcast %441 : vector<1x256xi1> to vector<4x256xi1>
    %443 = vector.broadcast %cst_303 : f32 to vector<4x256xf32>
    %444 = arith.select %442, %440, %443 : vector<4x256xi1>, vector<4x256xf32>
    %445 = arith.maximumf %439, %444 : vector<4x256xf32>
    %c0_304 = arith.constant 0 : index
    %c144_305 = arith.constant 144 : index
    %446 = vector.load %arg15[%c0_304, %c144_305] : memref<4x512xf32, #tpu.memory_space<vmem>>, vector<4x256xf32>
    %447 = arith.maximumf %445, %446 : vector<4x256xf32>
    %c0_306 = arith.constant 0 : index
    %c145_307 = arith.constant 145 : index
    %448 = vector.load %arg15[%c0_306, %c145_307] : memref<4x512xf32, #tpu.memory_space<vmem>>, vector<4x256xf32>
    %cst_308 = arith.constant 0xFF800000 : f32
    %449 = vector.shape_cast %22 : vector<1x256xi1> to vector<1x256xi1>
    %450 = vector.broadcast %449 : vector<1x256xi1> to vector<4x256xi1>
    %451 = vector.broadcast %cst_308 : f32 to vector<4x256xf32>
    %452 = arith.select %450, %448, %451 : vector<4x256xi1>, vector<4x256xf32>
    %453 = arith.maximumf %447, %452 : vector<4x256xf32>
    %c0_309 = arith.constant 0 : index
    %c0_310 = arith.constant 0 : index
    %454 = vector.load %arg11[%c0_309, %c0_310] : memref<8x4xbf16, #tpu.memory_space<vmem>>, vector<8x4xbf16>
    %455 = arith.truncf %453 : vector<4x256xf32> to vector<4x256xbf16>
    %cst_311 = arith.constant dense<0.000000e+00> : vector<8x256xf32>
    %456 = tpu.matmul %454, %455, %cst_311 {dimension_numbers = #tpu.dot_dimension_numbers<[1], [0], [0], [1], [0, 0, 1, 1], [], []>} : vector<8x4xbf16>, vector<4x256xbf16>, vector<8x256xf32> -> vector<8x256xf32>
    %c0_312 = arith.constant 0 : index
    %c0_313 = arith.constant 0 : index
    %457 = vector.load %arg12[%c0_312, %c0_313] : memref<8x1xf32, #tpu.memory_space<vmem>>, vector<8x1xf32>
    %458 = vector.broadcast %457 : vector<8x1xf32> to vector<8x256xf32>
    %459 = arith.mulf %456, %458 : vector<8x256xf32>
    %c0_314 = arith.constant 0 : index
    %c0_315 = arith.constant 0 : index
    %460 = vector.load %arg13[%c0_314, %c0_315] : memref<8x1xf32, #tpu.memory_space<vmem>>, vector<8x1xf32>
    %461 = vector.broadcast %460 : vector<8x1xf32> to vector<8x256xf32>
    %462 = arith.addf %459, %461 : vector<8x256xf32>
    %cst_316 = arith.constant 0.000000e+00 : f32
    %463 = vector.broadcast %cst_316 : f32 to vector<8x256xf32>
    %464 = arith.maximumf %462, %463 : vector<8x256xf32>
    %c0_317 = arith.constant 0 : index
    %c24 = arith.constant 24 : index
    %c0_318 = arith.constant 0 : index
    %465 = vector.load %arg14[%c0_317, %c24, %c0_318] : memref<2x32x256xf32, #tpu.memory_space<vmem>>, vector<1x8x256xf32>
    %466 = vector.shape_cast %465 : vector<1x8x256xf32> to vector<8x256xf32>
    %467 = vector.shape_cast %464 : vector<8x256xf32> to vector<1x8x256xf32>
    tpu.vector_store %arg14[%c0_317, %c24, %c0_318], %467 {strides = array<i32>} : memref<2x32x256xf32, #tpu.memory_space<vmem>>, vector<1x8x256xf32>,
    %c1_319 = arith.constant 1 : index
    %c0_320 = arith.constant 0 : index
    %c0_321 = arith.constant 0 : index
    %468 = vector.load %arg1[%c1_319, %c0_320, %c0_321] : memref<2x4x256xf32, #tpu.memory_space<vmem>>, vector<1x4x256xf32>
    %469 = vector.shape_cast %468 : vector<1x4x256xf32> to vector<4x256xf32>
    %470 = arith.truncf %469 : vector<4x256xf32> to vector<4x256xbf16>
    %c0_322 = arith.constant 0 : index
    %c0_323 = arith.constant 0 : index
    %471 = vector.load %arg2[%c0_322, %c0_323] : memref<24x4xbf16, #tpu.memory_space<vmem>>, vector<24x4xbf16>
    %cst_324 = arith.constant dense<0.000000e+00> : vector<24x256xf32>
    %472 = tpu.matmul %471, %470, %cst_324 {dimension_numbers = #tpu.dot_dimension_numbers<[1], [0], [0], [1], [0, 0, 1, 1], [], []>} : vector<24x4xbf16>, vector<4x256xbf16>, vector<24x256xf32> -> vector<24x256xf32>
    %c0_325 = arith.constant 0 : index
    %c0_326 = arith.constant 0 : index
    %473 = vector.load %arg3[%c0_325, %c0_326] : memref<24x1xf32, #tpu.memory_space<vmem>>, vector<24x1xf32>
    %474 = vector.broadcast %473 : vector<24x1xf32> to vector<24x256xf32>
    %475 = arith.mulf %472, %474 : vector<24x256xf32>
    %c0_327 = arith.constant 0 : index
    %c0_328 = arith.constant 0 : index
    %476 = vector.load %arg4[%c0_327, %c0_328] : memref<24x1xf32, #tpu.memory_space<vmem>>, vector<24x1xf32>
    %477 = vector.broadcast %476 : vector<24x1xf32> to vector<24x256xf32>
    %478 = arith.addf %475, %477 : vector<24x256xf32>
    %cst_329 = arith.constant 0.000000e+00 : f32
    %479 = vector.broadcast %cst_329 : f32 to vector<24x256xf32>
    %480 = arith.maximumf %478, %479 : vector<24x256xf32>
    %481 = vector.extract_strided_slice %480 {offsets = [0, 0], sizes = [8, 256], strides = [1, 1]} : vector<24x256xf32> to vector<8x256xf32>
    %c1_330 = arith.constant 1 : index
    %c0_331 = arith.constant 0 : index
    %c0_332 = arith.constant 0 : index
    %482 = vector.load %arg14[%c1_330, %c0_331, %c0_332] : memref<2x32x256xf32, #tpu.memory_space<vmem>>, vector<1x8x256xf32>
    %483 = vector.shape_cast %482 : vector<1x8x256xf32> to vector<8x256xf32>
    %484 = vector.shape_cast %481 : vector<8x256xf32> to vector<1x8x256xf32>
    tpu.vector_store %arg14[%c1_330, %c0_331, %c0_332], %484 {strides = array<i32>} : memref<2x32x256xf32, #tpu.memory_space<vmem>>, vector<1x8x256xf32>,
    %485 = vector.extract_strided_slice %480 {offsets = [8, 0], sizes = [8, 256], strides = [1, 1]} : vector<24x256xf32> to vector<8x256xf32>
    %c0_333 = arith.constant 0 : index
    %c128_334 = arith.constant 128 : index
    %486 = vector.load %arg16[%c0_333, %c128_334] : memref<8x512xf32, #tpu.memory_space<vmem>>, vector<8x256xf32>
    tpu.vector_store %arg16[%c0_333, %c128_334], %485 {strides = array<i32>} : memref<8x512xf32, #tpu.memory_space<vmem>>, vector<8x256xf32>,
    %487 = vector.extract_strided_slice %480 {offsets = [16, 0], sizes = [8, 256], strides = [1, 1]} : vector<24x256xf32> to vector<8x256xf32>
    %c0_335 = arith.constant 0 : index
    %c128_336 = arith.constant 128 : index
    %488 = vector.load %arg17[%c0_335, %c128_336] : memref<8x512xf32, #tpu.memory_space<vmem>>, vector<8x256xf32>
    tpu.vector_store %arg17[%c0_335, %c128_336], %487 {strides = array<i32>} : memref<8x512xf32, #tpu.memory_space<vmem>>, vector<8x256xf32>,
    %c0_337 = arith.constant 0 : index
    %c128_338 = arith.constant 128 : index
    %489 = vector.load %arg15[%c0_337, %c128_338] : memref<4x512xf32, #tpu.memory_space<vmem>>, vector<4x256xf32>
    tpu.vector_store %arg15[%c0_337, %c128_338], %469 {strides = array<i32>} : memref<4x512xf32, #tpu.memory_space<vmem>>, vector<4x256xf32>,
    %cst_339 = arith.constant 0.000000e+00 : f32
    %490 = vector.broadcast %cst_339 : f32 to vector<8x256xf32>
    %c0_340 = arith.constant 0 : index
    %c111_341 = arith.constant 111 : index
    %491 = vector.load %arg16[%c0_340, %c111_341] : memref<8x512xf32, #tpu.memory_space<vmem>>, vector<8x256xf32>
    %492 = arith.truncf %491 : vector<8x256xf32> to vector<8x256xbf16>
    %cst_342 = arith.constant 0.000000e+00 : f32
    %493 = arith.truncf %cst_342 : f32 to bf16
    %494 = vector.shape_cast %20 : vector<1x256xi1> to vector<1x256xi1>
    %495 = vector.broadcast %494 : vector<1x256xi1> to vector<8x256xi1>
    %496 = vector.broadcast %493 : bf16 to vector<8x256xbf16>
    %497 = arith.select %495, %492, %496 : vector<8x256xi1>, vector<8x256xbf16>
    %c0_343 = arith.constant 0 : index
    %c0_344 = arith.constant 0 : index
    %c0_345 = arith.constant 0 : index
    %c0_346 = arith.constant 0 : index
    %498 = vector.load %arg5[%c0_343, %c0_344, %c0_345, %c0_346] : memref<3x3x8x8xbf16, #tpu.memory_space<vmem>>, vector<1x1x8x8xbf16>
    %499 = vector.shape_cast %498 : vector<1x1x8x8xbf16> to vector<8x8xbf16>
    %cst_347 = arith.constant dense<0.000000e+00> : vector<8x256xf32>
    %500 = tpu.matmul %499, %497, %cst_347 {dimension_numbers = #tpu.dot_dimension_numbers<[1], [0], [0], [1], [0, 0, 1, 1], [], []>} : vector<8x8xbf16>, vector<8x256xbf16>, vector<8x256xf32> -> vector<8x256xf32>
    %501 = arith.addf %490, %500 : vector<8x256xf32>
    %c0_348 = arith.constant 0 : index
    %c112_349 = arith.constant 112 : index
    %502 = vector.load %arg16[%c0_348, %c112_349] : memref<8x512xf32, #tpu.memory_space<vmem>>, vector<8x256xf32>
    %503 = arith.truncf %502 : vector<8x256xf32> to vector<8x256xbf16>
    %c0_350 = arith.constant 0 : index
    %c1_351 = arith.constant 1 : index
    %c0_352 = arith.constant 0 : index
    %c0_353 = arith.constant 0 : index
    %504 = vector.load %arg5[%c0_350, %c1_351, %c0_352, %c0_353] : memref<3x3x8x8xbf16, #tpu.memory_space<vmem>>, vector<1x1x8x8xbf16>
    %505 = vector.shape_cast %504 : vector<1x1x8x8xbf16> to vector<8x8xbf16>
    %cst_354 = arith.constant dense<0.000000e+00> : vector<8x256xf32>
    %506 = tpu.matmul %505, %503, %cst_354 {dimension_numbers = #tpu.dot_dimension_numbers<[1], [0], [0], [1], [0, 0, 1, 1], [], []>} : vector<8x8xbf16>, vector<8x256xbf16>, vector<8x256xf32> -> vector<8x256xf32>
    %507 = arith.addf %501, %506 : vector<8x256xf32>
    %c0_355 = arith.constant 0 : index
    %c113_356 = arith.constant 113 : index
    %508 = vector.load %arg16[%c0_355, %c113_356] : memref<8x512xf32, #tpu.memory_space<vmem>>, vector<8x256xf32>
    %509 = arith.truncf %508 : vector<8x256xf32> to vector<8x256xbf16>
    %cst_357 = arith.constant 0.000000e+00 : f32
    %510 = arith.truncf %cst_357 : f32 to bf16
    %511 = vector.shape_cast %22 : vector<1x256xi1> to vector<1x256xi1>
    %512 = vector.broadcast %511 : vector<1x256xi1> to vector<8x256xi1>
    %513 = vector.broadcast %510 : bf16 to vector<8x256xbf16>
    %514 = arith.select %512, %509, %513 : vector<8x256xi1>, vector<8x256xbf16>
    %c0_358 = arith.constant 0 : index
    %c2_359 = arith.constant 2 : index
    %c0_360 = arith.constant 0 : index
    %c0_361 = arith.constant 0 : index
    %515 = vector.load %arg5[%c0_358, %c2_359, %c0_360, %c0_361] : memref<3x3x8x8xbf16, #tpu.memory_space<vmem>>, vector<1x1x8x8xbf16>
    %516 = vector.shape_cast %515 : vector<1x1x8x8xbf16> to vector<8x8xbf16>
    %cst_362 = arith.constant dense<0.000000e+00> : vector<8x256xf32>
    %517 = tpu.matmul %516, %514, %cst_362 {dimension_numbers = #tpu.dot_dimension_numbers<[1], [0], [0], [1], [0, 0, 1, 1], [], []>} : vector<8x8xbf16>, vector<8x256xbf16>, vector<8x256xf32> -> vector<8x256xf32>
    %518 = arith.addf %507, %517 : vector<8x256xf32>
    %c0_363 = arith.constant 0 : index
    %c127_364 = arith.constant 127 : index
    %519 = vector.load %arg16[%c0_363, %c127_364] : memref<8x512xf32, #tpu.memory_space<vmem>>, vector<8x256xf32>
    %520 = arith.truncf %519 : vector<8x256xf32> to vector<8x256xbf16>
    %cst_365 = arith.constant 0.000000e+00 : f32
    %521 = arith.truncf %cst_365 : f32 to bf16
    %522 = vector.shape_cast %20 : vector<1x256xi1> to vector<1x256xi1>
    %523 = vector.broadcast %522 : vector<1x256xi1> to vector<8x256xi1>
    %524 = vector.broadcast %521 : bf16 to vector<8x256xbf16>
    %525 = arith.select %523, %520, %524 : vector<8x256xi1>, vector<8x256xbf16>
    %c1_366 = arith.constant 1 : index
    %c0_367 = arith.constant 0 : index
    %c0_368 = arith.constant 0 : index
    %c0_369 = arith.constant 0 : index
    %526 = vector.load %arg5[%c1_366, %c0_367, %c0_368, %c0_369] : memref<3x3x8x8xbf16, #tpu.memory_space<vmem>>, vector<1x1x8x8xbf16>
    %527 = vector.shape_cast %526 : vector<1x1x8x8xbf16> to vector<8x8xbf16>
    %cst_370 = arith.constant dense<0.000000e+00> : vector<8x256xf32>
    %528 = tpu.matmul %527, %525, %cst_370 {dimension_numbers = #tpu.dot_dimension_numbers<[1], [0], [0], [1], [0, 0, 1, 1], [], []>} : vector<8x8xbf16>, vector<8x256xbf16>, vector<8x256xf32> -> vector<8x256xf32>
    %529 = arith.addf %518, %528 : vector<8x256xf32>
    %c0_371 = arith.constant 0 : index
    %c128_372 = arith.constant 128 : index
    %530 = vector.load %arg16[%c0_371, %c128_372] : memref<8x512xf32, #tpu.memory_space<vmem>>, vector<8x256xf32>
    %531 = arith.truncf %530 : vector<8x256xf32> to vector<8x256xbf16>
    %c1_373 = arith.constant 1 : index
    %c1_374 = arith.constant 1 : index
    %c0_375 = arith.constant 0 : index
    %c0_376 = arith.constant 0 : index
    %532 = vector.load %arg5[%c1_373, %c1_374, %c0_375, %c0_376] : memref<3x3x8x8xbf16, #tpu.memory_space<vmem>>, vector<1x1x8x8xbf16>
    %533 = vector.shape_cast %532 : vector<1x1x8x8xbf16> to vector<8x8xbf16>
    %cst_377 = arith.constant dense<0.000000e+00> : vector<8x256xf32>
    %534 = tpu.matmul %533, %531, %cst_377 {dimension_numbers = #tpu.dot_dimension_numbers<[1], [0], [0], [1], [0, 0, 1, 1], [], []>} : vector<8x8xbf16>, vector<8x256xbf16>, vector<8x256xf32> -> vector<8x256xf32>
    %535 = arith.addf %529, %534 : vector<8x256xf32>
    %c0_378 = arith.constant 0 : index
    %c129_379 = arith.constant 129 : index
    %536 = vector.load %arg16[%c0_378, %c129_379] : memref<8x512xf32, #tpu.memory_space<vmem>>, vector<8x256xf32>
    %537 = arith.truncf %536 : vector<8x256xf32> to vector<8x256xbf16>
    %cst_380 = arith.constant 0.000000e+00 : f32
    %538 = arith.truncf %cst_380 : f32 to bf16
    %539 = vector.shape_cast %22 : vector<1x256xi1> to vector<1x256xi1>
    %540 = vector.broadcast %539 : vector<1x256xi1> to vector<8x256xi1>
    %541 = vector.broadcast %538 : bf16 to vector<8x256xbf16>
    %542 = arith.select %540, %537, %541 : vector<8x256xi1>, vector<8x256xbf16>
    %c1_381 = arith.constant 1 : index
    %c2_382 = arith.constant 2 : index
    %c0_383 = arith.constant 0 : index
    %c0_384 = arith.constant 0 : index
    %543 = vector.load %arg5[%c1_381, %c2_382, %c0_383, %c0_384] : memref<3x3x8x8xbf16, #tpu.memory_space<vmem>>, vector<1x1x8x8xbf16>
    %544 = vector.shape_cast %543 : vector<1x1x8x8xbf16> to vector<8x8xbf16>
    %cst_385 = arith.constant dense<0.000000e+00> : vector<8x256xf32>
    %545 = tpu.matmul %544, %542, %cst_385 {dimension_numbers = #tpu.dot_dimension_numbers<[1], [0], [0], [1], [0, 0, 1, 1], [], []>} : vector<8x8xbf16>, vector<8x256xbf16>, vector<8x256xf32> -> vector<8x256xf32>
    %546 = arith.addf %535, %545 : vector<8x256xf32>
    %c0_386 = arith.constant 0 : index
    %c143_387 = arith.constant 143 : index
    %547 = vector.load %arg16[%c0_386, %c143_387] : memref<8x512xf32, #tpu.memory_space<vmem>>, vector<8x256xf32>
    %548 = arith.truncf %547 : vector<8x256xf32> to vector<8x256xbf16>
    %cst_388 = arith.constant 0.000000e+00 : f32
    %549 = arith.truncf %cst_388 : f32 to bf16
    %550 = vector.shape_cast %20 : vector<1x256xi1> to vector<1x256xi1>
    %551 = vector.broadcast %550 : vector<1x256xi1> to vector<8x256xi1>
    %552 = vector.broadcast %549 : bf16 to vector<8x256xbf16>
    %553 = arith.select %551, %548, %552 : vector<8x256xi1>, vector<8x256xbf16>
    %c2_389 = arith.constant 2 : index
    %c0_390 = arith.constant 0 : index
    %c0_391 = arith.constant 0 : index
    %c0_392 = arith.constant 0 : index
    %554 = vector.load %arg5[%c2_389, %c0_390, %c0_391, %c0_392] : memref<3x3x8x8xbf16, #tpu.memory_space<vmem>>, vector<1x1x8x8xbf16>
    %555 = vector.shape_cast %554 : vector<1x1x8x8xbf16> to vector<8x8xbf16>
    %cst_393 = arith.constant dense<0.000000e+00> : vector<8x256xf32>
    %556 = tpu.matmul %555, %553, %cst_393 {dimension_numbers = #tpu.dot_dimension_numbers<[1], [0], [0], [1], [0, 0, 1, 1], [], []>} : vector<8x8xbf16>, vector<8x256xbf16>, vector<8x256xf32> -> vector<8x256xf32>
    %557 = arith.addf %546, %556 : vector<8x256xf32>
    %c0_394 = arith.constant 0 : index
    %c144_395 = arith.constant 144 : index
    %558 = vector.load %arg16[%c0_394, %c144_395] : memref<8x512xf32, #tpu.memory_space<vmem>>, vector<8x256xf32>
    %559 = arith.truncf %558 : vector<8x256xf32> to vector<8x256xbf16>
    %c2_396 = arith.constant 2 : index
    %c1_397 = arith.constant 1 : index
    %c0_398 = arith.constant 0 : index
    %c0_399 = arith.constant 0 : index
    %560 = vector.load %arg5[%c2_396, %c1_397, %c0_398, %c0_399] : memref<3x3x8x8xbf16, #tpu.memory_space<vmem>>, vector<1x1x8x8xbf16>
    %561 = vector.shape_cast %560 : vector<1x1x8x8xbf16> to vector<8x8xbf16>
    %cst_400 = arith.constant dense<0.000000e+00> : vector<8x256xf32>
    %562 = tpu.matmul %561, %559, %cst_400 {dimension_numbers = #tpu.dot_dimension_numbers<[1], [0], [0], [1], [0, 0, 1, 1], [], []>} : vector<8x8xbf16>, vector<8x256xbf16>, vector<8x256xf32> -> vector<8x256xf32>
    %563 = arith.addf %557, %562 : vector<8x256xf32>
    %c0_401 = arith.constant 0 : index
    %c145_402 = arith.constant 145 : index
    %564 = vector.load %arg16[%c0_401, %c145_402] : memref<8x512xf32, #tpu.memory_space<vmem>>, vector<8x256xf32>
    %565 = arith.truncf %564 : vector<8x256xf32> to vector<8x256xbf16>
    %cst_403 = arith.constant 0.000000e+00 : f32
    %566 = arith.truncf %cst_403 : f32 to bf16
    %567 = vector.shape_cast %22 : vector<1x256xi1> to vector<1x256xi1>
    %568 = vector.broadcast %567 : vector<1x256xi1> to vector<8x256xi1>
    %569 = vector.broadcast %566 : bf16 to vector<8x256xbf16>
    %570 = arith.select %568, %565, %569 : vector<8x256xi1>, vector<8x256xbf16>
    %c2_404 = arith.constant 2 : index
    %c2_405 = arith.constant 2 : index
    %c0_406 = arith.constant 0 : index
    %c0_407 = arith.constant 0 : index
    %571 = vector.load %arg5[%c2_404, %c2_405, %c0_406, %c0_407] : memref<3x3x8x8xbf16, #tpu.memory_space<vmem>>, vector<1x1x8x8xbf16>
    %572 = vector.shape_cast %571 : vector<1x1x8x8xbf16> to vector<8x8xbf16>
    %cst_408 = arith.constant dense<0.000000e+00> : vector<8x256xf32>
    %573 = tpu.matmul %572, %570, %cst_408 {dimension_numbers = #tpu.dot_dimension_numbers<[1], [0], [0], [1], [0, 0, 1, 1], [], []>} : vector<8x8xbf16>, vector<8x256xbf16>, vector<8x256xf32> -> vector<8x256xf32>
    %574 = arith.addf %563, %573 : vector<8x256xf32>
    %c0_409 = arith.constant 0 : index
    %c0_410 = arith.constant 0 : index
    %575 = vector.load %arg6[%c0_409, %c0_410] : memref<8x1xf32, #tpu.memory_space<vmem>>, vector<8x1xf32>
    %576 = vector.broadcast %575 : vector<8x1xf32> to vector<8x256xf32>
    %577 = arith.mulf %574, %576 : vector<8x256xf32>
    %c0_411 = arith.constant 0 : index
    %c0_412 = arith.constant 0 : index
    %578 = vector.load %arg7[%c0_411, %c0_412] : memref<8x1xf32, #tpu.memory_space<vmem>>, vector<8x1xf32>
    %579 = vector.broadcast %578 : vector<8x1xf32> to vector<8x256xf32>
    %580 = arith.addf %577, %579 : vector<8x256xf32>
    %cst_413 = arith.constant 0.000000e+00 : f32
    %581 = vector.broadcast %cst_413 : f32 to vector<8x256xf32>
    %582 = arith.maximumf %580, %581 : vector<8x256xf32>
    %c1_414 = arith.constant 1 : index
    %c8_415 = arith.constant 8 : index
    %c0_416 = arith.constant 0 : index
    %583 = vector.load %arg14[%c1_414, %c8_415, %c0_416] : memref<2x32x256xf32, #tpu.memory_space<vmem>>, vector<1x8x256xf32>
    %584 = vector.shape_cast %583 : vector<1x8x256xf32> to vector<8x256xf32>
    %585 = vector.shape_cast %582 : vector<8x256xf32> to vector<1x8x256xf32>
    tpu.vector_store %arg14[%c1_414, %c8_415, %c0_416], %585 {strides = array<i32>} : memref<2x32x256xf32, #tpu.memory_space<vmem>>, vector<1x8x256xf32>,
    %cst_417 = arith.constant 0.000000e+00 : f32
    %586 = vector.broadcast %cst_417 : f32 to vector<8x256xf32>
    %c0_418 = arith.constant 0 : index
    %c94_419 = arith.constant 94 : index
    %587 = vector.load %arg17[%c0_418, %c94_419] : memref<8x512xf32, #tpu.memory_space<vmem>>, vector<8x256xf32>
    %588 = arith.truncf %587 : vector<8x256xf32> to vector<8x256xbf16>
    %cst_420 = arith.constant 0.000000e+00 : f32
    %589 = arith.truncf %cst_420 : f32 to bf16
    %590 = vector.shape_cast %18 : vector<1x256xi1> to vector<1x256xi1>
    %591 = vector.broadcast %590 : vector<1x256xi1> to vector<8x256xi1>
    %592 = vector.broadcast %589 : bf16 to vector<8x256xbf16>
    %593 = arith.select %591, %588, %592 : vector<8x256xi1>, vector<8x256xbf16>
    %c0_421 = arith.constant 0 : index
    %c0_422 = arith.constant 0 : index
    %c0_423 = arith.constant 0 : index
    %c0_424 = arith.constant 0 : index
    %594 = vector.load %arg8[%c0_421, %c0_422, %c0_423, %c0_424] : memref<5x5x8x8xbf16, #tpu.memory_space<vmem>>, vector<1x1x8x8xbf16>
    %595 = vector.shape_cast %594 : vector<1x1x8x8xbf16> to vector<8x8xbf16>
    %cst_425 = arith.constant dense<0.000000e+00> : vector<8x256xf32>
    %596 = tpu.matmul %595, %593, %cst_425 {dimension_numbers = #tpu.dot_dimension_numbers<[1], [0], [0], [1], [0, 0, 1, 1], [], []>} : vector<8x8xbf16>, vector<8x256xbf16>, vector<8x256xf32> -> vector<8x256xf32>
    %597 = arith.addf %586, %596 : vector<8x256xf32>
    %c0_426 = arith.constant 0 : index
    %c95_427 = arith.constant 95 : index
    %598 = vector.load %arg17[%c0_426, %c95_427] : memref<8x512xf32, #tpu.memory_space<vmem>>, vector<8x256xf32>
    %599 = arith.truncf %598 : vector<8x256xf32> to vector<8x256xbf16>
    %cst_428 = arith.constant 0.000000e+00 : f32
    %600 = arith.truncf %cst_428 : f32 to bf16
    %601 = vector.shape_cast %20 : vector<1x256xi1> to vector<1x256xi1>
    %602 = vector.broadcast %601 : vector<1x256xi1> to vector<8x256xi1>
    %603 = vector.broadcast %600 : bf16 to vector<8x256xbf16>
    %604 = arith.select %602, %599, %603 : vector<8x256xi1>, vector<8x256xbf16>
    %c0_429 = arith.constant 0 : index
    %c1_430 = arith.constant 1 : index
    %c0_431 = arith.constant 0 : index
    %c0_432 = arith.constant 0 : index
    %605 = vector.load %arg8[%c0_429, %c1_430, %c0_431, %c0_432] : memref<5x5x8x8xbf16, #tpu.memory_space<vmem>>, vector<1x1x8x8xbf16>
    %606 = vector.shape_cast %605 : vector<1x1x8x8xbf16> to vector<8x8xbf16>
    %cst_433 = arith.constant dense<0.000000e+00> : vector<8x256xf32>
    %607 = tpu.matmul %606, %604, %cst_433 {dimension_numbers = #tpu.dot_dimension_numbers<[1], [0], [0], [1], [0, 0, 1, 1], [], []>} : vector<8x8xbf16>, vector<8x256xbf16>, vector<8x256xf32> -> vector<8x256xf32>
    %608 = arith.addf %597, %607 : vector<8x256xf32>
    %c0_434 = arith.constant 0 : index
    %c96_435 = arith.constant 96 : index
    %609 = vector.load %arg17[%c0_434, %c96_435] : memref<8x512xf32, #tpu.memory_space<vmem>>, vector<8x256xf32>
    %610 = arith.truncf %609 : vector<8x256xf32> to vector<8x256xbf16>
    %c0_436 = arith.constant 0 : index
    %c2_437 = arith.constant 2 : index
    %c0_438 = arith.constant 0 : index
    %c0_439 = arith.constant 0 : index
    %611 = vector.load %arg8[%c0_436, %c2_437, %c0_438, %c0_439] : memref<5x5x8x8xbf16, #tpu.memory_space<vmem>>, vector<1x1x8x8xbf16>
    %612 = vector.shape_cast %611 : vector<1x1x8x8xbf16> to vector<8x8xbf16>
    %cst_440 = arith.constant dense<0.000000e+00> : vector<8x256xf32>
    %613 = tpu.matmul %612, %610, %cst_440 {dimension_numbers = #tpu.dot_dimension_numbers<[1], [0], [0], [1], [0, 0, 1, 1], [], []>} : vector<8x8xbf16>, vector<8x256xbf16>, vector<8x256xf32> -> vector<8x256xf32>
    %614 = arith.addf %608, %613 : vector<8x256xf32>
    %c0_441 = arith.constant 0 : index
    %c97_442 = arith.constant 97 : index
    %615 = vector.load %arg17[%c0_441, %c97_442] : memref<8x512xf32, #tpu.memory_space<vmem>>, vector<8x256xf32>
    %616 = arith.truncf %615 : vector<8x256xf32> to vector<8x256xbf16>
    %cst_443 = arith.constant 0.000000e+00 : f32
    %617 = arith.truncf %cst_443 : f32 to bf16
    %618 = vector.shape_cast %22 : vector<1x256xi1> to vector<1x256xi1>
    %619 = vector.broadcast %618 : vector<1x256xi1> to vector<8x256xi1>
    %620 = vector.broadcast %617 : bf16 to vector<8x256xbf16>
    %621 = arith.select %619, %616, %620 : vector<8x256xi1>, vector<8x256xbf16>
    %c0_444 = arith.constant 0 : index
    %c3_445 = arith.constant 3 : index
    %c0_446 = arith.constant 0 : index
    %c0_447 = arith.constant 0 : index
    %622 = vector.load %arg8[%c0_444, %c3_445, %c0_446, %c0_447] : memref<5x5x8x8xbf16, #tpu.memory_space<vmem>>, vector<1x1x8x8xbf16>
    %623 = vector.shape_cast %622 : vector<1x1x8x8xbf16> to vector<8x8xbf16>
    %cst_448 = arith.constant dense<0.000000e+00> : vector<8x256xf32>
    %624 = tpu.matmul %623, %621, %cst_448 {dimension_numbers = #tpu.dot_dimension_numbers<[1], [0], [0], [1], [0, 0, 1, 1], [], []>} : vector<8x8xbf16>, vector<8x256xbf16>, vector<8x256xf32> -> vector<8x256xf32>
    %625 = arith.addf %614, %624 : vector<8x256xf32>
    %c0_449 = arith.constant 0 : index
    %c98_450 = arith.constant 98 : index
    %626 = vector.load %arg17[%c0_449, %c98_450] : memref<8x512xf32, #tpu.memory_space<vmem>>, vector<8x256xf32>
    %627 = arith.truncf %626 : vector<8x256xf32> to vector<8x256xbf16>
    %cst_451 = arith.constant 0.000000e+00 : f32
    %628 = arith.truncf %cst_451 : f32 to bf16
    %629 = vector.shape_cast %24 : vector<1x256xi1> to vector<1x256xi1>
    %630 = vector.broadcast %629 : vector<1x256xi1> to vector<8x256xi1>
    %631 = vector.broadcast %628 : bf16 to vector<8x256xbf16>
    %632 = arith.select %630, %627, %631 : vector<8x256xi1>, vector<8x256xbf16>
    %c0_452 = arith.constant 0 : index
    %c4_453 = arith.constant 4 : index
    %c0_454 = arith.constant 0 : index
    %c0_455 = arith.constant 0 : index
    %633 = vector.load %arg8[%c0_452, %c4_453, %c0_454, %c0_455] : memref<5x5x8x8xbf16, #tpu.memory_space<vmem>>, vector<1x1x8x8xbf16>
    %634 = vector.shape_cast %633 : vector<1x1x8x8xbf16> to vector<8x8xbf16>
    %cst_456 = arith.constant dense<0.000000e+00> : vector<8x256xf32>
    %635 = tpu.matmul %634, %632, %cst_456 {dimension_numbers = #tpu.dot_dimension_numbers<[1], [0], [0], [1], [0, 0, 1, 1], [], []>} : vector<8x8xbf16>, vector<8x256xbf16>, vector<8x256xf32> -> vector<8x256xf32>
    %636 = arith.addf %625, %635 : vector<8x256xf32>
    %c0_457 = arith.constant 0 : index
    %c110_458 = arith.constant 110 : index
    %637 = vector.load %arg17[%c0_457, %c110_458] : memref<8x512xf32, #tpu.memory_space<vmem>>, vector<8x256xf32>
    %638 = arith.truncf %637 : vector<8x256xf32> to vector<8x256xbf16>
    %cst_459 = arith.constant 0.000000e+00 : f32
    %639 = arith.truncf %cst_459 : f32 to bf16
    %640 = vector.shape_cast %18 : vector<1x256xi1> to vector<1x256xi1>
    %641 = vector.broadcast %640 : vector<1x256xi1> to vector<8x256xi1>
    %642 = vector.broadcast %639 : bf16 to vector<8x256xbf16>
    %643 = arith.select %641, %638, %642 : vector<8x256xi1>, vector<8x256xbf16>
    %c1_460 = arith.constant 1 : index
    %c0_461 = arith.constant 0 : index
    %c0_462 = arith.constant 0 : index
    %c0_463 = arith.constant 0 : index
    %644 = vector.load %arg8[%c1_460, %c0_461, %c0_462, %c0_463] : memref<5x5x8x8xbf16, #tpu.memory_space<vmem>>, vector<1x1x8x8xbf16>
    %645 = vector.shape_cast %644 : vector<1x1x8x8xbf16> to vector<8x8xbf16>
    %cst_464 = arith.constant dense<0.000000e+00> : vector<8x256xf32>
    %646 = tpu.matmul %645, %643, %cst_464 {dimension_numbers = #tpu.dot_dimension_numbers<[1], [0], [0], [1], [0, 0, 1, 1], [], []>} : vector<8x8xbf16>, vector<8x256xbf16>, vector<8x256xf32> -> vector<8x256xf32>
    %647 = arith.addf %636, %646 : vector<8x256xf32>
    %c0_465 = arith.constant 0 : index
    %c111_466 = arith.constant 111 : index
    %648 = vector.load %arg17[%c0_465, %c111_466] : memref<8x512xf32, #tpu.memory_space<vmem>>, vector<8x256xf32>
    %649 = arith.truncf %648 : vector<8x256xf32> to vector<8x256xbf16>
    %cst_467 = arith.constant 0.000000e+00 : f32
    %650 = arith.truncf %cst_467 : f32 to bf16
    %651 = vector.shape_cast %20 : vector<1x256xi1> to vector<1x256xi1>
    %652 = vector.broadcast %651 : vector<1x256xi1> to vector<8x256xi1>
    %653 = vector.broadcast %650 : bf16 to vector<8x256xbf16>
    %654 = arith.select %652, %649, %653 : vector<8x256xi1>, vector<8x256xbf16>
    %c1_468 = arith.constant 1 : index
    %c1_469 = arith.constant 1 : index
    %c0_470 = arith.constant 0 : index
    %c0_471 = arith.constant 0 : index
    %655 = vector.load %arg8[%c1_468, %c1_469, %c0_470, %c0_471] : memref<5x5x8x8xbf16, #tpu.memory_space<vmem>>, vector<1x1x8x8xbf16>
    %656 = vector.shape_cast %655 : vector<1x1x8x8xbf16> to vector<8x8xbf16>
    %cst_472 = arith.constant dense<0.000000e+00> : vector<8x256xf32>
    %657 = tpu.matmul %656, %654, %cst_472 {dimension_numbers = #tpu.dot_dimension_numbers<[1], [0], [0], [1], [0, 0, 1, 1], [], []>} : vector<8x8xbf16>, vector<8x256xbf16>, vector<8x256xf32> -> vector<8x256xf32>
    %658 = arith.addf %647, %657 : vector<8x256xf32>
    %c0_473 = arith.constant 0 : index
    %c112_474 = arith.constant 112 : index
    %659 = vector.load %arg17[%c0_473, %c112_474] : memref<8x512xf32, #tpu.memory_space<vmem>>, vector<8x256xf32>
    %660 = arith.truncf %659 : vector<8x256xf32> to vector<8x256xbf16>
    %c1_475 = arith.constant 1 : index
    %c2_476 = arith.constant 2 : index
    %c0_477 = arith.constant 0 : index
    %c0_478 = arith.constant 0 : index
    %661 = vector.load %arg8[%c1_475, %c2_476, %c0_477, %c0_478] : memref<5x5x8x8xbf16, #tpu.memory_space<vmem>>, vector<1x1x8x8xbf16>
    %662 = vector.shape_cast %661 : vector<1x1x8x8xbf16> to vector<8x8xbf16>
    %cst_479 = arith.constant dense<0.000000e+00> : vector<8x256xf32>
    %663 = tpu.matmul %662, %660, %cst_479 {dimension_numbers = #tpu.dot_dimension_numbers<[1], [0], [0], [1], [0, 0, 1, 1], [], []>} : vector<8x8xbf16>, vector<8x256xbf16>, vector<8x256xf32> -> vector<8x256xf32>
    %664 = arith.addf %658, %663 : vector<8x256xf32>
    %c0_480 = arith.constant 0 : index
    %c113_481 = arith.constant 113 : index
    %665 = vector.load %arg17[%c0_480, %c113_481] : memref<8x512xf32, #tpu.memory_space<vmem>>, vector<8x256xf32>
    %666 = arith.truncf %665 : vector<8x256xf32> to vector<8x256xbf16>
    %cst_482 = arith.constant 0.000000e+00 : f32
    %667 = arith.truncf %cst_482 : f32 to bf16
    %668 = vector.shape_cast %22 : vector<1x256xi1> to vector<1x256xi1>
    %669 = vector.broadcast %668 : vector<1x256xi1> to vector<8x256xi1>
    %670 = vector.broadcast %667 : bf16 to vector<8x256xbf16>
    %671 = arith.select %669, %666, %670 : vector<8x256xi1>, vector<8x256xbf16>
    %c1_483 = arith.constant 1 : index
    %c3_484 = arith.constant 3 : index
    %c0_485 = arith.constant 0 : index
    %c0_486 = arith.constant 0 : index
    %672 = vector.load %arg8[%c1_483, %c3_484, %c0_485, %c0_486] : memref<5x5x8x8xbf16, #tpu.memory_space<vmem>>, vector<1x1x8x8xbf16>
    %673 = vector.shape_cast %672 : vector<1x1x8x8xbf16> to vector<8x8xbf16>
    %cst_487 = arith.constant dense<0.000000e+00> : vector<8x256xf32>
    %674 = tpu.matmul %673, %671, %cst_487 {dimension_numbers = #tpu.dot_dimension_numbers<[1], [0], [0], [1], [0, 0, 1, 1], [], []>} : vector<8x8xbf16>, vector<8x256xbf16>, vector<8x256xf32> -> vector<8x256xf32>
    %675 = arith.addf %664, %674 : vector<8x256xf32>
    %c0_488 = arith.constant 0 : index
    %c114_489 = arith.constant 114 : index
    %676 = vector.load %arg17[%c0_488, %c114_489] : memref<8x512xf32, #tpu.memory_space<vmem>>, vector<8x256xf32>
    %677 = arith.truncf %676 : vector<8x256xf32> to vector<8x256xbf16>
    %cst_490 = arith.constant 0.000000e+00 : f32
    %678 = arith.truncf %cst_490 : f32 to bf16
    %679 = vector.shape_cast %24 : vector<1x256xi1> to vector<1x256xi1>
    %680 = vector.broadcast %679 : vector<1x256xi1> to vector<8x256xi1>
    %681 = vector.broadcast %678 : bf16 to vector<8x256xbf16>
    %682 = arith.select %680, %677, %681 : vector<8x256xi1>, vector<8x256xbf16>
    %c1_491 = arith.constant 1 : index
    %c4_492 = arith.constant 4 : index
    %c0_493 = arith.constant 0 : index
    %c0_494 = arith.constant 0 : index
    %683 = vector.load %arg8[%c1_491, %c4_492, %c0_493, %c0_494] : memref<5x5x8x8xbf16, #tpu.memory_space<vmem>>, vector<1x1x8x8xbf16>
    %684 = vector.shape_cast %683 : vector<1x1x8x8xbf16> to vector<8x8xbf16>
    %cst_495 = arith.constant dense<0.000000e+00> : vector<8x256xf32>
    %685 = tpu.matmul %684, %682, %cst_495 {dimension_numbers = #tpu.dot_dimension_numbers<[1], [0], [0], [1], [0, 0, 1, 1], [], []>} : vector<8x8xbf16>, vector<8x256xbf16>, vector<8x256xf32> -> vector<8x256xf32>
    %686 = arith.addf %675, %685 : vector<8x256xf32>
    %c0_496 = arith.constant 0 : index
    %c126_497 = arith.constant 126 : index
    %687 = vector.load %arg17[%c0_496, %c126_497] : memref<8x512xf32, #tpu.memory_space<vmem>>, vector<8x256xf32>
    %688 = arith.truncf %687 : vector<8x256xf32> to vector<8x256xbf16>
    %cst_498 = arith.constant 0.000000e+00 : f32
    %689 = arith.truncf %cst_498 : f32 to bf16
    %690 = vector.shape_cast %18 : vector<1x256xi1> to vector<1x256xi1>
    %691 = vector.broadcast %690 : vector<1x256xi1> to vector<8x256xi1>
    %692 = vector.broadcast %689 : bf16 to vector<8x256xbf16>
    %693 = arith.select %691, %688, %692 : vector<8x256xi1>, vector<8x256xbf16>
    %c2_499 = arith.constant 2 : index
    %c0_500 = arith.constant 0 : index
    %c0_501 = arith.constant 0 : index
    %c0_502 = arith.constant 0 : index
    %694 = vector.load %arg8[%c2_499, %c0_500, %c0_501, %c0_502] : memref<5x5x8x8xbf16, #tpu.memory_space<vmem>>, vector<1x1x8x8xbf16>
    %695 = vector.shape_cast %694 : vector<1x1x8x8xbf16> to vector<8x8xbf16>
    %cst_503 = arith.constant dense<0.000000e+00> : vector<8x256xf32>
    %696 = tpu.matmul %695, %693, %cst_503 {dimension_numbers = #tpu.dot_dimension_numbers<[1], [0], [0], [1], [0, 0, 1, 1], [], []>} : vector<8x8xbf16>, vector<8x256xbf16>, vector<8x256xf32> -> vector<8x256xf32>
    %697 = arith.addf %686, %696 : vector<8x256xf32>
    %c0_504 = arith.constant 0 : index
    %c127_505 = arith.constant 127 : index
    %698 = vector.load %arg17[%c0_504, %c127_505] : memref<8x512xf32, #tpu.memory_space<vmem>>, vector<8x256xf32>
    %699 = arith.truncf %698 : vector<8x256xf32> to vector<8x256xbf16>
    %cst_506 = arith.constant 0.000000e+00 : f32
    %700 = arith.truncf %cst_506 : f32 to bf16
    %701 = vector.shape_cast %20 : vector<1x256xi1> to vector<1x256xi1>
    %702 = vector.broadcast %701 : vector<1x256xi1> to vector<8x256xi1>
    %703 = vector.broadcast %700 : bf16 to vector<8x256xbf16>
    %704 = arith.select %702, %699, %703 : vector<8x256xi1>, vector<8x256xbf16>
    %c2_507 = arith.constant 2 : index
    %c1_508 = arith.constant 1 : index
    %c0_509 = arith.constant 0 : index
    %c0_510 = arith.constant 0 : index
    %705 = vector.load %arg8[%c2_507, %c1_508, %c0_509, %c0_510] : memref<5x5x8x8xbf16, #tpu.memory_space<vmem>>, vector<1x1x8x8xbf16>
    %706 = vector.shape_cast %705 : vector<1x1x8x8xbf16> to vector<8x8xbf16>
    %cst_511 = arith.constant dense<0.000000e+00> : vector<8x256xf32>
    %707 = tpu.matmul %706, %704, %cst_511 {dimension_numbers = #tpu.dot_dimension_numbers<[1], [0], [0], [1], [0, 0, 1, 1], [], []>} : vector<8x8xbf16>, vector<8x256xbf16>, vector<8x256xf32> -> vector<8x256xf32>
    %708 = arith.addf %697, %707 : vector<8x256xf32>
    %c0_512 = arith.constant 0 : index
    %c128_513 = arith.constant 128 : index
    %709 = vector.load %arg17[%c0_512, %c128_513] : memref<8x512xf32, #tpu.memory_space<vmem>>, vector<8x256xf32>
    %710 = arith.truncf %709 : vector<8x256xf32> to vector<8x256xbf16>
    %c2_514 = arith.constant 2 : index
    %c2_515 = arith.constant 2 : index
    %c0_516 = arith.constant 0 : index
    %c0_517 = arith.constant 0 : index
    %711 = vector.load %arg8[%c2_514, %c2_515, %c0_516, %c0_517] : memref<5x5x8x8xbf16, #tpu.memory_space<vmem>>, vector<1x1x8x8xbf16>
    %712 = vector.shape_cast %711 : vector<1x1x8x8xbf16> to vector<8x8xbf16>
    %cst_518 = arith.constant dense<0.000000e+00> : vector<8x256xf32>
    %713 = tpu.matmul %712, %710, %cst_518 {dimension_numbers = #tpu.dot_dimension_numbers<[1], [0], [0], [1], [0, 0, 1, 1], [], []>} : vector<8x8xbf16>, vector<8x256xbf16>, vector<8x256xf32> -> vector<8x256xf32>
    %714 = arith.addf %708, %713 : vector<8x256xf32>
    %c0_519 = arith.constant 0 : index
    %c129_520 = arith.constant 129 : index
    %715 = vector.load %arg17[%c0_519, %c129_520] : memref<8x512xf32, #tpu.memory_space<vmem>>, vector<8x256xf32>
    %716 = arith.truncf %715 : vector<8x256xf32> to vector<8x256xbf16>
    %cst_521 = arith.constant 0.000000e+00 : f32
    %717 = arith.truncf %cst_521 : f32 to bf16
    %718 = vector.shape_cast %22 : vector<1x256xi1> to vector<1x256xi1>
    %719 = vector.broadcast %718 : vector<1x256xi1> to vector<8x256xi1>
    %720 = vector.broadcast %717 : bf16 to vector<8x256xbf16>
    %721 = arith.select %719, %716, %720 : vector<8x256xi1>, vector<8x256xbf16>
    %c2_522 = arith.constant 2 : index
    %c3_523 = arith.constant 3 : index
    %c0_524 = arith.constant 0 : index
    %c0_525 = arith.constant 0 : index
    %722 = vector.load %arg8[%c2_522, %c3_523, %c0_524, %c0_525] : memref<5x5x8x8xbf16, #tpu.memory_space<vmem>>, vector<1x1x8x8xbf16>
    %723 = vector.shape_cast %722 : vector<1x1x8x8xbf16> to vector<8x8xbf16>
    %cst_526 = arith.constant dense<0.000000e+00> : vector<8x256xf32>
    %724 = tpu.matmul %723, %721, %cst_526 {dimension_numbers = #tpu.dot_dimension_numbers<[1], [0], [0], [1], [0, 0, 1, 1], [], []>} : vector<8x8xbf16>, vector<8x256xbf16>, vector<8x256xf32> -> vector<8x256xf32>
    %725 = arith.addf %714, %724 : vector<8x256xf32>
    %c0_527 = arith.constant 0 : index
    %c130_528 = arith.constant 130 : index
    %726 = vector.load %arg17[%c0_527, %c130_528] : memref<8x512xf32, #tpu.memory_space<vmem>>, vector<8x256xf32>
    %727 = arith.truncf %726 : vector<8x256xf32> to vector<8x256xbf16>
    %cst_529 = arith.constant 0.000000e+00 : f32
    %728 = arith.truncf %cst_529 : f32 to bf16
    %729 = vector.shape_cast %24 : vector<1x256xi1> to vector<1x256xi1>
    %730 = vector.broadcast %729 : vector<1x256xi1> to vector<8x256xi1>
    %731 = vector.broadcast %728 : bf16 to vector<8x256xbf16>
    %732 = arith.select %730, %727, %731 : vector<8x256xi1>, vector<8x256xbf16>
    %c2_530 = arith.constant 2 : index
    %c4_531 = arith.constant 4 : index
    %c0_532 = arith.constant 0 : index
    %c0_533 = arith.constant 0 : index
    %733 = vector.load %arg8[%c2_530, %c4_531, %c0_532, %c0_533] : memref<5x5x8x8xbf16, #tpu.memory_space<vmem>>, vector<1x1x8x8xbf16>
    %734 = vector.shape_cast %733 : vector<1x1x8x8xbf16> to vector<8x8xbf16>
    %cst_534 = arith.constant dense<0.000000e+00> : vector<8x256xf32>
    %735 = tpu.matmul %734, %732, %cst_534 {dimension_numbers = #tpu.dot_dimension_numbers<[1], [0], [0], [1], [0, 0, 1, 1], [], []>} : vector<8x8xbf16>, vector<8x256xbf16>, vector<8x256xf32> -> vector<8x256xf32>
    %736 = arith.addf %725, %735 : vector<8x256xf32>
    %c0_535 = arith.constant 0 : index
    %c142_536 = arith.constant 142 : index
    %737 = vector.load %arg17[%c0_535, %c142_536] : memref<8x512xf32, #tpu.memory_space<vmem>>, vector<8x256xf32>
    %738 = arith.truncf %737 : vector<8x256xf32> to vector<8x256xbf16>
    %cst_537 = arith.constant 0.000000e+00 : f32
    %739 = arith.truncf %cst_537 : f32 to bf16
    %740 = vector.shape_cast %18 : vector<1x256xi1> to vector<1x256xi1>
    %741 = vector.broadcast %740 : vector<1x256xi1> to vector<8x256xi1>
    %742 = vector.broadcast %739 : bf16 to vector<8x256xbf16>
    %743 = arith.select %741, %738, %742 : vector<8x256xi1>, vector<8x256xbf16>
    %c3_538 = arith.constant 3 : index
    %c0_539 = arith.constant 0 : index
    %c0_540 = arith.constant 0 : index
    %c0_541 = arith.constant 0 : index
    %744 = vector.load %arg8[%c3_538, %c0_539, %c0_540, %c0_541] : memref<5x5x8x8xbf16, #tpu.memory_space<vmem>>, vector<1x1x8x8xbf16>
    %745 = vector.shape_cast %744 : vector<1x1x8x8xbf16> to vector<8x8xbf16>
    %cst_542 = arith.constant dense<0.000000e+00> : vector<8x256xf32>
    %746 = tpu.matmul %745, %743, %cst_542 {dimension_numbers = #tpu.dot_dimension_numbers<[1], [0], [0], [1], [0, 0, 1, 1], [], []>} : vector<8x8xbf16>, vector<8x256xbf16>, vector<8x256xf32> -> vector<8x256xf32>
    %747 = arith.addf %736, %746 : vector<8x256xf32>
    %c0_543 = arith.constant 0 : index
    %c143_544 = arith.constant 143 : index
    %748 = vector.load %arg17[%c0_543, %c143_544] : memref<8x512xf32, #tpu.memory_space<vmem>>, vector<8x256xf32>
    %749 = arith.truncf %748 : vector<8x256xf32> to vector<8x256xbf16>
    %cst_545 = arith.constant 0.000000e+00 : f32
    %750 = arith.truncf %cst_545 : f32 to bf16
    %751 = vector.shape_cast %20 : vector<1x256xi1> to vector<1x256xi1>
    %752 = vector.broadcast %751 : vector<1x256xi1> to vector<8x256xi1>
    %753 = vector.broadcast %750 : bf16 to vector<8x256xbf16>
    %754 = arith.select %752, %749, %753 : vector<8x256xi1>, vector<8x256xbf16>
    %c3_546 = arith.constant 3 : index
    %c1_547 = arith.constant 1 : index
    %c0_548 = arith.constant 0 : index
    %c0_549 = arith.constant 0 : index
    %755 = vector.load %arg8[%c3_546, %c1_547, %c0_548, %c0_549] : memref<5x5x8x8xbf16, #tpu.memory_space<vmem>>, vector<1x1x8x8xbf16>
    %756 = vector.shape_cast %755 : vector<1x1x8x8xbf16> to vector<8x8xbf16>
    %cst_550 = arith.constant dense<0.000000e+00> : vector<8x256xf32>
    %757 = tpu.matmul %756, %754, %cst_550 {dimension_numbers = #tpu.dot_dimension_numbers<[1], [0], [0], [1], [0, 0, 1, 1], [], []>} : vector<8x8xbf16>, vector<8x256xbf16>, vector<8x256xf32> -> vector<8x256xf32>
    %758 = arith.addf %747, %757 : vector<8x256xf32>
    %c0_551 = arith.constant 0 : index
    %c144_552 = arith.constant 144 : index
    %759 = vector.load %arg17[%c0_551, %c144_552] : memref<8x512xf32, #tpu.memory_space<vmem>>, vector<8x256xf32>
    %760 = arith.truncf %759 : vector<8x256xf32> to vector<8x256xbf16>
    %c3_553 = arith.constant 3 : index
    %c2_554 = arith.constant 2 : index
    %c0_555 = arith.constant 0 : index
    %c0_556 = arith.constant 0 : index
    %761 = vector.load %arg8[%c3_553, %c2_554, %c0_555, %c0_556] : memref<5x5x8x8xbf16, #tpu.memory_space<vmem>>, vector<1x1x8x8xbf16>
    %762 = vector.shape_cast %761 : vector<1x1x8x8xbf16> to vector<8x8xbf16>
    %cst_557 = arith.constant dense<0.000000e+00> : vector<8x256xf32>
    %763 = tpu.matmul %762, %760, %cst_557 {dimension_numbers = #tpu.dot_dimension_numbers<[1], [0], [0], [1], [0, 0, 1, 1], [], []>} : vector<8x8xbf16>, vector<8x256xbf16>, vector<8x256xf32> -> vector<8x256xf32>
    %764 = arith.addf %758, %763 : vector<8x256xf32>
    %c0_558 = arith.constant 0 : index
    %c145_559 = arith.constant 145 : index
    %765 = vector.load %arg17[%c0_558, %c145_559] : memref<8x512xf32, #tpu.memory_space<vmem>>, vector<8x256xf32>
    %766 = arith.truncf %765 : vector<8x256xf32> to vector<8x256xbf16>
    %cst_560 = arith.constant 0.000000e+00 : f32
    %767 = arith.truncf %cst_560 : f32 to bf16
    %768 = vector.shape_cast %22 : vector<1x256xi1> to vector<1x256xi1>
    %769 = vector.broadcast %768 : vector<1x256xi1> to vector<8x256xi1>
    %770 = vector.broadcast %767 : bf16 to vector<8x256xbf16>
    %771 = arith.select %769, %766, %770 : vector<8x256xi1>, vector<8x256xbf16>
    %c3_561 = arith.constant 3 : index
    %c3_562 = arith.constant 3 : index
    %c0_563 = arith.constant 0 : index
    %c0_564 = arith.constant 0 : index
    %772 = vector.load %arg8[%c3_561, %c3_562, %c0_563, %c0_564] : memref<5x5x8x8xbf16, #tpu.memory_space<vmem>>, vector<1x1x8x8xbf16>
    %773 = vector.shape_cast %772 : vector<1x1x8x8xbf16> to vector<8x8xbf16>
    %cst_565 = arith.constant dense<0.000000e+00> : vector<8x256xf32>
    %774 = tpu.matmul %773, %771, %cst_565 {dimension_numbers = #tpu.dot_dimension_numbers<[1], [0], [0], [1], [0, 0, 1, 1], [], []>} : vector<8x8xbf16>, vector<8x256xbf16>, vector<8x256xf32> -> vector<8x256xf32>
    %775 = arith.addf %764, %774 : vector<8x256xf32>
    %c0_566 = arith.constant 0 : index
    %c146_567 = arith.constant 146 : index
    %776 = vector.load %arg17[%c0_566, %c146_567] : memref<8x512xf32, #tpu.memory_space<vmem>>, vector<8x256xf32>
    %777 = arith.truncf %776 : vector<8x256xf32> to vector<8x256xbf16>
    %cst_568 = arith.constant 0.000000e+00 : f32
    %778 = arith.truncf %cst_568 : f32 to bf16
    %779 = vector.shape_cast %24 : vector<1x256xi1> to vector<1x256xi1>
    %780 = vector.broadcast %779 : vector<1x256xi1> to vector<8x256xi1>
    %781 = vector.broadcast %778 : bf16 to vector<8x256xbf16>
    %782 = arith.select %780, %777, %781 : vector<8x256xi1>, vector<8x256xbf16>
    %c3_569 = arith.constant 3 : index
    %c4_570 = arith.constant 4 : index
    %c0_571 = arith.constant 0 : index
    %c0_572 = arith.constant 0 : index
    %783 = vector.load %arg8[%c3_569, %c4_570, %c0_571, %c0_572] : memref<5x5x8x8xbf16, #tpu.memory_space<vmem>>, vector<1x1x8x8xbf16>
    %784 = vector.shape_cast %783 : vector<1x1x8x8xbf16> to vector<8x8xbf16>
    %cst_573 = arith.constant dense<0.000000e+00> : vector<8x256xf32>
    %785 = tpu.matmul %784, %782, %cst_573 {dimension_numbers = #tpu.dot_dimension_numbers<[1], [0], [0], [1], [0, 0, 1, 1], [], []>} : vector<8x8xbf16>, vector<8x256xbf16>, vector<8x256xf32> -> vector<8x256xf32>
    %786 = arith.addf %775, %785 : vector<8x256xf32>
    %c0_574 = arith.constant 0 : index
    %c158_575 = arith.constant 158 : index
    %787 = vector.load %arg17[%c0_574, %c158_575] : memref<8x512xf32, #tpu.memory_space<vmem>>, vector<8x256xf32>
    %788 = arith.truncf %787 : vector<8x256xf32> to vector<8x256xbf16>
    %cst_576 = arith.constant 0.000000e+00 : f32
    %789 = arith.truncf %cst_576 : f32 to bf16
    %790 = vector.shape_cast %18 : vector<1x256xi1> to vector<1x256xi1>
    %791 = vector.broadcast %790 : vector<1x256xi1> to vector<8x256xi1>
    %792 = vector.broadcast %789 : bf16 to vector<8x256xbf16>
    %793 = arith.select %791, %788, %792 : vector<8x256xi1>, vector<8x256xbf16>
    %c4_577 = arith.constant 4 : index
    %c0_578 = arith.constant 0 : index
    %c0_579 = arith.constant 0 : index
    %c0_580 = arith.constant 0 : index
    %794 = vector.load %arg8[%c4_577, %c0_578, %c0_579, %c0_580] : memref<5x5x8x8xbf16, #tpu.memory_space<vmem>>, vector<1x1x8x8xbf16>
    %795 = vector.shape_cast %794 : vector<1x1x8x8xbf16> to vector<8x8xbf16>
    %cst_581 = arith.constant dense<0.000000e+00> : vector<8x256xf32>
    %796 = tpu.matmul %795, %793, %cst_581 {dimension_numbers = #tpu.dot_dimension_numbers<[1], [0], [0], [1], [0, 0, 1, 1], [], []>} : vector<8x8xbf16>, vector<8x256xbf16>, vector<8x256xf32> -> vector<8x256xf32>
    %797 = arith.addf %786, %796 : vector<8x256xf32>
    %c0_582 = arith.constant 0 : index
    %c159_583 = arith.constant 159 : index
    %798 = vector.load %arg17[%c0_582, %c159_583] : memref<8x512xf32, #tpu.memory_space<vmem>>, vector<8x256xf32>
    %799 = arith.truncf %798 : vector<8x256xf32> to vector<8x256xbf16>
    %cst_584 = arith.constant 0.000000e+00 : f32
    %800 = arith.truncf %cst_584 : f32 to bf16
    %801 = vector.shape_cast %20 : vector<1x256xi1> to vector<1x256xi1>
    %802 = vector.broadcast %801 : vector<1x256xi1> to vector<8x256xi1>
    %803 = vector.broadcast %800 : bf16 to vector<8x256xbf16>
    %804 = arith.select %802, %799, %803 : vector<8x256xi1>, vector<8x256xbf16>
    %c4_585 = arith.constant 4 : index
    %c1_586 = arith.constant 1 : index
    %c0_587 = arith.constant 0 : index
    %c0_588 = arith.constant 0 : index
    %805 = vector.load %arg8[%c4_585, %c1_586, %c0_587, %c0_588] : memref<5x5x8x8xbf16, #tpu.memory_space<vmem>>, vector<1x1x8x8xbf16>
    %806 = vector.shape_cast %805 : vector<1x1x8x8xbf16> to vector<8x8xbf16>
    %cst_589 = arith.constant dense<0.000000e+00> : vector<8x256xf32>
    %807 = tpu.matmul %806, %804, %cst_589 {dimension_numbers = #tpu.dot_dimension_numbers<[1], [0], [0], [1], [0, 0, 1, 1], [], []>} : vector<8x8xbf16>, vector<8x256xbf16>, vector<8x256xf32> -> vector<8x256xf32>
    %808 = arith.addf %797, %807 : vector<8x256xf32>
    %c0_590 = arith.constant 0 : index
    %c160_591 = arith.constant 160 : index
    %809 = vector.load %arg17[%c0_590, %c160_591] : memref<8x512xf32, #tpu.memory_space<vmem>>, vector<8x256xf32>
    %810 = arith.truncf %809 : vector<8x256xf32> to vector<8x256xbf16>
    %c4_592 = arith.constant 4 : index
    %c2_593 = arith.constant 2 : index
    %c0_594 = arith.constant 0 : index
    %c0_595 = arith.constant 0 : index
    %811 = vector.load %arg8[%c4_592, %c2_593, %c0_594, %c0_595] : memref<5x5x8x8xbf16, #tpu.memory_space<vmem>>, vector<1x1x8x8xbf16>
    %812 = vector.shape_cast %811 : vector<1x1x8x8xbf16> to vector<8x8xbf16>
    %cst_596 = arith.constant dense<0.000000e+00> : vector<8x256xf32>
    %813 = tpu.matmul %812, %810, %cst_596 {dimension_numbers = #tpu.dot_dimension_numbers<[1], [0], [0], [1], [0, 0, 1, 1], [], []>} : vector<8x8xbf16>, vector<8x256xbf16>, vector<8x256xf32> -> vector<8x256xf32>
    %814 = arith.addf %808, %813 : vector<8x256xf32>
    %c0_597 = arith.constant 0 : index
    %c161_598 = arith.constant 161 : index
    %815 = vector.load %arg17[%c0_597, %c161_598] : memref<8x512xf32, #tpu.memory_space<vmem>>, vector<8x256xf32>
    %816 = arith.truncf %815 : vector<8x256xf32> to vector<8x256xbf16>
    %cst_599 = arith.constant 0.000000e+00 : f32
    %817 = arith.truncf %cst_599 : f32 to bf16
    %818 = vector.shape_cast %22 : vector<1x256xi1> to vector<1x256xi1>
    %819 = vector.broadcast %818 : vector<1x256xi1> to vector<8x256xi1>
    %820 = vector.broadcast %817 : bf16 to vector<8x256xbf16>
    %821 = arith.select %819, %816, %820 : vector<8x256xi1>, vector<8x256xbf16>
    %c4_600 = arith.constant 4 : index
    %c3_601 = arith.constant 3 : index
    %c0_602 = arith.constant 0 : index
    %c0_603 = arith.constant 0 : index
    %822 = vector.load %arg8[%c4_600, %c3_601, %c0_602, %c0_603] : memref<5x5x8x8xbf16, #tpu.memory_space<vmem>>, vector<1x1x8x8xbf16>
    %823 = vector.shape_cast %822 : vector<1x1x8x8xbf16> to vector<8x8xbf16>
    %cst_604 = arith.constant dense<0.000000e+00> : vector<8x256xf32>
    %824 = tpu.matmul %823, %821, %cst_604 {dimension_numbers = #tpu.dot_dimension_numbers<[1], [0], [0], [1], [0, 0, 1, 1], [], []>} : vector<8x8xbf16>, vector<8x256xbf16>, vector<8x256xf32> -> vector<8x256xf32>
    %825 = arith.addf %814, %824 : vector<8x256xf32>
    %c0_605 = arith.constant 0 : index
    %c162_606 = arith.constant 162 : index
    %826 = vector.load %arg17[%c0_605, %c162_606] : memref<8x512xf32, #tpu.memory_space<vmem>>, vector<8x256xf32>
    %827 = arith.truncf %826 : vector<8x256xf32> to vector<8x256xbf16>
    %cst_607 = arith.constant 0.000000e+00 : f32
    %828 = arith.truncf %cst_607 : f32 to bf16
    %829 = vector.shape_cast %24 : vector<1x256xi1> to vector<1x256xi1>
    %830 = vector.broadcast %829 : vector<1x256xi1> to vector<8x256xi1>
    %831 = vector.broadcast %828 : bf16 to vector<8x256xbf16>
    %832 = arith.select %830, %827, %831 : vector<8x256xi1>, vector<8x256xbf16>
    %c4_608 = arith.constant 4 : index
    %c4_609 = arith.constant 4 : index
    %c0_610 = arith.constant 0 : index
    %c0_611 = arith.constant 0 : index
    %833 = vector.load %arg8[%c4_608, %c4_609, %c0_610, %c0_611] : memref<5x5x8x8xbf16, #tpu.memory_space<vmem>>, vector<1x1x8x8xbf16>
    %834 = vector.shape_cast %833 : vector<1x1x8x8xbf16> to vector<8x8xbf16>
    %cst_612 = arith.constant dense<0.000000e+00> : vector<8x256xf32>
    %835 = tpu.matmul %834, %832, %cst_612 {dimension_numbers = #tpu.dot_dimension_numbers<[1], [0], [0], [1], [0, 0, 1, 1], [], []>} : vector<8x8xbf16>, vector<8x256xbf16>, vector<8x256xf32> -> vector<8x256xf32>
    %836 = arith.addf %825, %835 : vector<8x256xf32>
    %c0_613 = arith.constant 0 : index
    %c0_614 = arith.constant 0 : index
    %837 = vector.load %arg9[%c0_613, %c0_614] : memref<8x1xf32, #tpu.memory_space<vmem>>, vector<8x1xf32>
    %838 = vector.broadcast %837 : vector<8x1xf32> to vector<8x256xf32>
    %839 = arith.mulf %836, %838 : vector<8x256xf32>
    %c0_615 = arith.constant 0 : index
    %c0_616 = arith.constant 0 : index
    %840 = vector.load %arg10[%c0_615, %c0_616] : memref<8x1xf32, #tpu.memory_space<vmem>>, vector<8x1xf32>
    %841 = vector.broadcast %840 : vector<8x1xf32> to vector<8x256xf32>
    %842 = arith.addf %839, %841 : vector<8x256xf32>
    %cst_617 = arith.constant 0.000000e+00 : f32
    %843 = vector.broadcast %cst_617 : f32 to vector<8x256xf32>
    %844 = arith.maximumf %842, %843 : vector<8x256xf32>
    %c1_618 = arith.constant 1 : index
    %c16_619 = arith.constant 16 : index
    %c0_620 = arith.constant 0 : index
    %845 = vector.load %arg14[%c1_618, %c16_619, %c0_620] : memref<2x32x256xf32, #tpu.memory_space<vmem>>, vector<1x8x256xf32>
    %846 = vector.shape_cast %845 : vector<1x8x256xf32> to vector<8x256xf32>
    %847 = vector.shape_cast %844 : vector<8x256xf32> to vector<1x8x256xf32>
    tpu.vector_store %arg14[%c1_618, %c16_619, %c0_620], %847 {strides = array<i32>} : memref<2x32x256xf32, #tpu.memory_space<vmem>>, vector<1x8x256xf32>,
    %c0_621 = arith.constant 0 : index
    %c111_622 = arith.constant 111 : index
    %848 = vector.load %arg15[%c0_621, %c111_622] : memref<4x512xf32, #tpu.memory_space<vmem>>, vector<4x256xf32>
    %cst_623 = arith.constant 0xFF800000 : f32
    %849 = vector.shape_cast %20 : vector<1x256xi1> to vector<1x256xi1>
    %850 = vector.broadcast %849 : vector<1x256xi1> to vector<4x256xi1>
    %851 = vector.broadcast %cst_623 : f32 to vector<4x256xf32>
    %852 = arith.select %850, %848, %851 : vector<4x256xi1>, vector<4x256xf32>
    %853 = arith.maximumf %469, %852 : vector<4x256xf32>
    %c0_624 = arith.constant 0 : index
    %c112_625 = arith.constant 112 : index
    %854 = vector.load %arg15[%c0_624, %c112_625] : memref<4x512xf32, #tpu.memory_space<vmem>>, vector<4x256xf32>
    %855 = arith.maximumf %853, %854 : vector<4x256xf32>
    %c0_626 = arith.constant 0 : index
    %c113_627 = arith.constant 113 : index
    %856 = vector.load %arg15[%c0_626, %c113_627] : memref<4x512xf32, #tpu.memory_space<vmem>>, vector<4x256xf32>
    %cst_628 = arith.constant 0xFF800000 : f32
    %857 = vector.shape_cast %22 : vector<1x256xi1> to vector<1x256xi1>
    %858 = vector.broadcast %857 : vector<1x256xi1> to vector<4x256xi1>
    %859 = vector.broadcast %cst_628 : f32 to vector<4x256xf32>
    %860 = arith.select %858, %856, %859 : vector<4x256xi1>, vector<4x256xf32>
    %861 = arith.maximumf %855, %860 : vector<4x256xf32>
    %c0_629 = arith.constant 0 : index
    %c127_630 = arith.constant 127 : index
    %862 = vector.load %arg15[%c0_629, %c127_630] : memref<4x512xf32, #tpu.memory_space<vmem>>, vector<4x256xf32>
    %cst_631 = arith.constant 0xFF800000 : f32
    %863 = vector.shape_cast %20 : vector<1x256xi1> to vector<1x256xi1>
    %864 = vector.broadcast %863 : vector<1x256xi1> to vector<4x256xi1>
    %865 = vector.broadcast %cst_631 : f32 to vector<4x256xf32>
    %866 = arith.select %864, %862, %865 : vector<4x256xi1>, vector<4x256xf32>
    %867 = arith.maximumf %861, %866 : vector<4x256xf32>
    %c0_632 = arith.constant 0 : index
    %c129_633 = arith.constant 129 : index
    %868 = vector.load %arg15[%c0_632, %c129_633] : memref<4x512xf32, #tpu.memory_space<vmem>>, vector<4x256xf32>
    %cst_634 = arith.constant 0xFF800000 : f32
    %869 = vector.shape_cast %22 : vector<1x256xi1> to vector<1x256xi1>
    %870 = vector.broadcast %869 : vector<1x256xi1> to vector<4x256xi1>
    %871 = vector.broadcast %cst_634 : f32 to vector<4x256xf32>
    %872 = arith.select %870, %868, %871 : vector<4x256xi1>, vector<4x256xf32>
    %873 = arith.maximumf %867, %872 : vector<4x256xf32>
    %c0_635 = arith.constant 0 : index
    %c143_636 = arith.constant 143 : index
    %874 = vector.load %arg15[%c0_635, %c143_636] : memref<4x512xf32, #tpu.memory_space<vmem>>, vector<4x256xf32>
    %cst_637 = arith.constant 0xFF800000 : f32
    %875 = vector.shape_cast %20 : vector<1x256xi1> to vector<1x256xi1>
    %876 = vector.broadcast %875 : vector<1x256xi1> to vector<4x256xi1>
    %877 = vector.broadcast %cst_637 : f32 to vector<4x256xf32>
    %878 = arith.select %876, %874, %877 : vector<4x256xi1>, vector<4x256xf32>
    %879 = arith.maximumf %873, %878 : vector<4x256xf32>
    %c0_638 = arith.constant 0 : index
    %c144_639 = arith.constant 144 : index
    %880 = vector.load %arg15[%c0_638, %c144_639] : memref<4x512xf32, #tpu.memory_space<vmem>>, vector<4x256xf32>
    %881 = arith.maximumf %879, %880 : vector<4x256xf32>
    %c0_640 = arith.constant 0 : index
    %c145_641 = arith.constant 145 : index
    %882 = vector.load %arg15[%c0_640, %c145_641] : memref<4x512xf32, #tpu.memory_space<vmem>>, vector<4x256xf32>
    %cst_642 = arith.constant 0xFF800000 : f32
    %883 = vector.shape_cast %22 : vector<1x256xi1> to vector<1x256xi1>
    %884 = vector.broadcast %883 : vector<1x256xi1> to vector<4x256xi1>
    %885 = vector.broadcast %cst_642 : f32 to vector<4x256xf32>
    %886 = arith.select %884, %882, %885 : vector<4x256xi1>, vector<4x256xf32>
    %887 = arith.maximumf %881, %886 : vector<4x256xf32>
    %c0_643 = arith.constant 0 : index
    %c0_644 = arith.constant 0 : index
    %888 = vector.load %arg11[%c0_643, %c0_644] : memref<8x4xbf16, #tpu.memory_space<vmem>>, vector<8x4xbf16>
    %889 = arith.truncf %887 : vector<4x256xf32> to vector<4x256xbf16>
    %cst_645 = arith.constant dense<0.000000e+00> : vector<8x256xf32>
    %890 = tpu.matmul %888, %889, %cst_645 {dimension_numbers = #tpu.dot_dimension_numbers<[1], [0], [0], [1], [0, 0, 1, 1], [], []>} : vector<8x4xbf16>, vector<4x256xbf16>, vector<8x256xf32> -> vector<8x256xf32>
    %c0_646 = arith.constant 0 : index
    %c0_647 = arith.constant 0 : index
    %891 = vector.load %arg12[%c0_646, %c0_647] : memref<8x1xf32, #tpu.memory_space<vmem>>, vector<8x1xf32>
    %892 = vector.broadcast %891 : vector<8x1xf32> to vector<8x256xf32>
    %893 = arith.mulf %890, %892 : vector<8x256xf32>
    %c0_648 = arith.constant 0 : index
    %c0_649 = arith.constant 0 : index
    %894 = vector.load %arg13[%c0_648, %c0_649] : memref<8x1xf32, #tpu.memory_space<vmem>>, vector<8x1xf32>
    %895 = vector.broadcast %894 : vector<8x1xf32> to vector<8x256xf32>
    %896 = arith.addf %893, %895 : vector<8x256xf32>
    %cst_650 = arith.constant 0.000000e+00 : f32
    %897 = vector.broadcast %cst_650 : f32 to vector<8x256xf32>
    %898 = arith.maximumf %896, %897 : vector<8x256xf32>
    %c1_651 = arith.constant 1 : index
    %c24_652 = arith.constant 24 : index
    %c0_653 = arith.constant 0 : index
    %899 = vector.load %arg14[%c1_651, %c24_652, %c0_653] : memref<2x32x256xf32, #tpu.memory_space<vmem>>, vector<1x8x256xf32>
    %900 = vector.shape_cast %899 : vector<1x8x256xf32> to vector<8x256xf32>
    %901 = vector.shape_cast %898 : vector<8x256xf32> to vector<1x8x256xf32>
    tpu.vector_store %arg14[%c1_651, %c24_652, %c0_653], %901 {strides = array<i32>} : memref<2x32x256xf32, #tpu.memory_space<vmem>>, vector<1x8x256xf32>,
    return
  }
  func.func @transform_0(%arg0: i32) -> (i32, i32, i32) {
    %c0_i32 = arith.constant 0 : i32
    %c0_i32_0 = arith.constant 0 : i32
    %c0_i32_1 = arith.constant 0 : i32
    return %arg0, %c0_i32, %c0_i32_0 : i32, i32, i32
  }
  func.func @transform_1(%arg0: i32) -> (i32, i32) {
    %c0_i32 = arith.constant 0 : i32
    %c0_i32_0 = arith.constant 0 : i32
    %c0_i32_1 = arith.constant 0 : i32
    return %c0_i32, %c0_i32_0 : i32, i32
  }
  func.func @transform_2(%arg0: i32) -> (i32, i32) {
    %c0_i32 = arith.constant 0 : i32
    %c0_i32_0 = arith.constant 0 : i32
    %c0_i32_1 = arith.constant 0 : i32
    return %c0_i32, %c0_i32_0 : i32, i32
  }
  func.func @transform_3(%arg0: i32) -> (i32, i32) {
    %c0_i32 = arith.constant 0 : i32
    %c0_i32_0 = arith.constant 0 : i32
    %c0_i32_1 = arith.constant 0 : i32
    return %c0_i32, %c0_i32_0 : i32, i32
  }
  func.func @transform_4(%arg0: i32) -> (i32, i32, i32, i32) {
    %c0_i32 = arith.constant 0 : i32
    %c0_i32_0 = arith.constant 0 : i32
    %c0_i32_1 = arith.constant 0 : i32
    %c0_i32_2 = arith.constant 0 : i32
    %c0_i32_3 = arith.constant 0 : i32
    return %c0_i32, %c0_i32_0, %c0_i32_1, %c0_i32_2 : i32, i32, i32, i32
  }
  func.func @transform_5(%arg0: i32) -> (i32, i32) {
    %c0_i32 = arith.constant 0 : i32
    %c0_i32_0 = arith.constant 0 : i32
    %c0_i32_1 = arith.constant 0 : i32
    return %c0_i32, %c0_i32_0 : i32, i32
  }
  func.func @transform_6(%arg0: i32) -> (i32, i32) {
    %c0_i32 = arith.constant 0 : i32
    %c0_i32_0 = arith.constant 0 : i32
    %c0_i32_1 = arith.constant 0 : i32
    return %c0_i32, %c0_i32_0 : i32, i32
  }
  func.func @transform_7(%arg0: i32) -> (i32, i32, i32, i32) {
    %c0_i32 = arith.constant 0 : i32
    %c0_i32_0 = arith.constant 0 : i32
    %c0_i32_1 = arith.constant 0 : i32
    %c0_i32_2 = arith.constant 0 : i32
    %c0_i32_3 = arith.constant 0 : i32
    return %c0_i32, %c0_i32_0, %c0_i32_1, %c0_i32_2 : i32, i32, i32, i32
  }
  func.func @transform_8(%arg0: i32) -> (i32, i32) {
    %c0_i32 = arith.constant 0 : i32
    %c0_i32_0 = arith.constant 0 : i32
    %c0_i32_1 = arith.constant 0 : i32
    return %c0_i32, %c0_i32_0 : i32, i32
  }
  func.func @transform_9(%arg0: i32) -> (i32, i32) {
    %c0_i32 = arith.constant 0 : i32
    %c0_i32_0 = arith.constant 0 : i32
    %c0_i32_1 = arith.constant 0 : i32
    return %c0_i32, %c0_i32_0 : i32, i32
  }
  func.func @transform_10(%arg0: i32) -> (i32, i32) {
    %c0_i32 = arith.constant 0 : i32
    %c0_i32_0 = arith.constant 0 : i32
    %c0_i32_1 = arith.constant 0 : i32
    return %c0_i32, %c0_i32_0 : i32, i32
  }
  func.func @transform_11(%arg0: i32) -> (i32, i32) {
    %c0_i32 = arith.constant 0 : i32
    %c0_i32_0 = arith.constant 0 : i32
    %c0_i32_1 = arith.constant 0 : i32
    return %c0_i32, %c0_i32_0 : i32, i32
  }
  func.func @transform_12(%arg0: i32) -> (i32, i32) {
    %c0_i32 = arith.constant 0 : i32
    %c0_i32_0 = arith.constant 0 : i32
    %c0_i32_1 = arith.constant 0 : i32
    return %c0_i32, %c0_i32_0 : i32, i32
  }
  func.func @transform_13(%arg0: i32) -> (i32, i32, i32) {
    %c0_i32 = arith.constant 0 : i32
    %c0_i32_0 = arith.constant 0 : i32
    %c0_i32_1 = arith.constant 0 : i32
    return %arg0, %c0_i32, %c0_i32_0 : i32, i32, i32
  }
}

</mosaic_0001>

<bundles_post_ra>
// kernel: inception_block.1
= control target key start
LH: loop header
LB: loop body
LE: loop exit
PB: predicated region body
PF: predicated region fallthrough
CT: control target
= control target key end

     0   :  { %v47_v0 = vlaneseq  ;;  %vm8276_vm0 = vcmask 1041408   ;;  %v8375_v2 = vmov 0   ;;  %vm8275_vm2 = vcmask 31744   ;;  %s6157_s16 = smov 111   ;;  %s6158_s17 = smov 113   ;;  %s8257_s0 = inlined_call_operand.vmem [shape: f32[2,4,256], index: 0, kind: input, shape index: {}]   ;;  %s8258_s1 = inlined_call_operand.vmem [shape: bf16[24,4], index: 1, kind: input, shape index: {}]   ;;  %s8259_s2 = inlined_call_operand.vmem [shape: f32[24,1], index: 2, kind: input, shape index: {}]   ;;  %s8260_s3 = inlined_call_operand.vmem [shape: f32[24,1], index: 3, kind: input, shape index: {}]   ;;  %s8261_s4 = inlined_call_operand.vmem [shape: bf16[3,3,8,8], index: 4, kind: input, shape index: {}]   ;;  %s8262_s7 = inlined_call_operand.vmem [shape: bf16[5,5,8,8], index: 7, kind: input, shape index: {}]   ;;  %s8263_s10 = inlined_call_operand.vmem [shape: bf16[8,4], index: 10, kind: input, shape index: {}]   ;;  %s8264_s5 = inlined_call_operand.vmem [shape: f32[8,1], index: 5, kind: input, shape index: {}]   ;;  %s8265_s8 = inlined_call_operand.vmem [shape: f32[8,1], index: 8, kind: input, shape index: {}]   ;;  %s8266_s11 = inlined_call_operand.vmem [shape: f32[8,1], index: 11, kind: input, shape index: {}]   ;;  %s8267_s6 = inlined_call_operand.vmem [shape: f32[8,1], index: 6, kind: input, shape index: {}]   ;;  %s8268_s9 = inlined_call_operand.vmem [shape: f32[8,1], index: 9, kind: input, shape index: {}]   ;;  %s8269_s12 = inlined_call_operand.vmem [shape: f32[8,1], index: 12, kind: input, shape index: {}]   ;;  %s8270_s13 = inlined_call_operand.vmem [shape: f32[2,32,256], index: 13, kind: output, shape index: {}]  }
   0x1   :  { %v6256_v1 = vld [vmem:[%s8257_s0] sm:$0xff]  ;;  %151 = vmatprep.mubr.bf16.mxu0 %v8375_v2  ;;  %6144 = vset.pattern.permute.xlu0 %v8375_v2  ;;  %v171_v5 = vld [vmem:[%s8259_s2 + $0x8] sm:$0xff]  ;;  %s6159_s20 = smov 127   ;;  %s6160_s21 = smov 1   ;;  %v172_v24 = vld [vmem:[%s8259_s2 + $0x10] sm:$0xff]  ;;  %v8352_v25 = vmov 0.0|0.0  }
   0x2   :  { %v90_v3 = vcombine.high %v6256_v1, %v6256_v1  ;;  %230 = vst [vmem:[#allocation2 + $0x4] sm:$0xff] %v6256_v1  ;;  %v92_v4 = vpack.c.bf16 %v6256_v1, %v6256_v1  ;;  %v48_v6 = vand.u32 127, %v47_v0  ;;  %6145 = vset.pattern.permute.xlu1 %v8375_v2  ;;  %829 = vmatprep.mubr.bf16.mxu1 %v8375_v2  ;;  %v244_v7 = vshrl.u32 %v47_v0, 7  ;;  %v195_v10 = vld [vmem:[%s8260_s3 + $0x8] sm:$0xff]  ;;  %v6147_v13 = vld [vmem:[%s8258_s1] sm:$0xff]   ;;  %s8306_s24 = smov 16  }
   0x3   :  { %180 = vperm.xlu0 %6144, %v171_v5   ;;  %v6148_v22 = vld [vmem:[%s8258_s1 + $0x8] ss:$0 sps:$4 sm:$0xff]   ;;  %v196_v45 = vld [vmem:[%s8260_s3 + $0x10] sm:$0xff]  ;;  %vm8277_vm8 = vcmask 908288   ;;  %s6163_s27 = smov 15   ;;  %s6164_s28 = smov 17  }
   0x4   :  { %v93_v8 = vpack.c.bf16 %v90_v3, %v90_v3  ;;  %v114_v9 = vsel %vm8276_vm0, %v92_v4, 0  ;;  %v49_v11 = vadd.s32 128, %v48_v6  ;;  %v6274_v12 = vand.u32 15, %v48_v6  ;;  %s8295_s29 = smov 95   ;;  %s8287_s30 = smov 94  }
   0x5   :  { %v6283_v15 = vsub.s32 0, %v244_v7  ;;  %v6292_v16 = vsub.s32 4, %v244_v7  ;;  %vm410_vm11 = vcmask 924672   ;;  %s8298_s14 = smov 97   ;;  %s8300_s15 = smov 98  }
   0x6   :  { %5642 = vmatprep.subr.msk.bf16.mxu0 %vm8276_vm0, %v93_v8  ;;  %v6280_v14 = vand.u32 15, %v49_v11  ;;  %vm8274_vm1 = vcmp.ge.s32.totalorder %v6274_v12, 1  ;;  %vm8272_vm3 = vcmp.lt.s32.totalorder %v6274_v12, 15  ;;  %vm74_vm12 = vcmp.ge.s32.totalorder %v6274_v12, 2  ;;  %s8308_s18 = smov 110   ;;  %s6170_s26 = smov 33  }
   0x7   :  { %120 = vmatpush1.bf16.msra.mxu0 %v114_v9  ;;  %204 = vperm.xlu0 %6144, %v195_v10   ;;  %s8360_s19 = smov 34   ;;  %s8293_s25 = smov 32  }
   0x8   :  { %vm8273_vm4 = vcmp.ge.s32.totalorder %v6280_v14, 1  ;;  %vm8271_vm5 = vcmp.lt.s32.totalorder %v6280_v14, 15  ;;  %vm75_vm13 = vcmp.ge.s32.totalorder %v6280_v14, 2  ;;  %s8358_s22 = smov 31   ;;  %s8354_s23 = smov 18  }
   0x9   :  { %vm241_vm6 = vmpackc.low %vm8273_vm4, %vm8274_vm1 }
   0xa   :  { %5643 = vmatmul.mubr.msk.bf16.vlgmr.msra.gmra.mrb[0].mxu0 %vm8275_vm2, %v6147_v13  ;;  %v242_v17 = vsel %vm241_vm6, 65537, %v8375_v2  ;;  %vm396_vm7 = vmpackc.low %vm8271_vm5, %vm8272_vm3  ;;  %vm80_vm5 = vcmp.lt.s32.totalorder %v6274_v12, 14  ;;  %vm81_vm3 = vcmp.lt.s32.totalorder %v6280_v14, 14 }
   0xb   :  { %v6301_v18 = vrot.slane %v242_v17, %v6283_v15  ;;  %v397_v19 = vsel %vm396_vm7, 65537, %v8375_v2  ;;  %161 = vmatprep.mubr.bf16.mxu0 %v8375_v2  ;;  %v6311_v21 = vrot.slane %v242_v17, %v6292_v16  ;;  %vm946_vm14 = vmpackc.low %vm75_vm13, %vm74_vm12  ;;  %vm488_vm7 = vcmask 1039360  }
   0xc   :  { %v6306_v20 = vrot.slane %v397_v19, %v6283_v15  ;;  %v6321_v23 = vrot.slane %v397_v19, %v6292_v16  ;;  %v947_v53 = vsel %vm946_vm14, 65537, %v8375_v2  ;;  %vm507_vm14 = vcmask 7168   ;;  %vm1255_vm4 = vmpackc.low %vm81_vm3, %vm80_vm5 }
   0xd   :  { %251 = vrot.lane.b32.xlu1 %v6301_v18, %s6157_s16  ;;  %v6400_v55 = vrot.slane %v947_v53, %v6283_v15  ;;  %v6414_v59 = vrot.slane %v947_v53, %v6292_v16  ;;  %v1256_v4 = vsel %vm1255_vm4, 65537, %v8375_v2  ;;  %vm8279_vm3 = vcmask 130048   ;;  %v263_v53 = vld [vmem:[%s8261_s4] sm:$0xf] }
   0xe   :  { %406 = vrot.lane.b32.xlu0 %v6306_v20, %s6158_s17  ;;  %v6457_v7 = vrot.slane %v1256_v4, %v6283_v15  ;;  %v6465_v8 = vrot.slane %v1256_v4, %v6292_v16  ;;  %vm282_vm4 = vcmask 1043456   ;;  %vm278_vm5 = vcmask 64512  }
  0x11   :  { %253 = vrot.lane.b32.xlu1 %v6311_v21, %s6157_s16 }
  0x12   :  { %484 = vrot.lane.b32.xlu0 %v6301_v18, %s6159_s20  ;;  %5644 = vmatmul.mubr.msk.bf16.gmra.mrb[4].mxu0 %vm8275_vm2, %v6148_v22  ;;  %v5645_v22 = vld [vmem:[%s8261_s4 + $0x4] sm:$0xf] }
  0x13   :  { %321 = vmatprep.mubr.bf16.mxu0 %v8375_v2 }
  0x15   :  { %408 = vrot.lane.b32.xlu1 %v6321_v23, %s6158_s17 }
  0x16   :  { %622 = vrot.lane.b32.xlu0 %v6306_v20, %s6160_s21 }
  0x19   :  { %486 = vrot.lane.b32.xlu1 %v6311_v21, %s6159_s20 }
  0x1a   :  { %269 = vrot.lane.b32.xlu0 %v8352_v25, %s8306_s24 }
  0x1d   :  { %624 = vrot.lane.b32.xlu1 %v6321_v23, %s6160_s21 }
  0x21   :  { %185 = vperm.xlu1 %6145, %v172_v24  }
  0x7f   :  { %v252_v41 = vpop.permute.xlu1 %251 }
  0x82   :  { %v181_v26 = vpop.permute.xlu0 %180 }
  0x83   :  { %v6361_v46 = vpop.permute.xlu1 %253 }
  0x84   :  { %v6365_v47 = vsel %vm8277_vm8, %v252_v41, %v6361_v46  ;;  %vm8313_vm9 = vcmp.ne.s16.totalorder %v6361_v46, 0  ;;  %vm429_vm8 = vcmask 121856  }
  0x85   :  { %vm8315_vm10 = vcmp.ne.s16.totalorder %v6365_v47, 0 }
  0x86   :  { %v205_v32 = vpop.permute.xlu0 %204 }
  0x87   :  { %v6378_v49 = vpop.permute.xlu1 %408 }
  0x88   :  { %vm8311_vm6 = vcmp.ne.s16.totalorder %v6378_v49, 0 }
  0x8a   :  { %v407_v50 = vpop.permute.xlu0 %406 }
  0x8b   :  { %v6386_v52 = vsel %vm410_vm11, %v407_v50, %v6378_v49  ;;  %v6405_v56 = vpop.permute.xlu1 %486 }
  0x8c   :  { %vm8312_vm15 = vcmp.ne.s16.totalorder %v6386_v52, 0  ;;  %vm8323_vm12 = vcmp.ne.s16.totalorder %v6405_v56, 0 }
  0x8e   :  { %v485_v57 = vpop.permute.xlu0 %484 }
  0x8f   :  { %v6418_v60 = vsel %vm488_vm7, %v485_v57, %v6405_v56  ;;  %v625_v61 = vpop.permute.xlu1 %624 }
  0x90   :  { %vm8324_vm13 = vcmp.ne.s16.totalorder %v6418_v60, 0 }
  0x92   :  { %v6426_v62 = vpop.permute.xlu0 %622 }
  0x93   :  { %v6439_v3 = vsel %vm507_vm14, %v6426_v62, %v625_v61  ;;  %vm8322_vm2 = vcmp.ne.s16.totalorder %v6426_v62, 0 }
  0x94   :  { %vm8280_vm1 = vcmp.ne.s16.totalorder %v6439_v3, 0 }
  0x96   :  { %v270_v10 = vpop.permute.xlu0 %269 }
  0xa0   :  { %v186_v9 = vpop.permute.xlu1 %185 }
  0xdd   :  { %v6340_v27 = vpop.f32.mrb[0].mxu0 }
  0xde   :  { %8386 = vst [vmem:[#allocation5_spill] sm:$0xff] %v6340_v27  ;;  %v6342_v28 = vpop.f32.mrb[1].mxu0 }
  0xdf   :  { %8387 = vst [vmem:[#allocation6_spill] sm:$0xff] %v6342_v28  ;;  %v157_v29 = vpop.f32.mrb[2].mxu0  ;;  %v5665_v28 = vld [vmem:[%s8261_s4 + $0x1c] sm:$0xf] }
  0xe0   :  { %v190_v30 = vmul.f32 %v181_v26, %v157_v29  ;;  %v159_v31 = vpop.f32.mrb[3].mxu0 }
  0xe1   :  { %v191_v33 = vmul.f32 %v181_v26, %v159_v31 }
  0xe2   :  { %v214_v34 = vadd.f32 %v205_v32, %v190_v30 }
  0xe3   :  { %v215_v35 = vadd.f32 %v205_v32, %v191_v33 }
  0xe4   :  { %v220_v36 = vmax.f32 %v214_v34, 0.0 }
  0xe5   :  { %v221_v37 = vmax.f32 %v215_v35, 0.0  ;;  %v6344_v38 = vpop.f32.mrb[4].mxu0 }
  0xe6   :  { %v6346_v39 = vpack.c.bf16 %v220_v36, %v220_v36  ;;  %v6348_v40 = vpop.f32.mrb[5].mxu0  ;;  %v192_v33 = vmul.f32 %v186_v9, %v6344_v38 }
  0xe7   :  { %v6350_v42 = vpack.c.bf16 %v221_v37, %v221_v37  ;;  %v167_v43 = vpop.f32.mrb[6].mxu0  ;;  %v193_v31 = vmul.f32 %v186_v9, %v6348_v40 }
  0xe8   :  { %271 = vrot.lane.b32.xlu1 %v6346_v39, %s8306_s24  ;;  %v168_v44 = vpop.f32.mrb[7].mxu0  ;;  %v261_v51 = vsel %vm8315_vm10, %v6346_v39, 0  ;;  %v416_v54 = vsel %vm8312_vm15, %v6346_v39, 0  ;;  %v494_v0 = vsel %vm8324_vm13, %v6346_v39, 0  ;;  %v630_v6 = vsel %vm8322_vm2, %v6346_v39, 0 }
  0xe9   :  { %273 = vrot.lane.b32.xlu0 %v6350_v42, %s8306_s24  ;;  %v262_v48 = vsel %vm8313_vm9, %v6350_v42, 0  ;;  %v417_v58 = vsel %vm8311_vm6, %v6350_v42, 0  ;;  %v495_v63 = vsel %vm8323_vm12, %v6350_v42, 0  ;;  %v631_v5 = vsel %vm8280_vm1, %v6350_v42, 0 }
  0xea   :  { %vm8285_vm1 = vcmask 777216  }
  0xec   :  { %698 = vrot.lane.b32.xlu1 %v6301_v18, %s6163_s27 }
  0xed   :  { %209 = vperm.xlu0 %6144, %v196_v45  }
  0xf0   :  { %333 = vrot.lane.b32.xlu1 %v8352_v25, %s6164_s28 }
  0xf1   :  { %700 = vrot.lane.b32.xlu0 %v6311_v21, %s6163_s27 }
  0xf4   :  { %337 = vrot.lane.b32.xlu1 %v262_v48, %s6164_s28 }
  0xf5   :  { %335 = vrot.lane.b32.xlu0 %v261_v51, %s6164_s28 }
  0xf8   :  { %971 = vrot.lane.b32.xlu1 %v6311_v21, %s8295_s29 }
  0xf9   :  { %969 = vrot.lane.b32.xlu0 %v6301_v18, %s8295_s29  ;;  %s8356_s29 = smov 30  }
  0xfc   :  { %425 = vrot.lane.b32.xlu1 %v416_v54, %s6163_s27 }
  0xfd   :  { %423 = vrot.lane.b32.xlu0 %v8352_v25, %s6163_s27 }
 0x100   :  { %956 = vrot.lane.b32.xlu1 %v6400_v55, %s8287_s30 }
 0x101   :  { %427 = vrot.lane.b32.xlu0 %v417_v58, %s6163_s27 }
 0x104   :  { %501 = vrot.lane.b32.xlu1 %v8352_v25, %s6160_s21 }
 0x105   :  { %958 = vrot.lane.b32.xlu0 %v6414_v59, %s8287_s30  ;;  %s8335_s30 = smov 114  }
 0x108   :  { %505 = vrot.lane.b32.xlu1 %v495_v63, %s6160_s21 }
 0x109   :  { %503 = vrot.lane.b32.xlu0 %v494_v0, %s6160_s21 }
 0x10c   :  { %1175 = vrot.lane.b32.xlu1 %v6321_v23, %s8298_s14 }
 0x10d   :  { %1173 = vrot.lane.b32.xlu0 %v6306_v20, %s8298_s14  ;;  %s8406_s14 = smov 110  }
 0x110   :  { %640 = vrot.lane.b32.xlu1 %v631_v5, %s6159_s20 }
 0x111   :  { %638 = vrot.lane.b32.xlu0 %v630_v6, %s6159_s20 }
 0x114   :  { %1265 = vrot.lane.b32.xlu1 %v6457_v7, %s8300_s15 }
 0x115   :  { %642 = vrot.lane.b32.xlu0 %v8352_v25, %s6159_s20 }
 0x119   :  { %1267 = vrot.lane.b32.xlu0 %v6465_v8, %s8300_s15  ;;  %s8414_s15 = smov 95  }
 0x11d   :  { %1343 = vrot.lane.b32.xlu0 %v6400_v55, %s8308_s18 }
 0x15a   :  { %v272_v11 = vpop.permute.xlu1 %271 }
 0x15b   :  { %v276_v13 = vsel %vm8279_vm3, %v270_v10, %v272_v11  ;;  %v274_v15 = vpop.permute.xlu0 %273 }
 0x15c   :  { %v277_v17 = vsel %vm8279_vm3, %v272_v11, %v274_v15  ;;  %v284_v16 = vsel %vm282_vm4, %v276_v13, 0  ;;  %vm8282_vm3 = vcmask 138240   ;;  %v5650_v13 = vld [vmem:[%s8261_s4 + $0x8] sm:$0xf] }
 0x15d   :  { %5646 = vmatprep.subr.msk.bf16.mxu0 %vm282_vm4, %v277_v17 }
 0x15e   :  { %v6475_v19 = vpop.permute.xlu1 %698  ;;  %290 = vmatpush1.bf16.msra.mxu0 %v284_v16 }
 0x15f   :  { %vm8278_vm0 = vcmp.ne.s16.totalorder %v6475_v19, 0 }
 0x160   :  { %v706_v24 = vsel %vm8278_vm0, %v6346_v39, 0 }
 0x161   :  { %714 = vrot.lane.b32.xlu1 %v706_v24, %s6158_s17  ;;  %5647 = vmatmul.mubr.msk.bf16.vlgmr.msra.gmra.mrb[8].mxu0 %vm278_vm5, %v5645_v22 }
 0x162   :  { %v334_v26 = vpop.permute.xlu1 %333  ;;  %383 = vmatprep.mubr.bf16.mxu0 %v8375_v2 }
 0x165   :  { %718 = vrot.lane.b32.xlu1 %v8352_v25, %s6158_s17 }
 0x166   :  { %v338_v29 = vpop.permute.xlu1 %337 }
 0x169   :  { %1345 = vrot.lane.b32.xlu1 %v6414_v59, %s8308_s18  ;;  %s8327_s18 = smov 14  }
 0x16a   :  { %v6492_v32 = vpop.permute.xlu1 %971 }
 0x16c   :  { %v210_v30 = vpop.permute.xlu0 %209 }
 0x16d   :  { %v217_v34 = vadd.f32 %v210_v30, %v193_v31  ;;  %v216_v36 = vadd.f32 %v210_v30, %v192_v33 }
 0x16e   :  { %v426_v43 = vpop.permute.xlu1 %425 }
 0x16f   :  { %v223_v41 = vmax.f32 %v217_v34, 0.0  ;;  %v222_v38 = vmax.f32 %v216_v36, 0.0  ;;  %v5653_v36 = vld [vmem:[%s8261_s4 + $0xc] sm:$0xf] }
 0x170   :  { %v701_v35 = vpop.permute.xlu0 %700 }
 0x171   :  { %v6497_v37 = vsel %vm429_vm8, %v6475_v19, %v701_v35  ;;  %v6508_v51 = vpack.c.bf16 %v223_v41, %v223_v41  ;;  %v6516_v57 = vpack.c.bf16 %v222_v38, %v222_v38 }
 0x172   :  { %vm8281_vm0 = vcmp.ne.s16.totalorder %v6497_v37, 0  ;;  %v957_v61 = vpop.permute.xlu1 %956 }
 0x173   :  { %v707_v40 = vsel %vm8281_vm0, %v6350_v42, 0  ;;  %vm8283_vm0 = vcmp.ne.s16.totalorder %v6492_v32, 0 }
 0x174   :  { %v336_v44 = vpop.permute.xlu0 %335  ;;  %716 = vrot.lane.b32.xlu0 %v707_v40, %s6158_s17  ;;  %v980_v0 = vsel %vm8283_vm0, %v6508_v51, 0  ;;  %vm8290_vm0 = vcmask 769024  }
 0x175   :  { %v340_v45 = vsel %vm8282_vm3, %v334_v26, %v336_v44  ;;  %v341_v48 = vsel %vm8282_vm3, %v336_v44, %v338_v29 }
 0x176   :  { %5648 = vmatprep.subr.msk.bf16.mxu0 %vm282_vm4, %v341_v48  ;;  %v346_v50 = vsel %vm282_vm4, %v340_v45, 0  ;;  %v502_v6 = vpop.permute.xlu1 %501 }
 0x177   :  { %352 = vmatpush1.bf16.msra.mxu0 %v346_v50 }
 0x178   :  { %v970_v54 = vpop.permute.xlu0 %969  ;;  %986 = vrot.lane.b32.xlu0 %v8352_v25, %s6170_s26 }
 0x179   :  { %v6520_v58 = vsel %vm8285_vm1, %v970_v54, %v6492_v32 }
 0x17a   :  { %vm8284_vm3 = vcmp.ne.s16.totalorder %v6520_v58, 0  ;;  %5649 = vmatmul.mubr.msk.bf16.vlgmr.msra.gmra.mrb[8].mxu0 %vm278_vm5, %v263_v53  ;;  %v506_v16 = vpop.permute.xlu1 %505 }
 0x17b   :  { %v979_v63 = vsel %vm8284_vm3, %v6516_v57, 0  ;;  %473 = vmatprep.mubr.bf16.mxu0 %v8375_v2 }
 0x17c   :  { %v424_v4 = vpop.permute.xlu0 %423  ;;  %988 = vrot.lane.b32.xlu1 %v979_v63, %s6170_s26  ;;  %990 = vrot.lane.b32.xlu0 %v980_v0, %s6170_s26  ;;  %v5656_v0 = vld [vmem:[%s8261_s4 + $0x10] sm:$0xf] }
 0x17d   :  { %v430_v5 = vsel %vm429_vm8, %v424_v4, %v426_v43 }
 0x17e   :  { %v436_v11 = vsel %vm282_vm4, %v430_v5, 0  ;;  %v6566_v33 = vpop.permute.xlu1 %1175 }
 0x180   :  { %v428_v9 = vpop.permute.xlu0 %427  ;;  %1048 = vrot.lane.b32.xlu1 %v8352_v25, %s8360_s19 }
 0x181   :  { %v431_v10 = vsel %vm429_vm8, %v426_v43, %v428_v9  ;;  %v568_v43 = vsel %vm282_vm4, %v6346_v39, 0 }
 0x182   :  { %5651 = vmatprep.subr.msk.bf16.mxu0 %vm282_vm4, %v431_v10  ;;  %v641_v40 = vpop.permute.xlu1 %640 }
 0x183   :  { %442 = vmatpush1.bf16.msra.mxu0 %v436_v11 }
 0x184   :  { %v6542_v15 = vpop.permute.xlu0 %958 }
 0x185   :  { %vm8286_vm3 = vcmp.ne.s16.totalorder %v6542_v15, 0  ;;  %v6547_v17 = vsel %vm8290_vm0, %v957_v61, %v6542_v15 }
 0x186   :  { %5652 = vmatmul.mubr.msk.bf16.vlgmr.msra.gmra.mrb[8].mxu0 %vm278_vm5, %v5650_v13  ;;  %v967_v22 = vsel %vm8286_vm3, %v6508_v51, 0  ;;  %vm8289_vm1 = vcmp.ne.s16.totalorder %v6547_v17, 0  ;;  %vm8291_vm3 = vcmask 793600   ;;  %v1266_v50 = vpop.permute.xlu1 %1265 }
 0x187   :  { %1052 = vrot.lane.b32.xlu1 %v967_v22, %s8360_s19  ;;  %v966_v24 = vsel %vm8289_vm1, %v6516_v57, 0  ;;  %551 = vmatprep.mubr.bf16.mxu0 %v8375_v2  ;;  %vm8292_vm1 = vcmp.ne.s16.totalorder %v6566_v33, 0 }
 0x188   :  { %v504_v26 = vpop.permute.xlu0 %503  ;;  %1050 = vrot.lane.b32.xlu0 %v966_v24, %s8360_s19  ;;  %v1184_v44 = vsel %vm8292_vm1, %v6508_v51, 0 }
 0x189   :  { %v508_v29 = vsel %vm507_vm14, %v502_v6, %v504_v26  ;;  %v509_v30 = vsel %vm507_vm14, %v504_v26, %v506_v16  ;;  %v5659_v6 = vld [vmem:[%s8261_s4 + $0x14] sm:$0xf]  ;;  %v1422_v26 = vsel %vm8315_vm10, %v6516_v57, 0 }
 0x18a   :  { %5654 = vmatprep.subr.msk.bf16.mxu0 %vm282_vm4, %v509_v30  ;;  %v514_v31 = vsel %vm282_vm4, %v508_v29, 0  ;;  %v1423_v30 = vsel %vm8313_vm9, %v6508_v51, 0  ;;  %vm8342_vm9 = vcmask 932864  }
 0x18b   :  { %520 = vmatpush1.bf16.msra.mxu0 %v514_v31  ;;  %1114 = vrot.lane.b32.xlu1 %v6516_v57, %s8293_s25 }
 0x18c   :  { %v1174_v34 = vpop.permute.xlu0 %1173  ;;  %5657 = vmatprep.subr.msk.bf16.mxu0 %vm282_vm4, %v6350_v42  ;;  %1112 = vrot.lane.b32.xlu0 %v8352_v25, %s8293_s25 }
 0x18d   :  { %v6574_v35 = vsel %vm8291_vm3, %v1174_v34, %v6566_v33  ;;  %vm8304_vm3 = vcmask 801792  }
 0x18e   :  { %vm8297_vm0 = vcmp.ne.s16.totalorder %v6574_v35, 0 }
 0x18f   :  { %1190 = vrot.lane.b32.xlu1 %v8352_v25, %s8358_s22  ;;  %v1183_v38 = vsel %vm8297_vm0, %v6516_v57, 0 }
 0x190   :  { %v639_v41 = vpop.permute.xlu0 %638  ;;  %1116 = vrot.lane.b32.xlu0 %v6508_v51, %s8293_s25  ;;  %s8337_s25 = smov 126  }
 0x191   :  { %v644_v61 = vsel %vm488_vm7, %v639_v41, %v641_v40  ;;  %v5662_v41 = vld [vmem:[%s8261_s4 + $0x18] sm:$0xf] }
 0x192   :  { %5655 = vmatmul.mubr.msk.bf16.vlgmr.msra.gmra.mrb[8].mxu0 %vm278_vm5, %v5653_v36  ;;  %v650_v4 = vsel %vm282_vm4, %v644_v61, 0  ;;  %v5671_v61 = vld [vmem:[%s8262_s7 + $0x4] sm:$0xf] }
 0x193   :  { %574 = vmatpush1.bf16.msra.mxu0 %v568_v43  ;;  %1194 = vrot.lane.b32.xlu1 %v1184_v44, %s8358_s22  ;;  %v1552_v43 = vsel %vm8312_vm15, %v6516_v57, 0  ;;  %vm8345_vm15 = vcmask 252928  }
 0x194   :  { %v643_v45 = vpop.permute.xlu0 %642  ;;  %1192 = vrot.lane.b32.xlu0 %v1183_v38, %s8358_s22  ;;  %605 = vmatprep.mubr.bf16.mxu0 %v8375_v2 }
 0x195   :  { %v645_v48 = vsel %vm488_vm7, %v641_v40, %v643_v45 }
 0x196   :  { %5660 = vmatprep.subr.msk.bf16.mxu0 %vm282_vm4, %v645_v48 }
 0x197   :  { %1621 = vrot.lane.b32.xlu1 %v6465_v8, %s8335_s30 }
 0x198   :  { %v6601_v53 = vpop.permute.xlu0 %1267  ;;  %1619 = vrot.lane.b32.xlu0 %v6457_v7, %s8335_s30 }
 0x199   :  { %v6607_v54 = vsel %vm8304_vm3, %v1266_v50, %v6601_v53  ;;  %vm8302_vm0 = vcmp.ne.s16.totalorder %v6601_v53, 0 }
 0x19a   :  { %vm8303_vm1 = vcmp.ne.s16.totalorder %v6607_v54, 0  ;;  %v1276_v5 = vsel %vm8302_vm0, %v6508_v51, 0  ;;  %vm8317_vm0 = vcmask 900096  }
 0x19b   :  { %v1275_v63 = vsel %vm8303_vm1, %v6516_v57, 0 }
 0x19c   :  { %1282 = vrot.lane.b32.xlu0 %v8352_v25, %s8356_s29  ;;  %1284 = vrot.lane.b32.xlu1 %v1275_v63, %s8356_s29  ;;  %v1344_v11 = vpop.permute.xlu0 %1343  ;;  %v1553_v63 = vsel %vm8311_vm6, %v6508_v51, 0  ;;  %vm8314_vm6 = vcmask 261120  }
 0x19e   :  { %5658 = vmatmul.mubr.msk.bf16.vlgmr.msra.gmra.mrb[8].mxu0 %vm278_vm5, %v5656_v0 }
 0x19f   :  { %656 = vmatpush1.bf16.msra.mxu0 %v650_v4  ;;  %687 = vmatprep.mubr.bf16.mxu0 %v8375_v2 }
 0x1a0   :  { %1286 = vrot.lane.b32.xlu0 %v1276_v5, %s8356_s29  ;;  %1697 = vrot.lane.b32.xlu1 %v6400_v55, %s8337_s25 }
 0x1a4   :  { %1699 = vrot.lane.b32.xlu0 %v6414_v59, %s8337_s25  ;;  %1360 = vrot.lane.b32.xlu1 %v8352_v25, %s8354_s23 }
 0x1aa   :  { %5661 = vmatmul.mubr.msk.bf16.vlgmr.msra.gmra.mrb[8].mxu0 %vm278_vm5, %v5659_v6 }
 0x1ab   :  { %763 = vmatprep.mubr.bf16.mxu0 %v8375_v2 }
 0x1d3   :  { %v715_v9 = vpop.permute.xlu1 %714 }
 0x1d7   :  { %v719_v10 = vpop.permute.xlu1 %718 }
 0x1db   :  { %v6639_v13 = vpop.permute.xlu1 %1345 }
 0x1dc   :  { %vm8305_vm1 = vcmp.ne.s16.totalorder %v6639_v13, 0  ;;  %v6644_v16 = vsel %vm8317_vm0, %v1344_v11, %v6639_v13  ;;  %vm8340_vm0 = vcmask 1031168  }
 0x1dd   :  { %v1354_v22 = vsel %vm8305_vm1, %v6508_v51, 0  ;;  %vm8310_vm3 = vcmp.ne.s16.totalorder %v6644_v16, 0  ;;  %vm8351_vm1 = vcmask 269312  }
 0x1de   :  { %1364 = vrot.lane.b32.xlu1 %v1354_v22, %s8354_s23  ;;  %v1353_v24 = vsel %vm8310_vm3, %v6516_v57, 0  ;;  %vm8319_vm3 = vcmask 277504   ;;  %v968_v22 = vld [vmem:[%s8262_s7] sm:$0xf] }
 0x1df   :  { %1362 = vrot.lane.b32.xlu0 %v1353_v24, %s8354_s23 }
 0x1e2   :  { %1431 = vrot.lane.b32.xlu1 %v1422_v26, %s6164_s28 }
 0x1e3   :  { %1429 = vrot.lane.b32.xlu0 %v8352_v25, %s6164_s28 }
 0x1e6   :  { %v717_v29 = vpop.permute.xlu0 %716  ;;  %1491 = vrot.lane.b32.xlu1 %v8352_v25, %s8306_s24 }
 0x1e7   :  { %v720_v31 = vsel %vm410_vm11, %v715_v9, %v717_v29  ;;  %1433 = vrot.lane.b32.xlu0 %v1423_v30, %s6164_s28  ;;  %v721_v34 = vsel %vm410_vm11, %v717_v29, %v719_v10 }
 0x1e8   :  { %5663 = vmatprep.subr.msk.bf16.mxu0 %vm282_vm4, %v721_v34  ;;  %v726_v36 = vsel %vm282_vm4, %v720_v31, 0 }
 0x1e9   :  { %732 = vmatpush1.bf16.msra.mxu0 %v726_v36 }
 0x1ea   :  { %v987_v40 = vpop.permute.xlu0 %986  ;;  %1495 = vrot.lane.b32.xlu1 %v6508_v51, %s8306_s24 }
 0x1eb   :  { %1493 = vrot.lane.b32.xlu0 %v6516_v57, %s8306_s24  ;;  %s8325_s24 = smov 2  }
 0x1ec   :  { %5664 = vmatmul.mubr.msk.bf16.vlgmr.msra.gmra.mrb[8].mxu0 %vm278_vm5, %v5662_v41 }
 0x1ed   :  { %1036 = vmatprep.mubr.bf16.mxu0 %v8375_v2 }
 0x1ee   :  { %v989_v44 = vpop.permute.xlu1 %988  ;;  %v991_v38 = vpop.permute.xlu0 %990  ;;  %1561 = vrot.lane.b32.xlu1 %v1552_v43, %s6163_s27 }
 0x1ef   :  { %v993_v45 = vsel %vm8351_vm1, %v987_v40, %v989_v44  ;;  %v994_v48 = vsel %vm8351_vm1, %v989_v44, %v991_v38  ;;  %1559 = vrot.lane.b32.xlu0 %v8352_v25, %s6163_s27  ;;  %v5676_v38 = vld [vmem:[%s8262_s7 + $0x8] sm:$0xf] }
 0x1f0   :  { %5672 = vmatprep.subr.msk.bf16.mxu0 %vm282_vm4, %v994_v48  ;;  %v999_v50 = vsel %vm282_vm4, %v993_v45, 0 }
 0x1f1   :  { %1005 = vmatpush1.bf16.msra.mxu0 %v999_v50 }
 0x1f2   :  { %1971 = vrot.lane.b32.xlu1 %v6457_v7, %s8325_s24  ;;  %v1049_v0 = vpop.permute.xlu1 %1048 }
 0x1f3   :  { %1563 = vrot.lane.b32.xlu0 %v1553_v63, %s6163_s27 }
 0x1f4   :  { %5673 = vmatmul.mubr.msk.bf16.vlgmr.msra.gmra.mrb[12].mxu0 %vm278_vm5, %v5671_v61 }
 0x1f5   :  { %1098 = vmatprep.mubr.bf16.mxu0 %v8375_v2 }
 0x1f6   :  { %1636 = vrot.lane.b32.xlu1 %v8352_v25, %s8327_s18 }
 0x1f7   :  { %1973 = vrot.lane.b32.xlu0 %v6465_v8, %s8325_s24 }
 0x1f9   :  { %v1053_v4 = vpop.permute.xlu1 %1052 }
 0x1fa   :  { %v1051_v5 = vpop.permute.xlu0 %1050 }
 0x1fb   :  { %v1055_v6 = vsel %vm8319_vm3, %v1049_v0, %v1051_v5  ;;  %v1056_v9 = vsel %vm8319_vm3, %v1051_v5, %v1053_v4 }
 0x1fc   :  { %5674 = vmatprep.subr.msk.bf16.mxu0 %vm282_vm4, %v1056_v9  ;;  %v1061_v10 = vsel %vm282_vm4, %v1055_v6, 0 }
 0x1fd   :  { %1067 = vmatpush1.bf16.msra.mxu0 %v1061_v10  ;;  %v1115_v11 = vpop.permute.xlu1 %1114 }
 0x1fe   :  { %v1113_v24 = vpop.permute.xlu0 %1112 }
 0x1ff   :  { %v1119_v26 = vsel %vm8314_vm6, %v1113_v24, %v1115_v11 }
 0x200   :  { %5675 = vmatmul.mubr.msk.bf16.vlgmr.msra.gmra.mrb[12].mxu0 %vm278_vm5, %v968_v22  ;;  %v1125_v34 = vsel %vm282_vm4, %v1119_v26, 0 }
 0x201   :  { %v1191_v29 = vpop.permute.xlu1 %1190  ;;  %1162 = vmatprep.mubr.bf16.mxu0 %v8375_v2 }
 0x202   :  { %v1117_v30 = vpop.permute.xlu0 %1116 }
 0x203   :  { %v1120_v31 = vsel %vm8314_vm6, %v1115_v11, %v1117_v30  ;;  %v5679_v11 = vld [vmem:[%s8262_s7 + $0xc] sm:$0xf] }
 0x204   :  { %5677 = vmatprep.subr.msk.bf16.mxu0 %vm282_vm4, %v1120_v31  ;;  %v1776_v31 = vsel %vm8324_vm13, %v6516_v57, 0 }
 0x205   :  { %1131 = vmatpush1.bf16.msra.mxu0 %v1125_v34  ;;  %v1195_v36 = vpop.permute.xlu1 %1194  ;;  %v1777_v34 = vsel %vm8323_vm12, %v6508_v51, 0  ;;  %vm8395_vm12 = vcmask 130048  }
 0x206   :  { %v1193_v41 = vpop.permute.xlu0 %1192  ;;  %vm8396_vm13 = vmmov %vm8395_vm12 }
 0x207   :  { %v1198_v40 = vsel %vm8345_vm15, %v1193_v41, %v1195_v36  ;;  %v1197_v43 = vsel %vm8345_vm15, %v1191_v29, %v1193_v41  ;;  %v5682_v36 = vld [vmem:[%s8262_s7 + $0x10] sm:$0xf]  ;;  %v1903_v41 = vsel %vm8322_vm2, %v6516_v57, 0 }
 0x208   :  { %5680 = vmatprep.subr.msk.bf16.mxu0 %vm282_vm4, %v1198_v40  ;;  %v1203_v61 = vsel %vm282_vm4, %v1197_v43, 0 }
 0x209   :  { %v6721_v44 = vpop.permute.xlu1 %1621 }
 0x20a   :  { %8388 = vst [vmem:[#allocation7_spill] sm:$0xff] %v6721_v44  ;;  %v1620_v45 = vpop.permute.xlu0 %1619  ;;  %vm8316_vm6 = vcmp.ne.s16.totalorder %v6721_v44, 0 }
 0x20b   :  { %v6729_v48 = vsel %vm8342_vm9, %v1620_v45, %v6721_v44  ;;  %v1630_v50 = vsel %vm8316_vm6, %v6508_v51, 0  ;;  %vm8341_vm6 = vcmask 244736  }
 0x20c   :  { %8389 = vst [vmem:[#allocation8_spill] sm:$0xff] %v6729_v48  ;;  %vm8318_vm10 = vcmp.ne.s16.totalorder %v6729_v48, 0  ;;  %5678 = vmatmul.mubr.msk.bf16.vlgmr.msra.gmra.mrb[12].mxu0 %vm278_vm5, %v5676_v38  ;;  %1640 = vrot.lane.b32.xlu1 %v1630_v50, %s8327_s18 }
 0x20d   :  { %1209 = vmatpush1.bf16.msra.mxu0 %v1203_v61  ;;  %v1629_v63 = vsel %vm8318_vm10, %v6516_v57, 0  ;;  %1240 = vmatprep.mubr.bf16.mxu0 %v8375_v2 }
 0x20e   :  { %v1283_v0 = vpop.permute.xlu0 %1282  ;;  %1638 = vrot.lane.b32.xlu0 %v1629_v63, %s8327_s18  ;;  %v1285_v4 = vpop.permute.xlu1 %1284 }
 0x20f   :  { %v1289_v10 = vsel %vm8341_vm6, %v1283_v0, %v1285_v4 }
 0x210   :  { %2049 = vrot.lane.b32.xlu1 %v6414_v59, %s8327_s18  ;;  %v1295_v26 = vsel %vm282_vm4, %v1289_v10, 0 }
 0x212   :  { %v1287_v5 = vpop.permute.xlu0 %1286  ;;  %2047 = vrot.lane.b32.xlu0 %v6400_v55, %s8327_s18  ;;  %v1698_v9 = vpop.permute.xlu1 %1697  ;;  %s8477_s18 = smov 34  }
 0x213   :  { %v1290_v6 = vsel %vm8341_vm6, %v1285_v4, %v1287_v5  ;;  %v5685_v4 = vld [vmem:[%s8262_s7 + $0x14] sm:$0xf] }
 0x214   :  { %5683 = vmatprep.subr.msk.bf16.mxu0 %vm282_vm4, %v1290_v6 }
 0x216   :  { %v6753_v22 = vpop.permute.xlu0 %1699  ;;  %1714 = vrot.lane.b32.xlu0 %v8352_v25, %s8325_s24  ;;  %v1361_v43 = vpop.permute.xlu1 %1360 }
 0x217   :  { %8390 = vst [vmem:[#allocation9_spill] sm:$0xff] %v6753_v22  ;;  %v6759_v24 = vsel %vm8340_vm0, %v1698_v9, %v6753_v22  ;;  %vm8320_vm10 = vcmp.ne.s16.totalorder %v6753_v22, 0 }
 0x218   :  { %8391 = vst [vmem:[#allocation10_spill] sm:$0xff] %v6759_v24  ;;  %vm8321_vm3 = vcmp.ne.s16.totalorder %v6759_v24, 0  ;;  %5681 = vmatmul.mubr.msk.bf16.vlgmr.msra.gmra.mrb[12].mxu0 %vm278_vm5, %v5679_v11  ;;  %v1708_v29 = vsel %vm8320_vm10, %v6508_v51, 0  ;;  %vm8392_vm10 = vcmp.ne.s16.totalorder %v6439_v3, 0 }
 0x219   :  { %1301 = vmatpush1.bf16.msra.mxu0 %v1295_v26  ;;  %v1707_v30 = vsel %vm8321_vm3, %v6516_v57, 0  ;;  %1332 = vmatprep.mubr.bf16.mxu0 %v8375_v2  ;;  %v1904_v40 = vsel %vm8392_vm10, %v6508_v51, 0  ;;  %vm8339_vm3 = vcmask 146432   ;;  %vm8393_vm10 = vcmask 138240  }
 0x21a   :  { %1718 = vrot.lane.b32.xlu0 %v1708_v29, %s8325_s24  ;;  %1716 = vrot.lane.b32.xlu1 %v1707_v30, %s8325_s24  ;;  %vm8394_vm2 = vmmov %vm8393_vm10  ;;  %s6180_s24 = smov 112  }
 0x21e   :  { %1785 = vrot.lane.b32.xlu0 %v1776_v31, %s6160_s21  ;;  %1783 = vrot.lane.b32.xlu1 %v8352_v25, %s6160_s21 }
 0x222   :  { %840 = vrot.lane.b32.xlu0 %v6306_v20, %s6164_s28  ;;  %1787 = vrot.lane.b32.xlu1 %v1777_v34, %s6160_s21 }
 0x224   :  { %5684 = vmatmul.mubr.msk.bf16.vlgmr.msra.gmra.mrb[12].mxu0 %vm278_vm5, %v5682_v36 }
 0x225   :  { %1410 = vmatprep.mubr.bf16.mxu0 %v8375_v2 }
 0x226   :  { %1911 = vrot.lane.b32.xlu0 %v1903_v41, %s6159_s20  ;;  %842 = vrot.lane.b32.xlu1 %v6321_v23, %s6164_s28  ;;  %v5688_v41 = vld [vmem:[%s8262_s7 + $0x18] sm:$0xf] }
 0x22a   :  { %1915 = vrot.lane.b32.xlu0 %v8352_v25, %s6159_s20  ;;  %1913 = vrot.lane.b32.xlu1 %v1904_v40, %s6159_s20 }
 0x22e   :  { %2326 = vrot.lane.b32.xlu0 %v6465_v8, %s8354_s23  ;;  %2324 = vrot.lane.b32.xlu1 %v6457_v7, %s8354_s23  ;;  %s8488_s23 = smov 18  }
 0x250   :  { %v1365_v38 = vpop.permute.xlu1 %1364 }
 0x251   :  { %v1363_v45 = vpop.permute.xlu0 %1362 }
 0x252   :  { %v1367_v50 = vsel %vm8339_vm3, %v1361_v43, %v1363_v45  ;;  %v1368_v61 = vsel %vm8339_vm3, %v1363_v45, %v1365_v38 }
 0x253   :  { %5686 = vmatprep.subr.msk.bf16.mxu0 %vm282_vm4, %v1368_v61  ;;  %v1373_v63 = vsel %vm282_vm4, %v1367_v50, 0 }
 0x254   :  { %1379 = vmatpush1.bf16.msra.mxu0 %v1373_v63  ;;  %v1432_v0 = vpop.permute.xlu1 %1431 }
 0x255   :  { %v1430_v5 = vpop.permute.xlu0 %1429 }
 0x256   :  { %v1435_v6 = vsel %vm8393_vm10, %v1430_v5, %v1432_v0  ;;  %vm8331_vm10 = vcmask 113664  }
 0x257   :  { %5687 = vmatmul.mubr.msk.bf16.vlgmr.msra.gmra.mrb[12].mxu0 %vm278_vm5, %v5685_v4  ;;  %v1441_v26 = vsel %vm282_vm4, %v1435_v6, 0  ;;  %v5691_v6 = vld [vmem:[%s8262_s7 + $0x1c] sm:$0xf] }
 0x258   :  { %v1492_v9 = vpop.permute.xlu1 %1491  ;;  %1478 = vmatprep.mubr.bf16.mxu0 %v8375_v2 }
 0x259   :  { %v1434_v10 = vpop.permute.xlu0 %1433 }
 0x25a   :  { %v1436_v11 = vsel %vm8394_vm2, %v1432_v0, %v1434_v10 }
 0x25b   :  { %5689 = vmatprep.subr.msk.bf16.mxu0 %vm282_vm4, %v1436_v11  ;;  %v5694_v11 = vld [vmem:[%s8262_s7 + $0x20] sm:$0xf] }
 0x25c   :  { %1447 = vmatpush1.bf16.msra.mxu0 %v1441_v26  ;;  %v1496_v29 = vpop.permute.xlu1 %1495 }
 0x25d   :  { %v1494_v30 = vpop.permute.xlu0 %1493 }
 0x25e   :  { %v1498_v31 = vsel %vm8395_vm12, %v1494_v30, %v1496_v29  ;;  %v1497_v34 = vsel %vm8396_vm13, %v1492_v9, %v1494_v30  ;;  %vm8332_vm12 = vcmask 15360  }
 0x25f   :  { %5692 = vmatprep.subr.msk.bf16.mxu0 %vm282_vm4, %v1498_v31  ;;  %v1503_v43 = vsel %vm282_vm4, %v1497_v34, 0 }
 0x260   :  { %v1562_v36 = vpop.permute.xlu1 %1561 }
 0x261   :  { %v1560_v40 = vpop.permute.xlu0 %1559 }
 0x262   :  { %v1565_v4 = vsel %vm429_vm8, %v1560_v40, %v1562_v36 }
 0x263   :  { %5690 = vmatmul.mubr.msk.bf16.vlgmr.msra.gmra.mrb[12].mxu0 %vm278_vm5, %v5688_v41  ;;  %v1571_v9 = vsel %vm282_vm4, %v1565_v4, 0 }
 0x264   :  { %1509 = vmatpush1.bf16.msra.mxu0 %v1503_v43  ;;  %v6828_v38 = vpop.permute.xlu1 %1971  ;;  %1540 = vmatprep.mubr.bf16.mxu0 %v8375_v2 }
 0x265   :  { %8397 = vst [vmem:[#allocation11_spill] sm:$0xff] %v6828_v38  ;;  %v1564_v45 = vpop.permute.xlu0 %1563  ;;  %vm8330_vm2 = vcmp.ne.s16.totalorder %v6828_v38, 0 }
 0x266   :  { %v1566_v50 = vsel %vm429_vm8, %v1562_v36, %v1564_v45  ;;  %v1979_v61 = vsel %vm8330_vm2, %v6516_v57, 0  ;;  %v5697_v36 = vld [vmem:[%s8262_s7 + $0x24] sm:$0xf] }
 0x267   :  { %5695 = vmatprep.subr.msk.bf16.mxu0 %vm282_vm4, %v1566_v50  ;;  %1987 = vrot.lane.b32.xlu1 %v1979_v61, %s8337_s25 }
 0x268   :  { %v1637_v10 = vpop.permute.xlu1 %1636 }
 0x269   :  { %v1974_v63 = vpop.permute.xlu0 %1973 }
 0x26a   :  { %v6840_v0 = vsel %vm8332_vm12, %v6828_v38, %v1974_v63  ;;  %v8440_v38 = vmov 0  }
 0x26b   :  { %8398 = vst [vmem:[#allocation12_spill] sm:$0xff] %v6840_v0  ;;  %vm8329_vm13 = vcmp.ne.s16.totalorder %v6840_v0, 0  ;;  %1991 = vrot.lane.b32.xlu1 %v8352_v25, %s8337_s25  ;;  %v5668_v0 = vld [vmem:[%s8261_s4 + $0x20] sm:$0xf] }
 0x26c   :  { %v1980_v5 = vsel %vm8329_vm13, %v6508_v51, 0 }
 0x26d   :  { %1989 = vrot.lane.b32.xlu0 %v1980_v5, %s8337_s25  ;;  %s8409_s25 = smov 98  }
 0x26f   :  { %5693 = vmatmul.mubr.msk.bf16.vlgmr.msra.gmra.mrb[12].mxu0 %vm278_vm5, %v5691_v6  ;;  %2402 = vrot.lane.b32.xlu1 %v6414_v59, %s8356_s29 }
 0x270   :  { %1577 = vmatpush1.bf16.msra.mxu0 %v1571_v9  ;;  %1608 = vmatprep.mubr.bf16.mxu0 %v8375_v2 }
 0x271   :  { %2400 = vrot.lane.b32.xlu0 %v6400_v55, %s8356_s29  ;;  %s8425_s29 = smov 16  }
 0x27b   :  { %5696 = vmatmul.mubr.msk.bf16.vlgmr.msra.gmra.mrb[12].mxu0 %vm278_vm5, %v5694_v11 }
 0x27c   :  { %1686 = vmatprep.mubr.bf16.mxu0 %v8375_v2 }
 0x27e   :  { %v1641_v26 = vpop.permute.xlu1 %1640 }
 0x280   :  { %v1639_v29 = vpop.permute.xlu0 %1638 }
 0x281   :  { %v1643_v59 = vsel %vm8331_vm10, %v1637_v10, %v1639_v29  ;;  %v1644_v30 = vsel %vm8331_vm10, %v1639_v29, %v1641_v26  ;;  %v5700_v10 = vld [vmem:[%s8262_s7 + $0x28] sm:$0xf] }
 0x282   :  { %5698 = vmatprep.subr.msk.bf16.mxu0 %vm282_vm4, %v1644_v30  ;;  %v1649_v55 = vsel %vm282_vm4, %v1643_v59, 0  ;;  %v2050_v31 = vpop.permute.xlu1 %2049 }
 0x283   :  { %1655 = vmatpush1.bf16.msra.mxu0 %v1649_v55 }
 0x284   :  { %v6869_v34 = vpop.permute.xlu0 %2047 }
 0x285   :  { %8399 = vst [vmem:[#allocation13_spill] sm:$0xff] %v6869_v34  ;;  %vm8334_vm13 = vcmp.ne.s16.totalorder %v6869_v34, 0  ;;  %v6877_v41 = vsel %vm8331_vm10, %v6869_v34, %v2050_v31  ;;  %vm8401_vm10 = vcmp.ne.s16.totalorder %v6475_v19, 0 }
 0x286   :  { %8400 = vst [vmem:[#allocation14_spill] sm:$0xff] %v6877_v41  ;;  %vm8333_vm2 = vcmp.ne.s16.totalorder %v6877_v41, 0  ;;  %v2055_v40 = vsel %vm8334_vm13, %v6516_v57, 0  ;;  %v2123_v6 = vsel %vm8401_vm10, %v6516_v57, 0  ;;  %vm8403_vm10 = vcmask 138240  }
 0x287   :  { %v2056_v43 = vsel %vm8333_vm2, %v6508_v51, 0  ;;  %2063 = vrot.lane.b32.xlu0 %v2055_v40, %s8335_s30  ;;  %5699 = vmatmul.mubr.msk.bf16.vlgmr.msra.gmra.mrb[12].mxu0 %vm278_vm5, %v5697_v36 }
 0x288   :  { %v1715_v45 = vpop.permute.xlu0 %1714  ;;  %2065 = vrot.lane.b32.xlu1 %v2056_v43, %s8335_s30  ;;  %1764 = vmatprep.mubr.bf16.mxu0 %v8375_v2 }
 0x28b   :  { %2067 = vrot.lane.b32.xlu0 %v8352_v25, %s8335_s30  ;;  %s8348_s30 = smov 96  }
 0x28c   :  { %v1719_v50 = vpop.permute.xlu0 %1718  ;;  %2476 = vrot.lane.b32.xlu1 %v6301_v18, %s8358_s22  ;;  %v1717_v61 = vpop.permute.xlu1 %1716 }
 0x28d   :  { %v1721_v63 = vsel %vm8332_vm12, %v1715_v45, %v1717_v61  ;;  %v1722_v4 = vsel %vm8332_vm12, %v1717_v61, %v1719_v50  ;;  %vm8402_vm12 = vcmp.ne.s16.totalorder %v6497_v37, 0  ;;  %v5703_v45 = vld [vmem:[%s8262_s7 + $0x2c] sm:$0xf]  ;;  %v1849_v50 = vsel %vm282_vm4, %v6516_v57, 0 }
 0x28e   :  { %5701 = vmatprep.subr.msk.bf16.mxu0 %vm282_vm4, %v1722_v4  ;;  %v1727_v5 = vsel %vm282_vm4, %v1721_v63, 0  ;;  %v2124_v11 = vsel %vm8402_vm12, %v6508_v51, 0  ;;  %v6181_v63 = vmov -inf  }
 0x28f   :  { %2478 = vrot.lane.b32.xlu0 %v6311_v21, %s8358_s22  ;;  %1733 = vmatpush1.bf16.msra.mxu0 %v1727_v5  ;;  %86 = vst [vmem:[#allocation2] sm:$0xf] %v6181_v63  ;;  %87 = vst [vmem:[#allocation2 + $0xc] sm:$0xf] %v6181_v63  ;;  %s8482_s22 = smov 31  }
 0x290   :  { %v1786_v9 = vpop.permute.xlu0 %1785  ;;  %2131 = vrot.lane.b32.xlu1 %v2123_v6, %s6158_s17  ;;  %v1784_v18 = vpop.permute.xlu1 %1783 }
 0x291   :  { %v1789_v26 = vsel %vm507_vm14, %v1784_v18, %v1786_v9  ;;  %v5706_v18 = vld [vmem:[%s8262_s7 + $0x30] sm:$0xf] }
 0x292   :  { %v1795_v30 = vsel %vm282_vm4, %v1789_v26, 0  ;;  %v6995_v26 = vld [vmem:[%s8257_s0 + $0x8] sm:$0xff]  ;;  %s8411_s0 = smov 97  }
 0x293   :  { %2133 = vrot.lane.b32.xlu0 %v2124_v11, %s6158_s17  ;;  %5702 = vmatmul.mubr.msk.bf16.vlgmr.msra.gmra.mrb[12].mxu0 %vm278_vm5, %v5700_v10 }
 0x294   :  { %v6913_v21 = vpop.permute.xlu0 %840  ;;  %2135 = vrot.lane.b32.xlu1 %v8352_v25, %s6158_s17  ;;  %v1788_v29 = vpop.permute.xlu1 %1787  ;;  %1832 = vmatprep.mubr.bf16.mxu0 %v8375_v2 }
 0x295   :  { %v1790_v59 = vsel %vm507_vm14, %v1786_v9, %v1788_v29  ;;  %vm845_vm12 = vcmp.ne.s16.totalorder %v6913_v21, 0 }
 0x296   :  { %5704 = vmatprep.subr.msk.bf16.mxu0 %vm282_vm4, %v1790_v59  ;;  %v2256_v61 = vsel %vm845_vm12, %v6516_v57, 0 }
 0x297   :  { %2196 = vrot.lane.b32.xlu0 %v6516_v57, %s6180_s24  ;;  %1801 = vmatpush1.bf16.msra.mxu0 %v1795_v30  ;;  %v7001_v30 = vld [vmem:[#allocation2] sm:$0xff] }
 0x298   :  { %v1912_v55 = vpop.permute.xlu0 %1911  ;;  %2198 = vrot.lane.b32.xlu1 %v6508_v51, %s6180_s24  ;;  %5707 = vmatprep.subr.msk.bf16.mxu0 %vm282_vm4, %v6508_v51  ;;  %v843_v31 = vpop.permute.xlu1 %842 }
 0x299   :  { %v6932_v36 = vsel %vm8403_vm10, %v6913_v21, %v843_v31  ;;  %v7005_v31 = vld [vmem:[#allocation2 + $0x4] sm:$0xff] }
 0x29a   :  { %vm846_vm2 = vcmp.ne.s16.totalorder %v6932_v36, 0 }
 0x29b   :  { %2200 = vrot.lane.b32.xlu0 %v8352_v25, %s6180_s24  ;;  %v2257_v5 = vsel %vm846_vm2, %v6508_v51, 0 }
 0x29c   :  { %v1916_v40 = vpop.permute.xlu0 %1915  ;;  %2615 = vrot.lane.b32.xlu1 %v6306_v20, %s6170_s26  ;;  %v1914_v43 = vpop.permute.xlu1 %1913 }
 0x29d   :  { %v1918_v20 = vsel %vm488_vm7, %v1914_v43, %v1916_v40  ;;  %v1917_v9 = vsel %vm488_vm7, %v1912_v55, %v1914_v43  ;;  %v7003_v55 = vld [vmem:[#allocation2 + $0x8] sm:$0xf] }
 0x29e   :  { %v1923_v11 = vsel %vm282_vm4, %v1917_v9, 0  ;;  %3145 = vst [vmem:[#allocation2 + $0x4] sm:$0xff] %v6995_v26  ;;  %v5712_v9 = vld [vmem:[%s8262_s7 + $0x38] sm:$0xf] }
 0x29f   :  { %2617 = vrot.lane.b32.xlu0 %v6321_v23, %s6170_s26  ;;  %5705 = vmatmul.mubr.msk.bf16.vlgmr.msra.gmra.mrb[12].mxu0 %vm278_vm5, %v5703_v45 }
 0x2a0   :  { %1855 = vmatpush1.bf16.msra.mxu0 %v1849_v50  ;;  %2264 = vrot.lane.b32.xlu1 %v2256_v61, %s6157_s16  ;;  %v2327_v23 = vpop.permute.xlu0 %2326  ;;  %v6952_v4 = vpop.permute.xlu1 %2324 }
 0x2a1   :  { %5710 = vmatprep.subr.msk.bf16.mxu0 %vm282_vm4, %v1918_v20  ;;  %1886 = vmatprep.mubr.bf16.mxu0 %v8375_v2  ;;  %8404 = vst [vmem:[#allocation15_spill] sm:$0xff] %v6952_v4  ;;  %v6962_v6 = vsel %vm8339_vm3, %v6952_v4, %v2327_v23  ;;  %vm2329_vm10 = vcmp.ne.s16.totalorder %v6952_v4, 0 }
 0x2a2   :  { %8405 = vst [vmem:[#allocation16_spill] sm:$0xff] %v6962_v6  ;;  %vm8347_vm13 = vcmp.ne.s16.totalorder %v6962_v6, 0  ;;  %v2332_v10 = vsel %vm2329_vm10, %v6516_v57, 0 }
 0x2a3   :  { %2266 = vrot.lane.b32.xlu0 %v2257_v5, %s6157_s16 }
 0x2a4   :  { %2268 = vrot.lane.b32.xlu1 %v8352_v25, %s6157_s16 }
 0x2a7   :  { %2691 = vrot.lane.b32.xlu0 %v6457_v7, %s8360_s19  ;;  %v2333_v7 = vsel %vm8347_vm13, %v6508_v51, 0 }
 0x2a8   :  { %2693 = vrot.lane.b32.xlu1 %v6465_v8, %s8360_s19  ;;  %v5709_v8 = vld [vmem:[%s8262_s7 + $0x34] sm:$0xf] }
 0x2ab   :  { %5708 = vmatmul.mubr.msk.bf16.vlgmr.msra.gmra.mrb[12].mxu0 %vm278_vm5, %v5706_v18  ;;  %2340 = vrot.lane.b32.xlu0 %v2332_v10, %s8406_s14 }
 0x2ac   :  { %1929 = vmatpush1.bf16.msra.mxu0 %v1923_v11  ;;  %2342 = vrot.lane.b32.xlu1 %v2333_v7, %s8406_s14 }
 0x2ad   :  { %1960 = vmatprep.mubr.bf16.mxu0 %v8375_v2 }
 0x2af   :  { %2344 = vrot.lane.b32.xlu0 %v8352_v25, %s8406_s14 }
 0x2b7   :  { %5711 = vmatmul.mubr.msk.bf16.vlgmr.msra.gmra.mrb[12].mxu0 %vm278_vm5, %v5709_v8 }
 0x2b8   :  { %2036 = vmatprep.mubr.bf16.mxu0 %v8375_v2 }
 0x2bf   :  { %v6997_v29 = vpop.f32.mrb[8].mxu0 }
 0x2c0   :  { %v6999_v59 = vpop.f32.mrb[9].mxu0 }
 0x2c1   :  { %v769_v40 = vpop.f32.mrb[10].mxu0 }
 0x2c2   :  { %v770_v43 = vpop.f32.mrb[11].mxu0 }
 0x2d9   :  { %v1988_v45 = vpop.permute.xlu1 %1987 }
 0x2dd   :  { %v1992_v50 = vpop.permute.xlu1 %1991 }
 0x2df   :  { %v1990_v61 = vpop.permute.xlu0 %1989 }
 0x2e0   :  { %v1993_v20 = vsel %vm8340_vm0, %v1988_v45, %v1990_v61  ;;  %v1994_v63 = vsel %vm8340_vm0, %v1990_v61, %v1992_v50 }
 0x2e1   :  { %5713 = vmatprep.subr.msk.bf16.mxu0 %vm282_vm4, %v1994_v63  ;;  %v1999_v23 = vsel %vm282_vm4, %v1993_v20, 0  ;;  %v2403_v5 = vpop.permute.xlu1 %2402 }
 0x2e2   :  { %2005 = vmatpush1.bf16.msra.mxu0 %v1999_v23  ;;  %v5715_v23 = vld [vmem:[%s8262_s7 + $0x3c] sm:$0xf] }
 0x2e3   :  { %v7015_v18 = vpop.permute.xlu0 %2400 }
 0x2e4   :  { %8407 = vst [vmem:[#allocation17_spill] sm:$0xff] %v7015_v18  ;;  %vm2405_vm3 = vcmp.ne.s16.totalorder %v7015_v18, 0  ;;  %v7020_v10 = vsel %vm8341_vm6, %v7015_v18, %v2403_v5 }
 0x2e5   :  { %8408 = vst [vmem:[#allocation18_spill] sm:$0xff] %v7020_v10  ;;  %vm8344_vm0 = vcmp.ne.s16.totalorder %v7020_v10, 0  ;;  %v2408_v11 = vsel %vm2405_vm3, %v6516_v57, 0  ;;  %5714 = vmatmul.mubr.msk.bf16.vlgmr.msra.gmra.mrb[12].mxu0 %vm278_vm5, %v5712_v9 }
 0x2e6   :  { %v2409_v7 = vsel %vm8344_vm0, %v6508_v51, 0  ;;  %2416 = vrot.lane.b32.xlu1 %v2408_v11, %s8409_s25  ;;  %2112 = vmatprep.mubr.bf16.mxu0 %v8375_v2 }
 0x2e7   :  { %2418 = vrot.lane.b32.xlu0 %v2409_v7, %s8409_s25 }
 0x2ea   :  { %2420 = vrot.lane.b32.xlu1 %v8352_v25, %s8409_s25 }
 0x2f9   :  { %v2064_v8 = vpop.permute.xlu0 %2063 }
 0x2fa   :  { %v2066_v40 = vpop.permute.xlu1 %2065 }
 0x2fb   :  { %v2069_v43 = vsel %vm8342_vm9, %v2064_v8, %v2066_v40 }
 0x2fc   :  { %v2075_v20 = vsel %vm282_vm4, %v2069_v43, 0 }
 0x2fd   :  { %v2068_v45 = vpop.permute.xlu0 %2067 }
 0x2fe   :  { %v2070_v50 = vsel %vm8342_vm9, %v2066_v40, %v2068_v45  ;;  %v7037_v61 = vpop.permute.xlu1 %2476 }
 0x2ff   :  { %8410 = vst [vmem:[#allocation19_spill] sm:$0xff] %v7037_v61  ;;  %vm8385_vm6 = vcmp.ne.s16.totalorder %v7037_v61, 0  ;;  %5716 = vmatprep.subr.msk.bf16.mxu0 %vm282_vm4, %v2070_v50 }
 0x300   :  { %2081 = vmatpush1.bf16.msra.mxu0 %v2075_v20  ;;  %v2484_v63 = vsel %vm8385_vm6, %v6516_v57, 0  ;;  %vm8449_vm6 = vcmp.ge.s32.totalorder %v6280_v14, 1 }
 0x301   :  { %v2479_v5 = vpop.permute.xlu0 %2478  ;;  %2492 = vrot.lane.b32.xlu0 %v2484_v63, %s8411_s0 }
 0x302   :  { %v7051_v9 = vsel %vm8345_vm15, %v7037_v61, %v2479_v5  ;;  %v2132_v11 = vpop.permute.xlu1 %2131  ;;  %v5718_v5 = vld [vmem:[%s8262_s7 + $0x40] sm:$0xf] }
 0x303   :  { %8412 = vst [vmem:[#allocation20_spill] sm:$0xff] %v7051_v9  ;;  %vm8343_vm9 = vcmp.ne.s16.totalorder %v7051_v9, 0  ;;  %5717 = vmatmul.mubr.msk.bf16.vlgmr.msra.gmra.mrb[12].mxu0 %vm278_vm5, %v5715_v23 }
 0x304   :  { %v2485_v7 = vsel %vm8343_vm9, %v6508_v51, 0  ;;  %2180 = vmatprep.mubr.bf16.mxu0 %v8375_v2  ;;  %vm785_vm9 = vcmask 916480  }
 0x305   :  { %v2134_v8 = vpop.permute.xlu0 %2133  ;;  %2496 = vrot.lane.b32.xlu0 %v8352_v25, %s8411_s0  ;;  %2494 = vrot.lane.b32.xlu1 %v2485_v7, %s8411_s0 }
 0x306   :  { %v2137_v40 = vsel %vm410_vm11, %v2132_v11, %v2134_v8  ;;  %v2136_v43 = vpop.permute.xlu1 %2135  ;;  %v8524_v21 = vld [vmem:[#allocation19_spill] sm:$0xff] }
 0x307   :  { %v2138_v45 = vsel %vm410_vm11, %v2134_v8, %v2136_v43  ;;  %v2143_v50 = vsel %vm282_vm4, %v2137_v40, 0 }
 0x308   :  { %5719 = vmatprep.subr.msk.bf16.mxu0 %vm282_vm4, %v2138_v45 }
 0x309   :  { %v2197_v20 = vpop.permute.xlu0 %2196  ;;  %2556 = vrot.lane.b32.xlu0 %v6508_v51, %s8348_s30  ;;  %2554 = vrot.lane.b32.xlu1 %v6516_v57, %s8348_s30 }
 0x30a   :  { %2149 = vmatpush1.bf16.msra.mxu0 %v2143_v50  ;;  %v2199_v63 = vpop.permute.xlu1 %2198 }
 0x30b   :  { %v2202_v23 = vsel %vm785_vm9, %v2197_v20, %v2199_v63 }
 0x30c   :  { %v2208_v40 = vsel %vm282_vm4, %v2202_v23, 0 }
 0x30d   :  { %v2201_v11 = vpop.permute.xlu0 %2200  ;;  %2558 = vrot.lane.b32.xlu1 %v8352_v25, %s8348_s30  ;;  %s8421_s30 = smov 94  }
 0x30e   :  { %v2203_v7 = vsel %vm785_vm9, %v2199_v63, %v2201_v11  ;;  %v7077_v8 = vpop.permute.xlu1 %2615 }
 0x30f   :  { %8413 = vst [vmem:[#allocation21_spill] sm:$0xff] %v7077_v8  ;;  %vm8346_vm0 = vcmp.ne.s16.totalorder %v7077_v8, 0  ;;  %5720 = vmatmul.mubr.msk.bf16.vlgmr.msra.gmra.mrb[12].mxu0 %vm278_vm5, %v5718_v5  ;;  %5722 = vmatprep.subr.msk.bf16.mxu0 %vm282_vm4, %v2203_v7 }
 0x310   :  { %2214 = vmatpush1.bf16.msra.mxu0 %v2208_v40  ;;  %v2623_v43 = vsel %vm8346_vm0, %v6516_v57, 0  ;;  %2245 = vmatprep.mubr.bf16.mxu0 %v8375_v2  ;;  %vm8416_vm0 = vcmask 908288   ;;  %v5721_v40 = vld [vmem:[%s8262_s7 + $0x44] sm:$0xf] }
 0x311   :  { %v2618_v45 = vpop.permute.xlu0 %2617  ;;  %2631 = vrot.lane.b32.xlu0 %v2623_v43, %s8414_s15  ;;  %vm8417_vm13 = vmmov %vm8416_vm0 }
 0x312   :  { %v7090_v50 = vsel %vm8351_vm1, %v7077_v8, %v2618_v45  ;;  %v2265_v20 = vpop.permute.xlu1 %2264  ;;  %vm8419_vm1 = vcmask 277504  }
 0x313   :  { %8415 = vst [vmem:[#allocation22_spill] sm:$0xff] %v7090_v50  ;;  %vm8350_vm15 = vcmp.ne.s16.totalorder %v7090_v50, 0 }
 0x314   :  { %v2624_v63 = vsel %vm8350_vm15, %v6508_v51, 0 }
 0x315   :  { %v2267_v23 = vpop.permute.xlu0 %2266  ;;  %2635 = vrot.lane.b32.xlu0 %v8352_v25, %s8414_s15  ;;  %2633 = vrot.lane.b32.xlu1 %v2624_v63, %s8414_s15 }
 0x316   :  { %v2269_v5 = vpop.permute.xlu1 %2268  ;;  %v2270_v7 = vsel %vm8417_vm13, %v2265_v20, %v2267_v23 }
 0x317   :  { %v2271_v11 = vsel %vm8416_vm0, %v2267_v23, %v2269_v5  ;;  %v2276_v63 = vsel %vm282_vm4, %v2270_v7, 0 }
 0x318   :  { %5725 = vmatprep.subr.msk.bf16.mxu0 %vm282_vm4, %v2271_v11  ;;  %v3085_v11 = vld [vmem:[%s8259_s2 + $0x8] sm:$0xff] }
 0x319   :  { %v7105_v43 = vpop.permute.xlu0 %2691 }
 0x31a   :  { %8418 = vst [vmem:[#allocation23_spill] sm:$0xff] %v7105_v43  ;;  %vm8381_vm15 = vcmp.ne.s16.totalorder %v7105_v43, 0  ;;  %v2694_v45 = vpop.permute.xlu1 %2693 }
 0x31b   :  { %v7110_v25 = vsel %vm8419_vm1, %v7105_v43, %v2694_v45  ;;  %5723 = vmatmul.mubr.msk.bf16.vlgmr.msra.gmra.mrb[12].mxu0 %vm278_vm5, %v5721_v40  ;;  %v2699_v20 = vsel %vm8381_vm15, %v6516_v57, 0  ;;  %v8422_v57 = vmov 0.0|0.0   ;;  %v3109_v45 = vld [vmem:[%s8260_s3 + $0x8] sm:$0xff]  ;;  %vm8423_vm1 = vcmask 900096  }
 0x31c   :  { %8420 = vst [vmem:[#allocation24_spill] sm:$0xff] %v7110_v25  ;;  %vm8362_vm0 = vcmp.ne.s16.totalorder %v7110_v25, 0  ;;  %2282 = vmatpush1.bf16.msra.mxu0 %v2276_v63  ;;  %2707 = vrot.lane.b32.xlu1 %v2699_v20, %s8421_s30  ;;  %vm8424_vm13 = vmmov %vm8423_vm1  ;;  %v5724_v20 = vld [vmem:[%s8262_s7 + $0x48] sm:$0xf] }
 0x31d   :  { %v2700_v23 = vsel %vm8362_vm0, %v6508_v51, 0  ;;  %v2341_v5 = vpop.permute.xlu0 %2340  ;;  %2313 = vmatprep.mubr.bf16.mxu0 %v8375_v2  ;;  %vm8363_vm0 = vcmask 785408  }
 0x31e   :  { %2709 = vrot.lane.b32.xlu0 %v2700_v23, %s8421_s30  ;;  %v2343_v7 = vpop.permute.xlu1 %2342  ;;  %v2791_v23 = vcombine.high %v7001_v30, %v7001_v30 }
 0x31f   :  { %v2346_v63 = vsel %vm8424_vm13, %v2341_v5, %v2343_v7  ;;  %v5727_v5 = vld [vmem:[%s8262_s7 + $0x4c] sm:$0xf] }
 0x320   :  { %2711 = vrot.lane.b32.xlu1 %v8422_v57, %s8421_s30 }
 0x321   :  { %v2345_v40 = vpop.permute.xlu0 %2344 }
 0x322   :  { %v2347_v51 = vsel %vm8423_vm1, %v2343_v7, %v2345_v40  ;;  %3094 = vperm.xlu0 %6144, %v3085_v11   ;;  %v2352_v40 = vsel %vm282_vm4, %v2346_v63, 0  ;;  %v2861_v11 = vcombine.high %v7005_v31, %v7005_v31  ;;  %v2858_v7 = vld [vmem:[#allocation2 + $0xc] sm:$0xf]  ;;  %vm8426_vm1 = vcmask 801792  }
 0x323   :  { %5728 = vmatprep.subr.msk.bf16.mxu0 %vm282_vm4, %v2347_v51  ;;  %v849_v51 = vsel %vm846_vm2, %v6350_v42, 0  ;;  %vm8427_vm13 = vmmov %vm8426_vm1 }
 0x324   :  { %3118 = vperm.xlu1 %6145, %v3109_v45  }
 0x326   :  { %2792 = vrot.lane.b32.xlu0 %v7001_v30, %s6164_s28 }
 0x327   :  { %5726 = vmatmul.mubr.msk.bf16.vlgmr.msra.gmra.mrb[12].mxu0 %vm278_vm5, %v5724_v20 }
 0x328   :  { %2358 = vmatpush1.bf16.msra.mxu0 %v2352_v40  ;;  %2794 = vrot.lane.b32.xlu1 %v2791_v23, %s6164_s28 }
 0x329   :  { %2389 = vmatprep.mubr.bf16.mxu0 %v8375_v2 }
 0x32a   :  { %2796 = vrot.lane.b32.xlu0 %v7003_v55, %s6164_s28 }
 0x32c   :  { %2810 = vrot.lane.b32.xlu1 %v7001_v30, %s8425_s29 }
 0x32e   :  { %2812 = vrot.lane.b32.xlu0 %v7003_v55, %s8425_s29 }
 0x330   :  { %779 = vrot.lane.b32.xlu1 %v6346_v39, %s6180_s24 }
 0x332   :  { %781 = vrot.lane.b32.xlu0 %v6350_v42, %s6180_s24  ;;  %v5730_v42 = vld [vmem:[%s8262_s7 + $0x50] sm:$0xf] }
 0x333   :  { %5729 = vmatmul.mubr.msk.bf16.vlgmr.msra.gmra.mrb[12].mxu0 %vm278_vm5, %v5727_v5 }
 0x334   :  { %783 = vrot.lane.b32.xlu1 %v8422_v57, %s6180_s24  ;;  %2465 = vmatprep.mubr.bf16.mxu0 %v8375_v2 }
 0x336   :  { %2821 = vrot.lane.b32.xlu0 %v7001_v30, %s6163_s27 }
 0x338   :  { %2823 = vrot.lane.b32.xlu1 %v2791_v23, %s6163_s27 }
 0x33a   :  { %2825 = vrot.lane.b32.xlu0 %v7003_v55, %s6163_s27 }
 0x33c   :  { %2839 = vrot.lane.b32.xlu1 %v7001_v30, %s6160_s21  ;;  %v848_v30 = vsel %vm845_vm12, %v6346_v39, 0 }
 0x33e   :  { %2841 = vrot.lane.b32.xlu0 %v2791_v23, %s6160_s21 }
 0x340   :  { %2843 = vrot.lane.b32.xlu1 %v7003_v55, %s6160_s21 }
 0x342   :  { %2862 = vrot.lane.b32.xlu0 %v7005_v31, %s6159_s20 }
 0x344   :  { %2864 = vrot.lane.b32.xlu1 %v2861_v11, %s6159_s20 }
 0x346   :  { %2866 = vrot.lane.b32.xlu0 %v2858_v7, %s6159_s20 }
 0x348   :  { %2880 = vrot.lane.b32.xlu1 %v7005_v31, %s6158_s17 }
 0x34a   :  { %2882 = vrot.lane.b32.xlu0 %v2861_v11, %s6158_s17 }
 0x34c   :  { %2884 = vrot.lane.b32.xlu1 %v2858_v7, %s6158_s17 }
 0x34e   :  { %2898 = vrot.lane.b32.xlu0 %v7005_v31, %s6180_s24 }
 0x350   :  { %2900 = vrot.lane.b32.xlu1 %v2858_v7, %s6180_s24 }
 0x352   :  { %2909 = vrot.lane.b32.xlu0 %v7005_v31, %s6157_s16 }
 0x354   :  { %2911 = vrot.lane.b32.xlu1 %v2861_v11, %s6157_s16 }
 0x356   :  { %2913 = vrot.lane.b32.xlu0 %v2858_v7, %s6157_s16 }
 0x358   :  { %856 = vrot.lane.b32.xlu1 %v848_v30, %s6157_s16  ;;  %v2417_v55 = vpop.permute.xlu1 %2416 }
 0x359   :  { %v2419_v45 = vpop.permute.xlu0 %2418 }
 0x35a   :  { %858 = vrot.lane.b32.xlu0 %v849_v51, %s6157_s16  ;;  %v2422_v31 = vsel %vm8426_vm1, %v2417_v55, %v2419_v45  ;;  %vm8428_vm1 = vcmask 793600   ;;  %v5733_v55 = vld [vmem:[%s8262_s7 + $0x54] sm:$0xf] }
 0x35b   :  { %v2428_v39 = vsel %vm282_vm4, %v2422_v31, 0 }
 0x35c   :  { %v2421_v63 = vpop.permute.xlu1 %2420  ;;  %860 = vrot.lane.b32.xlu1 %v8422_v57, %s6157_s16 }
 0x35d   :  { %v2423_v20 = vsel %vm8427_vm13, %v2419_v45, %v2421_v63  ;;  %vm8429_vm13 = vmmov %vm8428_vm1 }
 0x35e   :  { %5731 = vmatprep.subr.msk.bf16.mxu0 %vm282_vm4, %v2423_v20  ;;  %3160 = vrot.lane.b32.xlu0 %v8422_v57, %s8425_s29 }
 0x35f   :  { %2434 = vmatpush1.bf16.msra.mxu0 %v2428_v39 }
 0x362   :  { %5732 = vmatmul.mubr.msk.bf16.vlgmr.msra.gmra.mrb[12].mxu0 %vm278_vm5, %v5730_v42 }
 0x363   :  { %2541 = vmatprep.mubr.bf16.mxu0 %v8375_v2 }
 0x373   :  { %v2493_v23 = vpop.permute.xlu0 %2492 }
 0x377   :  { %v2497_v40 = vpop.permute.xlu0 %2496  ;;  %v2495_v5 = vpop.permute.xlu1 %2494 }
 0x378   :  { %v2498_v11 = vsel %vm8428_vm1, %v2493_v23, %v2495_v5  ;;  %v2499_v7 = vsel %vm8429_vm13, %v2495_v5, %v2497_v40  ;;  %v5736_v23 = vld [vmem:[%s8262_s7 + $0x58] sm:$0xf]  ;;  %vm8430_vm1 = vcmask 777216  }
 0x379   :  { %5734 = vmatprep.subr.msk.bf16.mxu0 %vm282_vm4, %v2499_v7  ;;  %v2504_v30 = vsel %vm282_vm4, %v2498_v11, 0  ;;  %vm8431_vm13 = vmmov %vm8430_vm1 }
 0x37a   :  { %2510 = vmatpush1.bf16.msra.mxu0 %v2504_v30 }
 0x37b   :  { %v2557_v45 = vpop.permute.xlu0 %2556  ;;  %v2555_v51 = vpop.permute.xlu1 %2554 }
 0x37c   :  { %v2561_v31 = vsel %vm8363_vm0, %v2555_v51, %v2557_v45 }
 0x37d   :  { %5735 = vmatmul.mubr.msk.bf16.vlgmr.msra.gmra.mrb[12].mxu0 %vm278_vm5, %v5733_v55  ;;  %v2567_v39 = vsel %vm282_vm4, %v2561_v31, 0 }
 0x37e   :  { %2604 = vmatprep.mubr.bf16.mxu0 %v8375_v2 }
 0x37f   :  { %v2559_v63 = vpop.permute.xlu1 %2558 }
 0x380   :  { %v2562_v20 = vsel %vm8363_vm0, %v2557_v45, %v2559_v63  ;;  %v3006_v45 = vcombine.high %v6995_v26, %v6995_v26  ;;  %vm8432_vm0 = vcmask 769024  }
 0x381   :  { %5737 = vmatprep.subr.msk.bf16.mxu0 %vm282_vm4, %v2562_v20  ;;  %v5739_v20 = vld [vmem:[%s8262_s7 + $0x5c] sm:$0xf] }
 0x382   :  { %2573 = vmatpush1.bf16.msra.mxu0 %v2567_v39 }
 0x383   :  { %v2632_v42 = vpop.permute.xlu0 %2631 }
 0x387   :  { %v2636_v40 = vpop.permute.xlu0 %2635  ;;  %v2634_v5 = vpop.permute.xlu1 %2633 }
 0x388   :  { %v2637_v11 = vsel %vm8430_vm1, %v2632_v42, %v2634_v5  ;;  %v2638_v7 = vsel %vm8431_vm13, %v2634_v5, %v2636_v40  ;;  %vm8433_vm1 = vmmov %vm8432_vm0  ;;  %v3009_v42 = vpack.c.bf16 %v3006_v45, %v3006_v45  ;;  %vm8434_vm13 = vcmask 1041408   ;;  %v5742_v5 = vld [vmem:[%s8262_s7 + $0x60] sm:$0xf] }
 0x389   :  { %5738 = vmatmul.mubr.msk.bf16.vlgmr.msra.gmra.mrb[12].mxu0 %vm278_vm5, %v5736_v23  ;;  %5740 = vmatprep.subr.msk.bf16.mxu0 %vm282_vm4, %v2638_v7  ;;  %v2643_v30 = vsel %vm282_vm4, %v2637_v11, 0  ;;  %v3008_v40 = vpack.c.bf16 %v6995_v26, %v6995_v26  ;;  %v6151_v26 = vld [vmem:[%s8258_s1] sm:$0xff]  }
 0x38a   :  { %2649 = vmatpush1.bf16.msra.mxu0 %v2643_v30  ;;  %2680 = vmatprep.mubr.bf16.mxu0 %v8375_v2 }
 0x38e   :  { %v2708_v55 = vpop.permute.xlu1 %2707 }
 0x390   :  { %v2710_v51 = vpop.permute.xlu0 %2709 }
 0x391   :  { %v2713_v31 = vsel %vm8432_vm0, %v2708_v55, %v2710_v51  ;;  %vm8435_vm0 = vmmov %vm8434_vm13 }
 0x392   :  { %v2712_v63 = vpop.permute.xlu1 %2711  ;;  %v2719_v23 = vsel %vm282_vm4, %v2713_v31, 0  ;;  %v3028_v11 = vsel %vm8435_vm0, %v3008_v40, 0  ;;  %vm8438_vm0 = vcmask 908288  }
 0x393   :  { %v2714_v39 = vsel %vm8433_vm1, %v2710_v51, %v2712_v63  ;;  %vm8436_vm1 = vcmask 31744  }
 0x394   :  { %5743 = vmatprep.subr.msk.bf16.mxu0 %vm282_vm4, %v2714_v39 }
 0x395   :  { %5741 = vmatmul.mubr.msk.bf16.vlgmr.msra.gmra.mrb[12].mxu0 %vm278_vm5, %v5739_v20  ;;  %v6152_v20 = vld [vmem:[%s8258_s1 + $0x8] ss:$0 sps:$4 sm:$0xff]   ;;  %s8484_s1 = smov 30  }
 0x396   :  { %2725 = vmatpush1.bf16.msra.mxu0 %v2719_v23  ;;  %2756 = vmatprep.mubr.bf16.mxu0 %v8375_v2 }
 0x397   :  { %5750 = vmatprep.subr.msk.bf16.mxu0 %vm8434_vm13, %v3009_v42  ;;  %vm8437_vm13 = vmmov %vm8436_vm1 }
 0x3a1   :  { %v7251_v7 = vpop.permute.xlu0 %3094  ;;  %5744 = vmatmul.mubr.msk.bf16.vlgmr.msra.gmra.mrb[12].mxu0 %vm278_vm5, %v5742_v5 }
 0x3a2   :  { %3034 = vmatpush1.bf16.msra.mxu0 %v3028_v11  ;;  %3065 = vmatprep.mubr.bf16.mxu0 %v8375_v2 }
 0x3a3   :  { %v7255_v30 = vpop.permute.xlu1 %3118 }
 0x3a5   :  { %v2793_v55 = vpop.permute.xlu0 %2792 }
 0x3a7   :  { %v2795_v45 = vpop.permute.xlu1 %2794 }
 0x3a9   :  { %v2797_v51 = vpop.permute.xlu0 %2796  ;;  %5751 = vmatmul.mubr.msk.bf16.vlgmr.msra.gmra.mrb[16].mxu0 %vm8436_vm1, %v6151_v26  ;;  %vm8439_vm1 = vmmov %vm8438_vm0 }
 0x3aa   :  { %3075 = vmatprep.mubr.bf16.mxu0 %v8375_v2 }
 0x3ab   :  { %v2811_v31 = vpop.permute.xlu1 %2810 }
 0x3ad   :  { %v2813_v63 = vpop.permute.xlu0 %2812 }
 0x3af   :  { %v780_v39 = vpop.permute.xlu1 %779 }
 0x3b1   :  { %v782_v42 = vpop.permute.xlu0 %781  ;;  %5752 = vmatmul.mubr.msk.bf16.gmra.mrb[20].mxu0 %vm8437_vm13, %v6152_v20  ;;  %vm8441_vm13 = vcmask 138240  }
 0x3b2   :  { %v786_v23 = vsel %vm785_vm9, %v780_v39, %v782_v42  ;;  %5607 = vmatprep.mubr.bf16.mxu0 %v8375_v2  ;;  %v2799_v22 = vsel %vm8441_vm13, %v2793_v55, %v2795_v45  ;;  %vm8442_vm15 = vmmov %vm8441_vm13  ;;  %vm8445_vm13 = vcmask 130048  }
 0x3b3   :  { %v784_v40 = vpop.permute.xlu1 %783  ;;  %v792_v26 = vsel %vm282_vm4, %v786_v23, 0 }
 0x3b4   :  { %v787_v5 = vsel %vm785_vm9, %v782_v42, %v784_v40 }
 0x3b5   :  { %v2822_v11 = vpop.permute.xlu0 %2821  ;;  %5666 = vmatprep.subr.msk.bf16.mxu1 %vm282_vm4, %v787_v5 }
 0x3b6   :  { %798 = vmatpush1.bf16.msra.mxu1 %v792_v26 }
 0x3b7   :  { %v2824_v27 = vpop.permute.xlu1 %2823 }
 0x3b8   :  { %v2828_v44 = vsel %vm429_vm8, %v2822_v11, %v2824_v27 }
 0x3b9   :  { %v2826_v25 = vpop.permute.xlu0 %2825  ;;  %5667 = vmatmul.mubr.msk.bf16.vlgmr.msra.gmra.mrb[0].mxu1 %vm278_vm5, %v5665_v28 }
 0x3ba   :  { %905 = vmatprep.mubr.bf16.mxu1 %v8375_v2 }
 0x3bb   :  { %v2840_v20 = vpop.permute.xlu1 %2839 }
 0x3bd   :  { %v2842_v39 = vpop.permute.xlu0 %2841 }
 0x3bf   :  { %v2844_v43 = vpop.permute.xlu1 %2843 }
 0x3c1   :  { %v2863_v42 = vpop.permute.xlu0 %2862 }
 0x3c3   :  { %v2865_v40 = vpop.permute.xlu1 %2864 }
 0x3c5   :  { %v2867_v50 = vpop.permute.xlu0 %2866 }
 0x3c7   :  { %v2881_v5 = vpop.permute.xlu1 %2880 }
 0x3c9   :  { %v2883_v8 = vpop.permute.xlu0 %2882 }
 0x3cb   :  { %v2885_v23 = vpop.permute.xlu1 %2884 }
 0x3cd   :  { %v2899_v26 = vpop.permute.xlu0 %2898 }
 0x3cf   :  { %v2901_v9 = vpop.permute.xlu1 %2900 }
 0x3d1   :  { %v2910_v10 = vpop.permute.xlu0 %2909 }
 0x3d3   :  { %v2912_v6 = vpop.permute.xlu1 %2911 }
 0x3d5   :  { %v2914_v61 = vpop.permute.xlu0 %2913 }
 0x3d7   :  { %v857_v18 = vpop.permute.xlu1 %856 }
 0x3d9   :  { %v859_v4 = vpop.permute.xlu0 %858 }
 0x3da   :  { %v862_v28 = vsel %vm8438_vm0, %v857_v18, %v859_v4  ;;  %v2800_v18 = vsel %vm8442_vm15, %v2795_v45, %v2797_v51  ;;  %vm8443_vm0 = vcmp.ge.s32.totalorder %v6274_v12, 1  ;;  %vm8446_vm15 = vcmp.lt.s32.totalorder %v6274_v12, 15 }
 0x3db   :  { %v861_v41 = vpop.permute.xlu1 %860  ;;  %v868_v34 = vsel %vm282_vm4, %v862_v28, 0  ;;  %v2832_v45 = vsel %vm8446_vm15, %v2828_v44, -inf  ;;  %v2846_v51 = vsel %vm507_vm14, %v2840_v20, %v2842_v39  ;;  %v2888_v20 = vsel %vm410_vm11, %v2883_v8, %v2885_v23 }
 0x3dc   :  { %v863_v2 = vsel %vm8439_vm1, %v859_v4, %v861_v41  ;;  %v2803_v41 = vsel %vm8443_vm0, %v2799_v22, -inf  ;;  %vm8444_vm1 = vcmp.ge.s32.totalorder %v6280_v14, 1  ;;  %v2814_v4 = vrot.slane %v2811_v31, 4 }
 0x3dd   :  { %5669 = vmatprep.subr.msk.bf16.mxu1 %vm282_vm4, %v863_v2  ;;  %v2804_v2 = vsel %vm8444_vm1, %v2800_v18, -inf  ;;  %vm8447_vm0 = vcmp.lt.s32.totalorder %v6280_v14, 15  ;;  %vm8448_vm1 = vcmp.ge.s32.totalorder %v6274_v12, 1 }
 0x3de   :  { %874 = vmatpush1.bf16.msra.mxu1 %v868_v34  ;;  %v2815_v34 = vrot.slane %v2813_v63, 4  ;;  %v2807_v28 = vcombine.low %v2803_v41, %v2804_v2  ;;  %v2847_v63 = vsel %vm507_vm14, %v2842_v39, %v2844_v43  ;;  %v2850_v11 = vsel %vm8448_vm1, %v2846_v51, -inf }
 0x3e0   :  { %v2816_v24 = vsel %vm282_vm4, %v2814_v4, %v2815_v34  ;;  %v2809_v48 = vmax.f32 %v6256_v1, %v2807_v28  ;;  %v2851_v1 = vsel %vm8449_vm6, %v2847_v63, -inf  ;;  %vm8452_vm6 = vmmov %vm8448_vm1  ;;  %vm8454_vm1 = vcmask 908288  }
 0x3e1   :  { %5670 = vmatmul.mubr.msk.bf16.vlgmr.msra.gmra.mrb[0].mxu1 %vm278_vm5, %v5668_v0  ;;  %v2829_v0 = vsel %vm429_vm8, %v2824_v27, %v2826_v25  ;;  %v2818_v55 = vsel %vm8445_vm13, %v2811_v31, %v2816_v24  ;;  %v2869_v25 = vsel %vm488_vm7, %v2863_v42, %v2865_v40  ;;  %v2870_v27 = vsel %vm488_vm7, %v2865_v40, %v2867_v50  ;;  %vm8450_vm13 = vmmov %vm8446_vm15 }
 0x3e2   :  { %2974 = vmatprep.mubr.bf16.mxu1 %v8440_v38  ;;  %v2833_v22 = vsel %vm8447_vm0, %v2829_v0, -inf  ;;  %v2820_v18 = vmax.f32 %v2809_v48, %v2818_v55  ;;  %v2854_v24 = vcombine.low %v2850_v11, %v2851_v1  ;;  %v2873_v31 = vsel %vm8450_vm13, %v2869_v25, -inf  ;;  %vm8451_vm15 = vmmov %vm8447_vm0 }
 0x3e3   :  { %v2836_v41 = vcombine.low %v2832_v45, %v2833_v22  ;;  %v2874_v43 = vsel %vm8451_vm15, %v2870_v27, -inf  ;;  %v2887_v48 = vsel %vm410_vm11, %v2881_v5, %v2883_v8  ;;  %vm8453_vm0 = vcmp.ge.s32.totalorder %v6280_v14, 1  ;;  %vm8455_vm13 = vmmov %vm8454_vm1 }
 0x3e4   :  { %v2877_v2 = vcombine.low %v2873_v31, %v2874_v43  ;;  %v2891_v4 = vsel %vm8452_vm6, %v2887_v48, -inf  ;;  %v2892_v50 = vsel %vm8453_vm0, %v2888_v20, -inf  ;;  %v2902_v42 = vrot.slane %v2899_v26, 4 }
 0x3e5   :  { %v2838_v44 = vmax.f32 %v2820_v18, %v2836_v41  ;;  %v2903_v40 = vrot.slane %v2901_v9, 4  ;;  %v2895_v28 = vcombine.low %v2891_v4, %v2892_v50  ;;  %v2916_v55 = vsel %vm8454_vm1, %v2910_v10, %v2912_v6 }
 0x3e6   :  { %v2917_v5 = vsel %vm8455_vm13, %v2912_v6, %v2914_v61  ;;  %vm8456_vm15 = vcmp.lt.s32.totalorder %v6274_v12, 15  ;;  %vm8457_vm6 = vcmp.lt.s32.totalorder %v6280_v14, 15  ;;  %vm8458_vm0 = vcmask 1041408   ;;  %v2927_v6 = vld [vmem:[%s8263_s10] sm:$0xf] }
 0x3e7   :  { %v2856_v39 = vmax.f32 %v2838_v44, %v2854_v24  ;;  %v2904_v0 = vsel %vm282_vm4, %v2902_v42, %v2903_v40  ;;  %v2920_v23 = vsel %vm8456_vm15, %v2916_v55, -inf  ;;  %v2921_v22 = vsel %vm8457_vm6, %v2917_v5, -inf  ;;  %vm8459_vm1 = vmmov %vm8458_vm0  ;;  %v3110_v55 = vld [vmem:[%s8260_s3 + $0x10] sm:$0xff] }
 0x3e8   :  { %v2906_v8 = vsel %vm785_vm9, %v2899_v26, %v2904_v0  ;;  %v2924_v63 = vcombine.low %v2920_v23, %v2921_v22  ;;  %vm8460_vm13 = vcmask 31744   ;;  %vm8461_vm15 = vcmp.ne.s16.totalorder %v6365_v47, 0  ;;  %v3086_v0 = vld [vmem:[%s8259_s2 + $0x10] sm:$0xff] }
 0x3e9   :  { %v2879_v34 = vmax.f32 %v2856_v39, %v2877_v2  ;;  %vm8462_vm6 = vcmp.ne.s16.totalorder %v6361_v46, 0 }
 0x3eb   :  { %v2897_v45 = vmax.f32 %v2879_v34, %v2895_v28 }
 0x3ed   :  { %v2908_v51 = vmax.f32 %v2897_v45, %v2906_v8 }
 0x3ef   :  { %v2926_v9 = vmax.f32 %v2908_v51, %v2924_v63 }
 0x3f1   :  { %v2929_v18 = vcombine.high %v2926_v9, %v2926_v9  ;;  %v2931_v11 = vpack.c.bf16 %v2926_v9, %v2926_v9 }
 0x3f3   :  { %v2932_v41 = vpack.c.bf16 %v2929_v18, %v2929_v18  ;;  %v2937_v10 = vsel %vm8459_vm1, %v2931_v11, 0  ;;  %vm8464_vm1 = vcmp.ne.s16.totalorder %v6378_v49, 0 }
 0x3f5   :  { %5745 = vmatprep.subr.msk.bf16.mxu1 %vm8458_vm0, %v2932_v41  ;;  %vm8463_vm0 = vcmp.ne.s16.totalorder %v6386_v52, 0 }
 0x3f6   :  { %2943 = vmatpush1.bf16.msra.mxu1 %v2937_v10 }
 0x3f9   :  { %5746 = vmatmul.mubr.msk.bf16.vlgmr.msra.gmra.mrb[4].mxu1 %vm8460_vm13, %v2927_v6  ;;  %vm8465_vm13 = vcmp.ne.s16.totalorder %v6418_v60, 0 }
 0x3fa   :  { %3209 = vmatprep.mubr.bf16.mxu1 %v8440_v38 }
 0x474   :  { %v7333_v61 = vpop.f32.mrb[12].mxu0 }
 0x475   :  { %v7335_v26 = vpop.f32.mrb[13].mxu0 }
 0x476   :  { %v2762_v1 = vpop.f32.mrb[14].mxu0 }
 0x477   :  { %v2763_v25 = vpop.f32.mrb[15].mxu0 }
 0x47c   :  { %v7337_v27 = vpop.f32.mrb[16].mxu0 }
 0x47d   :  { %v7339_v44 = vpop.f32.mrb[17].mxu0 }
 0x47e   :  { %v3071_v24 = vpop.f32.mrb[18].mxu0 }
 0x47f   :  { %v3104_v31 = vmul.f32 %v7251_v7, %v3071_v24  ;;  %v3073_v43 = vpop.f32.mrb[19].mxu0 }
 0x480   :  { %v3105_v48 = vmul.f32 %v7251_v7, %v3073_v43  ;;  %v3161_v43 = vpop.permute.xlu0 %3160 }
 0x481   :  { %v3128_v20 = vadd.f32 %v7255_v30, %v3104_v31 }
 0x482   :  { %v3129_v39 = vadd.f32 %v7255_v30, %v3105_v48 }
 0x483   :  { %v3134_v2 = vmax.f32 %v3128_v20, 0.0 }
 0x484   :  { %v3135_v4 = vmax.f32 %v3129_v39, 0.0  ;;  %v7359_v30 = vpop.f32.mrb[20].mxu0 }
 0x485   :  { %v7345_v50 = vpack.c.bf16 %v3134_v2, %v3134_v2  ;;  %v7381_v5 = vpop.f32.mrb[21].mxu0 }
 0x486   :  { %v7347_v42 = vpack.c.bf16 %v3135_v4, %v3135_v4  ;;  %v3081_v45 = vpop.f32.mrb[22].mxu0  ;;  %v5755_v4 = vld [vmem:[%s8261_s4 + $0x4] sm:$0xf] }
 0x487   :  { %3162 = vrot.lane.b32.xlu1 %v7345_v50, %s8425_s29  ;;  %v3153_v7 = vsel %vm8461_vm15, %v7345_v50, 0  ;;  %v3280_v34 = vsel %vm8463_vm0, %v7345_v50, 0  ;;  %v3082_v8 = vpop.f32.mrb[23].mxu0  ;;  %v3347_v23 = vsel %vm8465_vm13, %v7345_v50, 0  ;;  %vm8466_vm15 = vcmp.ne.s16.totalorder %v6405_v56, 0 }
 0x488   :  { %3164 = vrot.lane.b32.xlu0 %v7347_v42, %s8425_s29  ;;  %v3154_v40 = vsel %vm8462_vm6, %v7347_v42, 0  ;;  %v3281_v28 = vsel %vm8464_vm1, %v7347_v42, 0  ;;  %v3348_v22 = vsel %vm8466_vm15, %v7347_v42, 0  ;;  %vm8467_vm6 = vcmp.ne.s16.totalorder %v6426_v62, 0 }
 0x489   :  { %v3472_v51 = vsel %vm8467_vm6, %v7345_v50, 0  ;;  %vm8468_vm0 = vcmp.ne.s16.totalorder %v6439_v3, 0  ;;  %vm8469_vm1 = vcmp.ne.s16.totalorder %v6475_v19, 0  ;;  %vm8470_vm13 = vcmp.ne.s16.totalorder %v6497_v37, 0 }
 0x48a   :  { %v3473_v63 = vsel %vm8468_vm0, %v7347_v42, 0  ;;  %v3539_v9 = vsel %vm8469_vm1, %v7345_v50, 0  ;;  %v3540_v18 = vsel %vm8470_vm13, %v7347_v42, 0  ;;  %v3670_v41 = vsel %vm845_vm12, %v7345_v50, 0 }
 0x48b   :  { %3221 = vrot.lane.b32.xlu1 %v8422_v57, %s6164_s28  ;;  %v3671_v11 = vsel %vm846_vm2, %v7347_v42, 0  ;;  %vm8471_vm15 = vcmask 130048   ;;  %vm8473_vm0 = vcmask 138240   ;;  %vm8475_vm13 = vcmp.ne.s16.totalorder %v6520_v58, 0 }
 0x48c   :  { %3223 = vrot.lane.b32.xlu0 %v3153_v7, %s6164_s28  ;;  %vm8472_vm6 = vmmov %vm8471_vm15 }
 0x48d   :  { %vm8474_vm1 = vmmov %vm8473_vm0 }
 0x48f   :  { %3225 = vrot.lane.b32.xlu1 %v3154_v40, %s6164_s28 }
 0x490   :  { %3286 = vrot.lane.b32.xlu0 %v8422_v57, %s6163_s27 }
 0x493   :  { %3288 = vrot.lane.b32.xlu1 %v3280_v34, %s6163_s27 }
 0x494   :  { %3290 = vrot.lane.b32.xlu0 %v3281_v28, %s6163_s27 }
 0x497   :  { %3099 = vperm.xlu1 %6145, %v3086_v0  }
 0x498   :  { %3123 = vperm.xlu0 %6144, %v3110_v55  }
 0x49b   :  { %3353 = vrot.lane.b32.xlu1 %v8422_v57, %s6160_s21 }
 0x49c   :  { %3355 = vrot.lane.b32.xlu0 %v3347_v23, %s6160_s21 }
 0x49f   :  { %3357 = vrot.lane.b32.xlu1 %v3348_v22, %s6160_s21 }
 0x4a0   :  { %3479 = vrot.lane.b32.xlu0 %v3472_v51, %s6159_s20  ;;  %v3155_v51 = vld [vmem:[%s8261_s4] sm:$0xf] }
 0x4a3   :  { %3481 = vrot.lane.b32.xlu1 %v3473_v63, %s6159_s20 }
 0x4a4   :  { %3483 = vrot.lane.b32.xlu0 %v8422_v57, %s6159_s20 }
 0x4a7   :  { %3546 = vrot.lane.b32.xlu1 %v3539_v9, %s6158_s17  ;;  %v5760_v9 = vld [vmem:[%s8261_s4 + $0x8] sm:$0xf] }
 0x4a8   :  { %3548 = vrot.lane.b32.xlu0 %v3540_v18, %s6158_s17 }
 0x4ab   :  { %3550 = vrot.lane.b32.xlu1 %v8422_v57, %s6158_s17 }
 0x4ac   :  { %3610 = vrot.lane.b32.xlu0 %v7345_v50, %s6180_s24 }
 0x4af   :  { %3612 = vrot.lane.b32.xlu1 %v7347_v42, %s6180_s24 }
 0x4b0   :  { %3614 = vrot.lane.b32.xlu0 %v8422_v57, %s6180_s24 }
 0x4b3   :  { %3677 = vrot.lane.b32.xlu1 %v3670_v41, %s6157_s16 }
 0x4b4   :  { %v907_v10 = vpop.f32.mrb[0].mxu1  ;;  %3679 = vrot.lane.b32.xlu0 %v3671_v11, %s6157_s16 }
 0x4b5   :  { %v7428_v6 = vadd.f32 %v907_v10, %v6997_v29  ;;  %v909_v1 = vpop.f32.mrb[1].mxu1 }
 0x4b6   :  { %v7431_v25 = vadd.f32 %v909_v1, %v6999_v59  ;;  %v911_v24 = vpop.f32.mrb[2].mxu1 }
 0x4b7   :  { %3681 = vrot.lane.b32.xlu1 %v8422_v57, %s6157_s16  ;;  %v912_v31 = vpop.f32.mrb[3].mxu1 }
 0x4b8   :  { %3774 = vrot.lane.b32.xlu0 %v8422_v57, %s6170_s26 }
 0x4f9   :  { %v3163_v48 = vpop.permute.xlu1 %3162 }
 0x4fa   :  { %v3166_v20 = vsel %vm8471_vm15, %v3161_v43, %v3163_v48  ;;  %v3165_v39 = vpop.permute.xlu0 %3164  ;;  %vm8476_vm15 = vcmp.ne.s16.totalorder %v6492_v32, 0 }
 0x4fb   :  { %v3167_v29 = vsel %vm8472_vm6, %v3163_v48, %v3165_v39  ;;  %v3172_v2 = vsel %vm282_vm4, %v3166_v20, 0  ;;  %vm8478_vm6 = vcmp.ne.s16.totalorder %v6547_v17, 0 }
 0x4fc   :  { %5756 = vmatprep.subr.msk.bf16.mxu1 %vm282_vm4, %v3167_v29 }
 0x4fd   :  { %v3222_v59 = vpop.permute.xlu1 %3221  ;;  %3178 = vmatpush1.bf16.msra.mxu1 %v3172_v2 }
 0x4fe   :  { %v3224_v7 = vpop.permute.xlu0 %3223 }
 0x4ff   :  { %v3227_v40 = vsel %vm8473_vm0, %v3222_v59, %v3224_v7  ;;  %vm8479_vm0 = vcmp.ne.s16.totalorder %v6542_v15, 0 }
 0x500   :  { %5757 = vmatmul.mubr.msk.bf16.vlgmr.msra.gmra.mrb[8].mxu1 %vm278_vm5, %v5755_v4  ;;  %v3233_v55 = vsel %vm282_vm4, %v3227_v40, 0 }
 0x501   :  { %v3226_v34 = vpop.permute.xlu1 %3225  ;;  %3270 = vmatprep.mubr.bf16.mxu1 %v8440_v38 }
 0x502   :  { %v3228_v28 = vsel %vm8474_vm1, %v3224_v7, %v3226_v34  ;;  %v3287_v0 = vpop.permute.xlu0 %3286  ;;  %v5763_v34 = vld [vmem:[%s8261_s4 + $0xc] sm:$0xf]  ;;  %vm8481_vm1 = vcmp.ne.s16.totalorder %v6574_v35, 0 }
 0x503   :  { %5758 = vmatprep.subr.msk.bf16.mxu1 %vm282_vm4, %v3228_v28 }
 0x504   :  { %3239 = vmatpush1.bf16.msra.mxu1 %v3233_v55  ;;  %v3418_v55 = vsel %vm282_vm4, %v7345_v50, 0  ;;  %v5766_v50 = vld [vmem:[%s8261_s4 + $0x10] sm:$0xf] }
 0x505   :  { %v3289_v45 = vpop.permute.xlu1 %3288 }
 0x506   :  { %v3291_v8 = vpop.permute.xlu0 %3290  ;;  %v3292_v22 = vsel %vm429_vm8, %v3287_v0, %v3289_v45 }
 0x507   :  { %v3293_v23 = vsel %vm429_vm8, %v3289_v45, %v3291_v8  ;;  %v3298_v63 = vsel %vm282_vm4, %v3292_v22, 0 }
 0x508   :  { %5761 = vmatprep.subr.msk.bf16.mxu1 %vm282_vm4, %v3293_v23 }
 0x50c   :  { %5759 = vmatmul.mubr.msk.bf16.vlgmr.msra.gmra.mrb[8].mxu1 %vm278_vm5, %v3155_v51 }
 0x50d   :  { %3304 = vmatpush1.bf16.msra.mxu1 %v3298_v63  ;;  %3335 = vmatprep.mubr.bf16.mxu1 %v8440_v38 }
 0x516   :  { %v3100_v18 = vpop.permute.xlu1 %3099 }
 0x517   :  { %v3106_v41 = vmul.f32 %v3100_v18, %v7359_v30  ;;  %v3107_v11 = vmul.f32 %v3100_v18, %v7381_v5  ;;  %v3124_v10 = vpop.permute.xlu0 %3123 }
 0x518   :  { %5762 = vmatmul.mubr.msk.bf16.vlgmr.msra.gmra.mrb[8].mxu1 %vm278_vm5, %v5760_v9 }
 0x519   :  { %v3130_v1 = vadd.f32 %v3124_v10, %v3106_v41  ;;  %v3131_v24 = vadd.f32 %v3124_v10, %v3107_v11  ;;  %3402 = vmatprep.mubr.bf16.mxu1 %v8440_v38 }
 0x51a   :  { %v3354_v31 = vpop.permute.xlu1 %3353 }
 0x51b   :  { %v3136_v43 = vmax.f32 %v3130_v1, 0.0  ;;  %v3137_v48 = vmax.f32 %v3131_v24, 0.0  ;;  %v3356_v20 = vpop.permute.xlu0 %3355 }
 0x51c   :  { %v3359_v2 = vsel %vm507_vm14, %v3354_v31, %v3356_v20 }
 0x51d   :  { %v7466_v39 = vpack.c.bf16 %v3136_v43, %v3136_v43  ;;  %v7468_v29 = vpack.c.bf16 %v3137_v48, %v3137_v48  ;;  %v3365_v40 = vsel %vm282_vm4, %v3359_v2, 0 }
 0x51e   :  { %v3358_v30 = vpop.permute.xlu1 %3357 }
 0x51f   :  { %v3360_v5 = vsel %vm507_vm14, %v3356_v20, %v3358_v30  ;;  %v3480_v59 = vpop.permute.xlu0 %3479  ;;  %v3768_v4 = vsel %vm8475_vm13, %v7466_v39, 0  ;;  %v3769_v7 = vsel %vm8476_vm15, %v7468_v29, 0  ;;  %v3764_v0 = vsel %vm8478_vm6, %v7466_v39, 0 }
 0x520   :  { %5764 = vmatprep.subr.msk.bf16.mxu1 %vm282_vm4, %v3360_v5  ;;  %3776 = vrot.lane.b32.xlu1 %v3768_v4, %s6170_s26  ;;  %v3958_v22 = vsel %vm8481_vm1, %v7466_v39, 0  ;;  %vm8483_vm13 = vcmp.ne.s16.totalorder %v6566_v33, 0  ;;  %vm8485_vm15 = vcmp.ne.s16.totalorder %v6607_v54, 0  ;;  %vm8486_vm6 = vcmp.ne.s16.totalorder %v6601_v53, 0  ;;  %v5769_v33 = vld [vmem:[%s8261_s4 + $0x14] sm:$0xf] }
 0x521   :  { %3778 = vrot.lane.b32.xlu0 %v3769_v7, %s6170_s26  ;;  %3371 = vmatpush1.bf16.msra.mxu1 %v3365_v40  ;;  %s8480_s26 = smov 32   ;;  %v3959_v63 = vsel %vm8483_vm13, %v7468_v29, 0  ;;  %v4025_v35 = vsel %vm8485_vm15, %v7466_v39, 0  ;;  %v4026_v18 = vsel %vm8486_vm6, %v7468_v29, 0  ;;  %vm8489_vm1 = vcmp.ne.s16.totalorder %v6639_v13, 0 }
 0x522   :  { %5767 = vmatprep.subr.msk.bf16.mxu1 %vm282_vm4, %v7347_v42  ;;  %v3482_v58 = vpop.permute.xlu1 %3481  ;;  %v3765_v42 = vsel %vm8479_vm0, %v7468_v29, 0  ;;  %vm8487_vm0 = vcmp.ne.s16.totalorder %v6644_v16, 0  ;;  %v4093_v24 = vsel %vm8489_vm1, %v7468_v29, 0  ;;  %vm8490_vm13 = vcmp.ne.s16.totalorder %v6365_v47, 0  ;;  %v5772_v13 = vld [vmem:[%s8261_s4 + $0x18] sm:$0xf] }
 0x523   :  { %v3484_v28 = vpop.permute.xlu0 %3483  ;;  %v3485_v17 = vsel %vm488_vm7, %v3480_v59, %v3482_v58  ;;  %v4092_v53 = vsel %vm8487_vm0, %v7466_v39, 0  ;;  %v4159_v16 = vsel %vm8490_vm13, %v7466_v39, 0  ;;  %vm8491_vm15 = vcmp.ne.s16.totalorder %v6361_v46, 0  ;;  %v5775_v4 = vld [vmem:[%s8261_s4 + $0x1c] sm:$0xf] }
 0x524   :  { %v3486_v32 = vsel %vm488_vm7, %v3482_v58, %v3484_v28  ;;  %5765 = vmatmul.mubr.msk.bf16.vlgmr.msra.gmra.mrb[8].mxu1 %vm278_vm5, %v5763_v34  ;;  %3835 = vrot.lane.b32.xlu1 %v8422_v57, %s8477_s18  ;;  %v3491_v23 = vsel %vm282_vm4, %v3485_v17, 0  ;;  %v4160_v43 = vsel %vm8491_vm15, %v7468_v29, 0  ;;  %vm8492_vm6 = vcmask 908288   ;;  %v8502_v58 = vld [vmem:[#allocation10_spill] sm:$0xff] }
 0x525   :  { %3837 = vrot.lane.b32.xlu0 %v3764_v0, %s8477_s18  ;;  %3424 = vmatpush1.bf16.msra.mxu1 %v3418_v55  ;;  %vm8493_vm0 = vcmp.ne.s16.totalorder %v6386_v52, 0  ;;  %vm8494_vm1 = vcmp.ne.s16.totalorder %v6378_v49, 0  ;;  %vm8495_vm13 = vmmov %vm8492_vm6  ;;  %v8496_v52 = vld [vmem:[#allocation8_spill] sm:$0xff]  ;;  %v8499_v49 = vld [vmem:[#allocation7_spill] sm:$0xff] }
 0x526   :  { %5770 = vmatprep.subr.msk.bf16.mxu1 %vm282_vm4, %v3486_v32  ;;  %3455 = vmatprep.mubr.bf16.mxu1 %v8440_v38  ;;  %v3547_v45 = vpop.permute.xlu1 %3546  ;;  %v4287_v30 = vsel %vm8493_vm0, %v7466_v39, 0  ;;  %v4288_v5 = vsel %vm8494_vm1, %v7468_v29, 0  ;;  %vm8497_vm15 = vcmp.ne.s16.totalorder %v8496_v52, 0  ;;  %vm8503_vm0 = vcmp.ne.s16.totalorder %v8502_v58, 0  ;;  %v8504_v32 = vld [vmem:[#allocation9_spill] sm:$0xff] }
 0x527   :  { %v3549_v15 = vpop.permute.xlu0 %3548  ;;  %v4354_v40 = vsel %vm8497_vm15, %v7466_v39, 0  ;;  %v4421_v28 = vsel %vm8503_vm0, %v7466_v39, 0  ;;  %vm8505_vm1 = vcmp.ne.s16.totalorder %v8504_v32, 0  ;;  %v5778_v55 = vld [vmem:[%s8261_s4 + $0x20] sm:$0xf]  ;;  %vm8507_vm15 = vcmp.ne.s16.totalorder %v6405_v56, 0 }
 0x528   :  { %3839 = vrot.lane.b32.xlu1 %v3765_v42, %s8477_s18  ;;  %v3552_v41 = vsel %vm410_vm11, %v3547_v45, %v3549_v15  ;;  %v4422_v0 = vsel %vm8505_vm1, %v7468_v29, 0  ;;  %v4489_v45 = vsel %vm8507_vm15, %v7468_v29, 0  ;;  %vm8509_vm0 = vcmp.ne.s16.totalorder %v6439_v3, 0  ;;  %v8510_v56 = vld [vmem:[#allocation11_spill] sm:$0xff]  ;;  %s8514_s4 = smov 126   ;;  %v8515_v3 = vld [vmem:[#allocation13_spill] sm:$0xff] }
 0x529   :  { %3897 = vrot.lane.b32.xlu0 %v8422_v57, %s8480_s26  ;;  %v3558_v54 = vsel %vm282_vm4, %v3552_v41, 0  ;;  %vm8511_vm1 = vcmp.ne.s16.totalorder %v8510_v56, 0  ;;  %vm8516_vm15 = vcmp.ne.s16.totalorder %v8515_v3, 0  ;;  %s8528_s18 = smov 96   ;;  %v8536_v56 = vld [vmem:[#allocation18_spill] sm:$0xff]  ;;  %v8540_v41 = vld [vmem:[#allocation20_spill] sm:$0xff] }
 0x52a   :  { %v3551_v8 = vpop.permute.xlu1 %3550 }
 0x52b   :  { %v3553_v51 = vsel %vm410_vm11, %v3549_v15, %v3551_v8  ;;  %v3611_v9 = vpop.permute.xlu0 %3610  ;;  %v4747_v8 = vsel %vm8516_vm15, %v7466_v39, 0 }
 0x52c   :  { %3899 = vrot.lane.b32.xlu1 %v7466_v39, %s8480_s26 }
 0x52d   :  { %3901 = vrot.lane.b32.xlu0 %v7468_v29, %s8480_s26  ;;  %s8498_s26 = smov 14  }
 0x52e   :  { %v3613_v11 = vpop.permute.xlu1 %3612 }
 0x52f   :  { %v3615_v10 = vpop.permute.xlu0 %3614  ;;  %v3616_v48 = vsel %vm785_vm9, %v3611_v9, %v3613_v11  ;;  %v7676_v9 = vpop.f32.mrb[4].mxu1 }
 0x530   :  { %5768 = vmatmul.mubr.msk.bf16.vlgmr.msra.gmra.mrb[8].mxu1 %vm278_vm5, %v5766_v50  ;;  %3964 = vrot.lane.b32.xlu1 %v8422_v57, %s8482_s22  ;;  %v3617_v1 = vsel %vm785_vm9, %v3613_v11, %v3615_v10  ;;  %v3622_v47 = vsel %vm282_vm4, %v3616_v48, 0  ;;  %v4680_v50 = vsel %vm8511_vm1, %v7466_v39, 0  ;;  %vm8521_vm1 = vcmp.ne.s16.totalorder %v6497_v37, 0 }
 0x531   :  { %3497 = vmatpush1.bf16.msra.mxu1 %v3491_v23  ;;  %3966 = vrot.lane.b32.xlu0 %v3958_v22, %s8482_s22  ;;  %v8518_v23 = vld [vmem:[#allocation14_spill] sm:$0xff]  ;;  %v5079_v10 = vsel %vm2405_vm3, %v7466_v39, 0  ;;  %vm8526_vm3 = vcmask 269312  }
 0x532   :  { %5773 = vmatprep.subr.msk.bf16.mxu1 %vm282_vm4, %v3553_v51  ;;  %3528 = vmatprep.mubr.bf16.mxu1 %v8440_v38  ;;  %v3678_v31 = vpop.permute.xlu1 %3677 }
 0x533   :  { %v3680_v2 = vpop.permute.xlu0 %3679 }
 0x534   :  { %3968 = vrot.lane.b32.xlu1 %v3959_v63, %s8482_s22  ;;  %v3683_v59 = vsel %vm8495_vm13, %v3678_v31, %v3680_v2  ;;  %vm8506_vm13 = vcmp.ne.s16.totalorder %v6418_v60, 0  ;;  %v4614_v60 = vsel %vm8509_vm0, %v7468_v29, 0  ;;  %vm8520_vm0 = vcmp.ne.s16.totalorder %v6475_v19, 0  ;;  %v7680_v19 = vpop.f32.mrb[5].mxu1 }
 0x535   :  { %4031 = vrot.lane.b32.xlu0 %v8422_v57, %s8484_s1  ;;  %v3689_v7 = vsel %vm282_vm4, %v3683_v59, 0  ;;  %v4488_v42 = vsel %vm8506_vm13, %v7466_v39, 0  ;;  %v4814_v51 = vsel %vm8520_vm0, %v7466_v39, 0  ;;  %v4815_v63 = vsel %vm8521_vm1, %v7468_v29, 0  ;;  %v2980_v37 = vpop.f32.mrb[6].mxu1  ;;  %v8531_v59 = vld [vmem:[#allocation16_spill] sm:$0xff] }
 0x536   :  { %v3682_v20 = vpop.permute.xlu1 %3681  ;;  %vm8532_vm15 = vcmp.ne.s16.totalorder %v8531_v59, 0  ;;  %vm8535_vm1 = vcmask 252928  }
 0x537   :  { %v3684_v46 = vsel %vm8492_vm6, %v3680_v2, %v3682_v20  ;;  %vm8500_vm6 = vcmp.ne.s16.totalorder %v8499_v49, 0  ;;  %v5429_v49 = vld [vmem:[#allocation2 + $0x8] sm:$0xf] }
 0x538   :  { %4033 = vrot.lane.b32.xlu1 %v4025_v35, %s8484_s1  ;;  %v4355_v34 = vsel %vm8500_vm6, %v7468_v29, 0  ;;  %vm8508_vm6 = vcmp.ne.s16.totalorder %v6426_v62, 0  ;;  %v8512_v62 = vld [vmem:[#allocation12_spill] sm:$0xff]  ;;  %v2981_v35 = vpop.f32.mrb[7].mxu1 }
 0x539   :  { %4035 = vrot.lane.b32.xlu0 %v4026_v18, %s8484_s1  ;;  %v4613_v17 = vsel %vm8508_vm6, %v7466_v39, 0  ;;  %vm8513_vm13 = vcmp.ne.s16.totalorder %v8512_v62, 0  ;;  %s8517_s1 = smov 114   ;;  %vm8519_vm6 = vcmp.ne.s16.totalorder %v8518_v23, 0  ;;  %v4945_v18 = vsel %vm845_vm12, %v7466_v39, 0  ;;  %v5494_v35 = vld [vmem:[#allocation2 + $0x4] sm:$0xff] }
 0x53a   :  { %v4681_v15 = vsel %vm8513_vm13, %v7468_v29, 0  ;;  %v4748_v22 = vsel %vm8519_vm6, %v7468_v29, 0  ;;  %vm8525_vm12 = vcmp.ne.s16.totalorder %v8524_v21, 0  ;;  %vm8533_vm6 = vcmask 261120   ;;  %v5788_v23 = vld [vmem:[%s8262_s7 + $0x8] sm:$0xf] }
 0x53b   :  { %vm8534_vm0 = vmmov %vm8533_vm6  ;;  %v5498_v11 = vcombine.high %v5494_v35, %v5494_v35 }
 0x53c   :  { %5771 = vmatmul.mubr.msk.bf16.vlgmr.msra.gmra.mrb[8].mxu1 %vm278_vm5, %v5769_v33  ;;  %4098 = vrot.lane.b32.xlu1 %v8422_v57, %s8488_s23  ;;  %v5012_v33 = vsel %vm2329_vm10, %v7466_v39, 0  ;;  %vm8527_vm10 = vmmov %vm8526_vm3 }
 0x53d   :  { %3564 = vmatpush1.bf16.msra.mxu1 %v3558_v54  ;;  %4100 = vrot.lane.b32.xlu0 %v4092_v53, %s8488_s23  ;;  %v5146_v54 = vsel %vm8525_vm12, %v7466_v39, 0  ;;  %v3775_v53 = vpop.permute.xlu0 %3774  ;;  %vm8537_vm12 = vcmp.ne.s16.totalorder %v8536_v56, 0 }
 0x53e   :  { %5776 = vmatprep.subr.msk.bf16.mxu1 %vm282_vm4, %v3617_v1  ;;  %3595 = vmatprep.mubr.bf16.mxu1 %v8440_v38  ;;  %v4946_v1 = vsel %vm846_vm2, %v7468_v29, 0  ;;  %vm8529_vm2 = vcmask 277504  }
 0x53f   :  { %vm8530_vm13 = vmmov %vm8529_vm2 }
 0x540   :  { %4102 = vrot.lane.b32.xlu1 %v4093_v24, %s8488_s23  ;;  %s8501_s23 = smov 2  }
 0x541   :  { %4165 = vrot.lane.b32.xlu0 %v8422_v57, %s6164_s28 }
 0x544   :  { %4167 = vrot.lane.b32.xlu1 %v4159_v16, %s6164_s28 }
 0x545   :  { %4169 = vrot.lane.b32.xlu0 %v4160_v43, %s6164_s28 }
 0x548   :  { %5774 = vmatmul.mubr.msk.bf16.vlgmr.msra.gmra.mrb[8].mxu1 %vm278_vm5, %v5772_v13  ;;  %4226 = vrot.lane.b32.xlu1 %v8422_v57, %s8425_s29  ;;  %v5783_v13 = vld [vmem:[%s8262_s7 + $0x4] sm:$0xf] }
 0x549   :  { %3628 = vmatpush1.bf16.msra.mxu1 %v3622_v47  ;;  %4228 = vrot.lane.b32.xlu0 %v7466_v39, %s8425_s29 }
 0x54a   :  { %5779 = vmatprep.subr.msk.bf16.mxu1 %vm282_vm4, %v3684_v46  ;;  %3659 = vmatprep.mubr.bf16.mxu1 %v8440_v38  ;;  %v5428_v46 = vld [vmem:[#allocation2] sm:$0xff] }
 0x54b   :  { %v5432_v52 = vcombine.high %v5428_v46, %v5428_v46 }
 0x54c   :  { %4230 = vrot.lane.b32.xlu1 %v7468_v29, %s8425_s29 }
 0x54d   :  { %4293 = vrot.lane.b32.xlu0 %v8422_v57, %s6163_s27 }
 0x550   :  { %4295 = vrot.lane.b32.xlu1 %v4287_v30, %s6163_s27 }
 0x551   :  { %4297 = vrot.lane.b32.xlu0 %v4288_v5, %s6163_s27 }
 0x554   :  { %5777 = vmatmul.mubr.msk.bf16.vlgmr.msra.gmra.mrb[8].mxu1 %vm278_vm5, %v5775_v4  ;;  %4360 = vrot.lane.b32.xlu1 %v8422_v57, %s8498_s26  ;;  %v5013_v4 = vsel %vm8532_vm15, %v7468_v29, 0  ;;  %vm8543_vm15 = vcmask 146432  }
 0x555   :  { %3695 = vmatpush1.bf16.msra.mxu1 %v3689_v7  ;;  %4362 = vrot.lane.b32.xlu0 %v4354_v40, %s8498_s26 }
 0x556   :  { %3726 = vmatprep.mubr.bf16.mxu1 %v8440_v38 }
 0x558   :  { %4364 = vrot.lane.b32.xlu1 %v4355_v34, %s8498_s26 }
 0x559   :  { %4427 = vrot.lane.b32.xlu0 %v8422_v57, %s8501_s23 }
 0x55c   :  { %4429 = vrot.lane.b32.xlu1 %v4421_v28, %s8501_s23 }
 0x55d   :  { %4431 = vrot.lane.b32.xlu0 %v4422_v0, %s8501_s23  ;;  %v3766_v0 = vld [vmem:[%s8262_s7] sm:$0xf] }
 0x560   :  { %5780 = vmatmul.mubr.msk.bf16.vlgmr.msra.gmra.mrb[8].mxu1 %vm278_vm5, %v5778_v55  ;;  %4494 = vrot.lane.b32.xlu1 %v8422_v57, %s6160_s21 }
 0x561   :  { %4496 = vrot.lane.b32.xlu0 %v4488_v42, %s6160_s21  ;;  %3823 = vmatprep.mubr.bf16.mxu1 %v8440_v38 }
 0x564   :  { %4498 = vrot.lane.b32.xlu1 %v4489_v45, %s6160_s21 }
 0x565   :  { %4620 = vrot.lane.b32.xlu0 %v4613_v17, %s6159_s20 }
 0x568   :  { %4622 = vrot.lane.b32.xlu1 %v4614_v60, %s6159_s20 }
 0x569   :  { %4624 = vrot.lane.b32.xlu0 %v8422_v57, %s6159_s20 }
 0x56c   :  { %4687 = vrot.lane.b32.xlu1 %v4680_v50, %s8514_s4  ;;  %v5080_v50 = vsel %vm8537_vm12, %v7468_v29, 0 }
 0x56d   :  { %4689 = vrot.lane.b32.xlu0 %v4681_v15, %s8514_s4 }
 0x570   :  { %4691 = vrot.lane.b32.xlu1 %v8422_v57, %s8514_s4 }
 0x571   :  { %4754 = vrot.lane.b32.xlu0 %v4747_v8, %s8517_s1 }
 0x574   :  { %4756 = vrot.lane.b32.xlu1 %v4748_v22, %s8517_s1 }
 0x575   :  { %4758 = vrot.lane.b32.xlu0 %v8422_v57, %s8517_s1 }
 0x578   :  { %4821 = vrot.lane.b32.xlu1 %v4814_v51, %s6158_s17 }
 0x579   :  { %4823 = vrot.lane.b32.xlu0 %v4815_v63, %s6158_s17 }
 0x57c   :  { %4825 = vrot.lane.b32.xlu1 %v8422_v57, %s6158_s17 }
 0x57d   :  { %4885 = vrot.lane.b32.xlu0 %v7466_v39, %s6180_s24 }
 0x580   :  { %4887 = vrot.lane.b32.xlu1 %v7468_v29, %s6180_s24 }
 0x581   :  { %4889 = vrot.lane.b32.xlu0 %v8422_v57, %s6180_s24 }
 0x584   :  { %4952 = vrot.lane.b32.xlu1 %v4945_v18, %s6157_s16 }
 0x585   :  { %5019 = vrot.lane.b32.xlu0 %v5012_v33, %s8406_s14 }
 0x588   :  { %4956 = vrot.lane.b32.xlu1 %v8422_v57, %s6157_s16 }
 0x589   :  { %5023 = vrot.lane.b32.xlu0 %v8422_v57, %s8406_s14 }
 0x58c   :  { %5086 = vrot.lane.b32.xlu1 %v5079_v10, %s8409_s25 }
 0x58d   :  { %5153 = vrot.lane.b32.xlu0 %v5146_v54, %s8411_s0  ;;  %v5495_v54 = vld [vmem:[#allocation2 + $0xc] sm:$0xf] }
 0x590   :  { %5090 = vrot.lane.b32.xlu1 %v8422_v57, %s8409_s25 }
 0x591   :  { %4954 = vrot.lane.b32.xlu0 %v4946_v1, %s6157_s16 }
 0x592   :  { %v3777_v24 = vpop.permute.xlu1 %3776 }
 0x593   :  { %v3780_v31 = vsel %vm8526_vm3, %v3775_v53, %v3777_v24  ;;  %v3779_v16 = vpop.permute.xlu0 %3778  ;;  %vm8538_vm3 = vmmov %vm8535_vm1 }
 0x594   :  { %v3781_v43 = vsel %vm8527_vm10, %v3777_v24, %v3779_v16  ;;  %5214 = vrot.lane.b32.xlu1 %v7466_v39, %s8528_s18  ;;  %v3786_v48 = vsel %vm282_vm4, %v3780_v31, 0  ;;  %vm8539_vm10 = vcmask 244736   ;;  %v5791_v24 = vld [vmem:[%s8262_s7 + $0xc] sm:$0xf] }
 0x595   :  { %5157 = vrot.lane.b32.xlu0 %v8422_v57, %s8411_s0  ;;  %5784 = vmatprep.subr.msk.bf16.mxu1 %vm282_vm4, %v3781_v43 }
 0x596   :  { %3792 = vmatpush1.bf16.msra.mxu1 %v3786_v48  ;;  %v3836_v36 = vpop.permute.xlu1 %3835 }
 0x597   :  { %v3838_v20 = vpop.permute.xlu0 %3837 }
 0x598   :  { %5218 = vrot.lane.b32.xlu1 %v8422_v57, %s8528_s18  ;;  %v3841_v2 = vsel %vm8529_vm2, %v3836_v36, %v3838_v20  ;;  %vm8541_vm2 = vcmp.ne.s16.totalorder %v8540_v41, 0 }
 0x599   :  { %5216 = vrot.lane.b32.xlu0 %v7468_v29, %s8528_s18  ;;  %5785 = vmatmul.mubr.msk.bf16.vlgmr.msra.gmra.mrb[12].mxu1 %vm278_vm5, %v5783_v13  ;;  %v3847_v7 = vsel %vm282_vm4, %v3841_v2, 0  ;;  %v5147_v33 = vsel %vm8541_vm2, %v7468_v29, 0  ;;  %v8544_v2 = vld [vmem:[#allocation21_spill] sm:$0xff] }
 0x59a   :  { %v3840_v47 = vpop.permute.xlu1 %3839  ;;  %3884 = vmatprep.mubr.bf16.mxu1 %v8440_v38 }
 0x59b   :  { %v3898_v30 = vpop.permute.xlu0 %3897  ;;  %v3842_v5 = vsel %vm8530_vm13, %v3838_v20, %v3840_v47  ;;  %vm8542_vm13 = vmmov %vm8539_vm10 }
 0x59c   :  { %5021 = vrot.lane.b32.xlu1 %v5013_v4, %s8406_s14  ;;  %5786 = vmatprep.subr.msk.bf16.mxu1 %vm282_vm4, %v3842_v5  ;;  %v5794_v5 = vld [vmem:[%s8262_s7 + $0x10] sm:$0xf] }
 0x59d   :  { %5433 = vrot.lane.b32.xlu0 %v5428_v46, %s6164_s28  ;;  %3853 = vmatpush1.bf16.msra.mxu1 %v3847_v7 }
 0x59e   :  { %v3900_v40 = vpop.permute.xlu1 %3899 }
 0x59f   :  { %v3902_v34 = vpop.permute.xlu0 %3901  ;;  %v3903_v28 = vsel %vm8534_vm0, %v3898_v30, %v3900_v40  ;;  %vm8546_vm0 = vmmov %vm8543_vm15 }
 0x5a0   :  { %5435 = vrot.lane.b32.xlu1 %v5432_v52, %s6164_s28  ;;  %v3904_v58 = vsel %vm8533_vm6, %v3900_v40, %v3902_v34  ;;  %v3909_v42 = vsel %vm282_vm4, %v3903_v28, 0  ;;  %vm8545_vm6 = vcmp.ne.s16.totalorder %v8544_v2, 0  ;;  %v924_v2 = vld [vmem:[%s8267_s6] sm:$0xff] }
 0x5a1   :  { %5437 = vrot.lane.b32.xlu0 %v5429_v49, %s6164_s28  ;;  %5789 = vmatprep.subr.msk.bf16.mxu1 %vm282_vm4, %v3904_v58  ;;  %v5274_v47 = vsel %vm8545_vm6, %v7466_v39, 0  ;;  %vm8557_vm6 = vcmask 1031168  }
 0x5a2   :  { %v3965_v32 = vpop.permute.xlu1 %3964 }
 0x5a3   :  { %v3967_v55 = vpop.permute.xlu0 %3966 }
 0x5a4   :  { %5450 = vrot.lane.b32.xlu1 %v5428_v46, %s8425_s29  ;;  %v3970_v3 = vsel %vm8538_vm3, %v3965_v32, %v3967_v55 }
 0x5a5   :  { %5452 = vrot.lane.b32.xlu0 %v5429_v49, %s8425_s29  ;;  %5787 = vmatmul.mubr.msk.bf16.vlgmr.msra.gmra.mrb[12].mxu1 %vm278_vm5, %v3766_v0  ;;  %v3976_v51 = vsel %vm282_vm4, %v3970_v3, 0  ;;  %v170_v3 = vld [vmem:[%s8259_s2] sm:$0xff] }
 0x5a6   :  { %3915 = vmatpush1.bf16.msra.mxu1 %v3909_v42  ;;  %v3969_v45 = vpop.permute.xlu1 %3968  ;;  %3946 = vmatprep.mubr.bf16.mxu1 %v8440_v38 }
 0x5a7   :  { %v4032_v17 = vpop.permute.xlu0 %4031  ;;  %v3971_v60 = vsel %vm8535_vm1, %v3967_v55, %v3969_v45  ;;  %vm8547_vm1 = vcmask 138240   ;;  %v5797_v55 = vld [vmem:[%s8262_s7 + $0x14] sm:$0xf]  ;;  %v8551_v45 = vld [vmem:[#allocation23_spill] sm:$0xff] }
 0x5a8   :  { %5460 = vrot.lane.b32.xlu1 %v5428_v46, %s6163_s27  ;;  %5792 = vmatprep.subr.msk.bf16.mxu1 %vm282_vm4, %v3971_v60  ;;  %vm8550_vm3 = vmmov %vm8547_vm1  ;;  %v8553_v60 = vld [vmem:[#allocation24_spill] sm:$0xff] }
 0x5a9   :  { %5088 = vrot.lane.b32.xlu0 %v5080_v50, %s8409_s25  ;;  %vm8554_vm2 = vcmp.ne.s16.totalorder %v8553_v60, 0 }
 0x5aa   :  { %v4034_v62 = vpop.permute.xlu1 %4033  ;;  %v5342_v56 = vsel %vm8554_vm2, %v7468_v29, 0  ;;  %vm8563_vm2 = vcmask 15360  }
 0x5ab   :  { %v4036_v15 = vpop.permute.xlu0 %4035  ;;  %v4037_v53 = vsel %vm8542_vm13, %v4032_v17, %v4034_v62  ;;  %vm8555_vm13 = vcmask 130048  }
 0x5ac   :  { %5464 = vrot.lane.b32.xlu1 %v5429_v49, %s6163_s27  ;;  %v4038_v63 = vsel %vm8539_vm10, %v4034_v62, %v4036_v15  ;;  %v4043_v16 = vsel %vm282_vm4, %v4037_v53, 0  ;;  %vm8552_vm10 = vcmp.ne.s16.totalorder %v8551_v45, 0 }
 0x5ad   :  { %5462 = vrot.lane.b32.xlu0 %v5432_v52, %s6163_s27  ;;  %v5341_v17 = vsel %vm8552_vm10, %v7466_v39, 0 }
 0x5ae   :  { %v4099_v8 = vpop.permute.xlu1 %4098 }
 0x5af   :  { %v4101_v22 = vpop.permute.xlu0 %4100 }
 0x5b0   :  { %5479 = vrot.lane.b32.xlu1 %v5432_v52, %s6160_s21 }
 0x5b1   :  { %5477 = vrot.lane.b32.xlu0 %v5428_v46, %s6160_s21  ;;  %5790 = vmatmul.mubr.msk.bf16.vlgmr.msra.gmra.mrb[12].mxu1 %vm278_vm5, %v5788_v23  ;;  %v4104_v46 = vsel %vm8546_vm0, %v4099_v8, %v4101_v22  ;;  %v916_v23 = vld [vmem:[%s8264_s5] sm:$0xff]  ;;  %vm8558_vm0 = vmmov %vm8557_vm6 }
 0x5b2   :  { %3982 = vmatpush1.bf16.msra.mxu1 %v3976_v51  ;;  %v4103_v37 = vpop.permute.xlu1 %4102  ;;  %4013 = vmatprep.mubr.bf16.mxu1 %v8440_v38  ;;  %v4110_v4 = vsel %vm282_vm4, %v4104_v46, 0  ;;  %v2767_v51 = vld [vmem:[%s8265_s8] sm:$0xff] }
 0x5b3   :  { %5795 = vmatprep.subr.msk.bf16.mxu1 %vm282_vm4, %v4038_v63  ;;  %v4166_v18 = vpop.permute.xlu0 %4165  ;;  %v4105_v43 = vsel %vm8543_vm15, %v4101_v22, %v4103_v37  ;;  %vm8556_vm15 = vmmov %vm8555_vm13 }
 0x5b4   :  { %5155 = vrot.lane.b32.xlu1 %v5147_v33, %s8411_s0  ;;  %v5800_v33 = vld [vmem:[%s8262_s7 + $0x18] sm:$0xf] }
 0x5b5   :  { %5481 = vrot.lane.b32.xlu0 %v5429_v49, %s6160_s21  ;;  %v8548_v49 = vld [vmem:[#allocation22_spill] sm:$0xff] }
 0x5b6   :  { %v4168_v10 = vpop.permute.xlu1 %4167  ;;  %vm8549_vm12 = vcmp.ne.s16.totalorder %v8548_v49, 0 }
 0x5b7   :  { %v4170_v21 = vpop.permute.xlu0 %4169  ;;  %v5275_v34 = vsel %vm8549_vm12, %v7468_v29, 0  ;;  %v4171_v32 = vsel %vm8550_vm3, %v4166_v18, %v4168_v10  ;;  %vm8561_vm3 = vcmask 113664  }
 0x5b8   :  { %5499 = vrot.lane.b32.xlu1 %v5494_v35, %s6159_s20  ;;  %v4172_v7 = vsel %vm8547_vm1, %v4168_v10, %v4170_v21  ;;  %v4177_v50 = vsel %vm282_vm4, %v4171_v32, 0  ;;  %vm8559_vm1 = vcmask 932864   ;;  %vm8562_vm10 = vmmov %vm8561_vm3 }
 0x5b9   :  { %5501 = vrot.lane.b32.xlu0 %v5498_v11, %s6159_s20  ;;  %vm8560_vm12 = vmmov %vm8559_vm1 }
 0x5ba   :  { %v7777_v1 = vpop.permute.xlu1 %4226 }
 0x5bb   :  { %v7782_v31 = vpop.permute.xlu0 %4228 }
 0x5bc   :  { %5503 = vrot.lane.b32.xlu1 %v5495_v54, %s6159_s20  ;;  %v4232_v18 = vsel %vm8556_vm15, %v7777_v1, %v7782_v31  ;;  %vm8565_vm15 = vcmask 908288  }
 0x5bd   :  { %5516 = vrot.lane.b32.xlu0 %v5494_v35, %s6158_s17  ;;  %5793 = vmatmul.mubr.msk.bf16.vlgmr.msra.gmra.mrb[12].mxu1 %vm278_vm5, %v5791_v24  ;;  %v4238_v21 = vsel %vm282_vm4, %v4232_v18, 0 }
 0x5be   :  { %4049 = vmatpush1.bf16.msra.mxu1 %v4043_v16  ;;  %v4231_v48 = vpop.permute.xlu1 %4230  ;;  %4080 = vmatprep.mubr.bf16.mxu1 %v8440_v38  ;;  %v194_v16 = vld [vmem:[%s8260_s3] sm:$0xff] }
 0x5bf   :  { %5798 = vmatprep.subr.msk.bf16.mxu1 %vm282_vm4, %v4105_v43  ;;  %v7791_v36 = vpop.permute.xlu0 %4293  ;;  %v4233_v62 = vsel %vm8555_vm13, %v7782_v31, %v4231_v48  ;;  %vm8564_vm13 = vmmov %vm8563_vm2 }
 0x5c0   :  { %5518 = vrot.lane.b32.xlu1 %v5498_v11, %s6158_s17 }
 0x5c1   :  { %5520 = vrot.lane.b32.xlu0 %v5495_v54, %s6158_s17 }
 0x5c2   :  { %v7795_v13 = vpop.permute.xlu1 %4295 }
 0x5c3   :  { %v7797_v20 = vpop.permute.xlu0 %4297 }
 0x5c4   :  { %5281 = vrot.lane.b32.xlu1 %v5274_v47, %s8414_s15  ;;  %v4299_v47 = vsel %vm429_vm8, %v7791_v36, %v7795_v13  ;;  %v2991_v36 = vld [vmem:[%s8269_s12] sm:$0xff] }
 0x5c5   :  { %5533 = vrot.lane.b32.xlu0 %v5494_v35, %s6180_s24 }
 0x5c6   :  { %v7805_v30 = vpop.permute.xlu1 %4360 }
 0x5c7   :  { %v7810_v59 = vpop.permute.xlu0 %4362 }
 0x5c8   :  { %5285 = vrot.lane.b32.xlu1 %v8422_v57, %s8414_s15 }
 0x5c9   :  { %5543 = vrot.lane.b32.xlu0 %v5494_v35, %s6157_s16  ;;  %5796 = vmatmul.mubr.msk.bf16.vlgmr.msra.gmra.mrb[12].mxu1 %vm278_vm5, %v5794_v5  ;;  %v2775_v5 = vld [vmem:[%s8268_s9] sm:$0xff] }
 0x5ca   :  { %4116 = vmatpush1.bf16.msra.mxu1 %v4110_v4  ;;  %v7818_v52 = vpop.permute.xlu1 %4364  ;;  %4147 = vmatprep.mubr.bf16.mxu1 %v8440_v38  ;;  %v5803_v4 = vld [vmem:[%s8262_s7 + $0x1c] sm:$0xf] }
 0x5cb   :  { %5801 = vmatprep.subr.msk.bf16.mxu1 %vm282_vm4, %v4172_v7  ;;  %v7822_v40 = vpop.permute.xlu0 %4427 }
 0x5cc   :  { %5535 = vrot.lane.b32.xlu1 %v5495_v54, %s6180_s24 }
 0x5cd   :  { %5283 = vrot.lane.b32.xlu0 %v5275_v34, %s8414_s15  ;;  %v4305_v34 = vsel %vm282_vm4, %v4299_v47, 0 }
 0x5ce   :  { %v7829_v58 = vpop.permute.xlu1 %4429 }
 0x5cf   :  { %v7831_v28 = vpop.permute.xlu0 %4431 }
 0x5d0   :  { %5545 = vrot.lane.b32.xlu1 %v5498_v11, %s6157_s16 }
 0x5d1   :  { %5547 = vrot.lane.b32.xlu0 %v5495_v54, %s6157_s16  ;;  %v4300_v54 = vsel %vm429_vm8, %v7795_v13, %v7797_v20  ;;  %v4367_v13 = vsel %vm8561_vm3, %v7810_v59, %v7818_v52  ;;  %v4366_v52 = vsel %vm8562_vm10, %v7805_v30, %v7810_v59  ;;  %vm8571_vm10 = vcmask 801792  }
 0x5d2   :  { %v7836_v0 = vpop.permute.xlu1 %4494 }
 0x5d3   :  { %v7841_v42 = vpop.permute.xlu0 %4496 }
 0x5d4   :  { %5348 = vrot.lane.b32.xlu1 %v5341_v17, %s8421_s30 }
 0x5d5   :  { %5350 = vrot.lane.b32.xlu0 %v5342_v56, %s8421_s30  ;;  %5799 = vmatmul.mubr.msk.bf16.vlgmr.msra.gmra.mrb[12].mxu1 %vm278_vm5, %v5797_v55 }
 0x5d6   :  { %4183 = vmatpush1.bf16.msra.mxu1 %v4177_v50  ;;  %v7855_v15 = vpop.permute.xlu1 %4498  ;;  %4214 = vmatprep.mubr.bf16.mxu1 %v8440_v38 }
 0x5d7   :  { %5804 = vmatprep.subr.msk.bf16.mxu1 %vm282_vm4, %v4233_v62  ;;  %v4621_v8 = vpop.permute.xlu0 %4620 }
 0x5d8   :  { %5352 = vrot.lane.b32.xlu1 %v8422_v57, %s8421_s30  ;;  %v2983_v57 = vld [vmem:[%s8266_s11] sm:$0xff] }
 0x5d9   :  { %175 = vperm.xlu0 %6144, %v170_v3  }
 0x5da   :  { %v4623_v22 = vpop.permute.xlu1 %4622 }
 0x5db   :  { %v4625_v63 = vpop.permute.xlu0 %4624  ;;  %v7871_v37 = vsel %vm488_vm7, %v4621_v8, %v4623_v22 }
 0x5dc   :  { %v7874_v35 = vsel %vm488_vm7, %v4623_v22, %v4625_v63  ;;  %919 = vperm.xlu1 %6145, %v916_v23   ;;  %v4434_v22 = vsel %vm8563_vm2, %v7829_v58, %v7831_v28  ;;  %vm8572_vm2 = vmmov %vm8571_vm10 }
 0x5dd   :  { %2770 = vperm.xlu0 %6144, %v2767_v51  }
 0x5de   :  { %v4688_v41 = vpop.permute.xlu1 %4687 }
 0x5df   :  { %v4690_v11 = vpop.permute.xlu0 %4689 }
 0x5e0   :  { %v7886_v10 = vsel %vm8557_vm6, %v4688_v41, %v4690_v11  ;;  %2986 = vperm.xlu1 %6145, %v2983_v57   ;;  %v5809_v41 = vld [vmem:[%s8262_s7 + $0x24] sm:$0xf]  ;;  %vm8566_vm6 = vmmov %vm8565_vm15 }
 0x5e1   :  { %3089 = vperm.xlu0 %6144, %v170_v3   ;;  %5802 = vmatmul.mubr.msk.bf16.vlgmr.msra.gmra.mrb[12].mxu1 %vm278_vm5, %v5800_v33  ;;  %v5806_v3 = vld [vmem:[%s8262_s7 + $0x20] sm:$0xf] }
 0x5e2   :  { %4244 = vmatpush1.bf16.msra.mxu1 %v4238_v21  ;;  %v4692_v53 = vpop.permute.xlu1 %4691  ;;  %4275 = vmatprep.mubr.bf16.mxu1 %v8440_v38 }
 0x5e3   :  { %5807 = vmatprep.subr.msk.bf16.mxu1 %vm282_vm4, %v4300_v54  ;;  %v4755_v1 = vpop.permute.xlu0 %4754  ;;  %v7896_v24 = vsel %vm8558_vm0, %v4690_v11, %v4692_v53  ;;  %vm8567_vm0 = vcmask 785408  }
 0x5e4   :  { %3740 = vperm.xlu1 %6145, %v916_v23   ;;  %v4372_v23 = vsel %vm282_vm4, %v4366_v52, 0 }
 0x5e5   :  { %5411 = vperm.xlu0 %6144, %v2767_v51  }
 0x5e6   :  { %v4757_v31 = vpop.permute.xlu1 %4756 }
 0x5e7   :  { %v4759_v43 = vpop.permute.xlu0 %4758  ;;  %v7902_v48 = vsel %vm8559_vm1, %v4755_v1, %v4757_v31  ;;  %vm8568_vm1 = vmmov %vm8567_vm0 }
 0x5e8   :  { %v7905_v20 = vsel %vm8560_vm12, %v4757_v31, %v4759_v43  ;;  %5619 = vperm.xlu1 %6145, %v2983_v57   ;;  %v4433_v57 = vsel %vm8564_vm13, %v7822_v40, %v7829_v58  ;;  %v4501_v40 = vsel %vm507_vm14, %v7841_v42, %v7855_v15  ;;  %v4500_v43 = vsel %vm507_vm14, %v7836_v0, %v7841_v42 }
 0x5e9   :  { %199 = vperm.xlu0 %6144, %v194_v16   ;;  %v4439_v21 = vsel %vm282_vm4, %v4433_v57, 0  ;;  %vm8569_vm12 = vcmask 900096   ;;  %vm8573_vm13 = vcmask 138240  }
 0x5ea   :  { %v4822_v46 = vpop.permute.xlu1 %4821  ;;  %vm8570_vm3 = vmmov %vm8569_vm12 }
 0x5eb   :  { %v4824_v7 = vpop.permute.xlu0 %4823 }
 0x5ec   :  { %v7920_v49 = vsel %vm410_vm11, %v4822_v46, %v4824_v7  ;;  %927 = vperm.xlu1 %6145, %v924_v2  }
 0x5ed   :  { %2778 = vperm.xlu0 %6144, %v2775_v5   ;;  %5805 = vmatmul.mubr.msk.bf16.vlgmr.msra.gmra.mrb[12].mxu1 %vm278_vm5, %v5803_v4  ;;  %v4506_v4 = vsel %vm282_vm4, %v4500_v43, 0 }
 0x5ee   :  { %4311 = vmatpush1.bf16.msra.mxu1 %v4305_v34  ;;  %v4826_v32 = vpop.permute.xlu1 %4825  ;;  %4342 = vmatprep.mubr.bf16.mxu1 %v8440_v38 }
 0x5ef   :  { %5810 = vmatprep.subr.msk.bf16.mxu1 %vm282_vm4, %v4367_v13  ;;  %v4886_v55 = vpop.permute.xlu0 %4885  ;;  %v7933_v45 = vsel %vm410_vm11, %v4824_v7, %v4826_v32  ;;  %v5815_v13 = vld [vmem:[%s8262_s7 + $0x2c] sm:$0xf] }
 0x5f0   :  { %2994 = vperm.xlu1 %6145, %v2991_v36  }
 0x5f1   :  { %3113 = vperm.xlu0 %6144, %v194_v16  }
 0x5f2   :  { %v4888_v17 = vpop.permute.xlu1 %4887 }
 0x5f3   :  { %v4890_v60 = vpop.permute.xlu0 %4889  ;;  %v7936_v56 = vsel %vm785_vm9, %v4886_v55, %v4888_v17 }
 0x5f4   :  { %v7939_v50 = vsel %vm785_vm9, %v4888_v17, %v4890_v60  ;;  %3748 = vperm.xlu1 %6145, %v924_v2   ;;  %v5812_v2 = vld [vmem:[%s8262_s7 + $0x28] sm:$0xf] }
 0x5f5   :  { %5419 = vperm.xlu0 %6144, %v2775_v5  }
 0x5f6   :  { %v4953_v62 = vpop.permute.xlu1 %4952 }
 0x5f7   :  { %v5020_v8 = vpop.permute.xlu0 %5019 }
 0x5f8   :  { %5627 = vperm.xlu1 %6145, %v2991_v36  }
 0x5f9   :  { %5808 = vmatmul.mubr.msk.bf16.vlgmr.msra.gmra.mrb[12].mxu1 %vm278_vm5, %v5806_v3 }
 0x5fa   :  { %4378 = vmatpush1.bf16.msra.mxu1 %v4372_v23  ;;  %v4957_v51 = vpop.permute.xlu1 %4956  ;;  %4409 = vmatprep.mubr.bf16.mxu1 %v8440_v38 }
 0x5fb   :  { %5813 = vmatprep.subr.msk.bf16.mxu1 %vm282_vm4, %v4434_v22  ;;  %v5024_v30 = vpop.permute.xlu0 %5023 }
 0x5fe   :  { %v5087_v59 = vpop.permute.xlu1 %5086 }
 0x5ff   :  { %v5154_v63 = vpop.permute.xlu0 %5153 }
 0x602   :  { %v5091_v18 = vpop.permute.xlu1 %5090 }
 0x603   :  { %v4955_v33 = vpop.permute.xlu0 %4954 }
 0x604   :  { %v7961_v28 = vsel %vm8565_vm15, %v4953_v62, %v4955_v33  ;;  %v7964_v11 = vsel %vm8566_vm6, %v4955_v33, %v4957_v51  ;;  %vm8574_vm15 = vmmov %vm8573_vm13  ;;  %vm8575_vm6 = vcmp.ge.s32.totalorder %v6274_v12, 1 }
 0x605   :  { %5811 = vmatmul.mubr.msk.bf16.vlgmr.msra.gmra.mrb[12].mxu1 %vm278_vm5, %v5809_v41 }
 0x606   :  { %4445 = vmatpush1.bf16.msra.mxu1 %v4439_v21  ;;  %v5215_v58 = vpop.permute.xlu1 %5214  ;;  %4476 = vmatprep.mubr.bf16.mxu1 %v8440_v38  ;;  %v4632_v21 = vsel %vm282_vm4, %v7871_v37, 0 }
 0x607   :  { %5816 = vmatprep.subr.msk.bf16.mxu1 %vm282_vm4, %v4501_v40  ;;  %v5158_v54 = vpop.permute.xlu0 %5157 }
 0x60a   :  { %v5219_v53 = vpop.permute.xlu1 %5218 }
 0x60b   :  { %v5217_v1 = vpop.permute.xlu0 %5216 }
 0x60c   :  { %v7974_v31 = vsel %vm8567_vm0, %v5215_v58, %v5217_v1  ;;  %v7977_v16 = vsel %vm8568_vm1, %v5217_v1, %v5219_v53  ;;  %vm8576_vm0 = vcmp.ge.s32.totalorder %v6280_v14, 1  ;;  %vm8577_vm1 = vcmask 793600  }
 0x60e   :  { %v5022_v15 = vpop.permute.xlu1 %5021 }
 0x60f   :  { %v5434_v47 = vpop.permute.xlu0 %5433  ;;  %v7986_v46 = vsel %vm8569_vm12, %v5020_v8, %v5022_v15  ;;  %v7989_v5 = vsel %vm8570_vm3, %v5022_v15, %v5024_v30  ;;  %vm8578_vm12 = vmmov %vm8577_vm1  ;;  %vm8579_vm3 = vcmask 130048  }
 0x611   :  { %5814 = vmatmul.mubr.msk.bf16.vlgmr.msra.gmra.mrb[12].mxu1 %vm278_vm5, %v5812_v2 }
 0x612   :  { %4512 = vmatpush1.bf16.msra.mxu1 %v4506_v4  ;;  %v5436_v7 = vpop.permute.xlu1 %5435  ;;  %4543 = vmatprep.mubr.bf16.mxu1 %v8440_v38 }
 0x613   :  { %5819 = vmatprep.subr.msk.bf16.mxu1 %vm282_vm4, %v7468_v29  ;;  %v5438_v0 = vpop.permute.xlu0 %5437  ;;  %v4559_v29 = vsel %vm282_vm4, %v7466_v39, 0  ;;  %v5439_v62 = vsel %vm8573_vm13, %v5434_v47, %v5436_v7  ;;  %vm8583_vm13 = vmmov %vm8576_vm0 }
 0x614   :  { %v5440_v3 = vsel %vm8574_vm15, %v5436_v7, %v5438_v0  ;;  %v5443_v22 = vsel %vm8575_vm6, %v5439_v62, -inf  ;;  %vm8586_vm15 = vmmov %vm8575_vm6 }
 0x615   :  { %v5444_v39 = vsel %vm8576_vm0, %v5440_v3, -inf }
 0x616   :  { %v5451_v42 = vpop.permute.xlu1 %5450  ;;  %v5447_v33 = vcombine.low %v5443_v22, %v5444_v39  ;;  %v4699_v22 = vsel %vm282_vm4, %v7886_v10, 0 }
 0x617   :  { %v5453_v34 = vpop.permute.xlu0 %5452  ;;  %v5454_v30 = vrot.slane %v5451_v42, 4 }
 0x618   :  { %v5455_v51 = vrot.slane %v5453_v34, 4 }
 0x61a   :  { %v5461_v36 = vpop.permute.xlu1 %5460  ;;  %v5456_v40 = vsel %vm282_vm4, %v5454_v30, %v5455_v51 }
 0x61b   :  { %v5089_v32 = vpop.permute.xlu0 %5088  ;;  %v5457_v37 = vsel %vm8579_vm3, %v5451_v42, %v5456_v40 }
 0x61c   :  { %v8000_v55 = vsel %vm8571_vm10, %v5087_v59, %v5089_v32  ;;  %v8003_v17 = vsel %vm8572_vm2, %v5089_v32, %v5091_v18  ;;  %vm8580_vm10 = vcmp.lt.s32.totalorder %v6274_v12, 15  ;;  %vm8581_vm2 = vcmp.lt.s32.totalorder %v6280_v14, 15 }
 0x61d   :  { %5817 = vmatmul.mubr.msk.bf16.vlgmr.msra.gmra.mrb[12].mxu1 %vm278_vm5, %v5815_v13  ;;  %vm8592_vm3 = vmmov %vm8580_vm10 }
 0x61e   :  { %4565 = vmatpush1.bf16.msra.mxu1 %v4559_v29  ;;  %v5465_v60 = vpop.permute.xlu1 %5464  ;;  %4596 = vmatprep.mubr.bf16.mxu1 %v8440_v38 }
 0x61f   :  { %5822 = vmatprep.subr.msk.bf16.mxu1 %vm282_vm4, %v7874_v35  ;;  %v5463_v52 = vpop.permute.xlu0 %5462  ;;  %v5818_v35 = vld [vmem:[%s8262_s7 + $0x30] sm:$0xf] }
 0x620   :  { %v5466_v58 = vsel %vm429_vm8, %v5461_v36, %v5463_v52  ;;  %v5467_v53 = vsel %vm429_vm8, %v5463_v52, %v5465_v60  ;;  %vm8582_vm8 = vmmov %vm8575_vm6  ;;  %v5821_v60 = vld [vmem:[%s8262_s7 + $0x34] sm:$0xf] }
 0x621   :  { %v5470_v15 = vsel %vm8580_vm10, %v5466_v58, -inf  ;;  %v5471_v2 = vsel %vm8581_vm2, %v5467_v53, -inf  ;;  %vm8587_vm6 = vmmov %vm8576_vm0 }
 0x622   :  { %v5480_v8 = vpop.permute.xlu1 %5479  ;;  %v5474_v36 = vcombine.low %v5470_v15, %v5471_v2  ;;  %v5824_v2 = vld [vmem:[%s8262_s7 + $0x38] sm:$0xf] }
 0x623   :  { %v5478_v23 = vpop.permute.xlu0 %5477 }
 0x624   :  { %v5483_v47 = vsel %vm507_vm14, %v5478_v23, %v5480_v8 }
 0x626   :  { %v5156_v59 = vpop.permute.xlu1 %5155 }
 0x627   :  { %v5482_v57 = vpop.permute.xlu0 %5481  ;;  %v8021_v18 = vsel %vm8577_vm1, %v5154_v63, %v5156_v59  ;;  %v8024_v41 = vsel %vm8578_vm12, %v5156_v59, %v5158_v54  ;;  %v6155_v54 = vld [vmem:[#allocation2 + $0x4] sm:$0xff]  ;;  %vm8590_vm1 = vcmask 908288  }
 0x628   :  { %v5449_v43 = vmax.f32 %v6155_v54, %v5447_v33  ;;  %v5484_v4 = vsel %vm507_vm14, %v5480_v8, %v5482_v57  ;;  %vm8584_vm14 = vmmov %vm8580_vm10 }
 0x629   :  { %5820 = vmatmul.mubr.msk.bf16.vlgmr.msra.gmra.mrb[12].mxu1 %vm278_vm5, %v5818_v35  ;;  %v5488_v42 = vsel %vm8583_vm13, %v5484_v4, -inf  ;;  %vm8591_vm12 = vmmov %vm8590_vm1 }
 0x62a   :  { %4638 = vmatpush1.bf16.msra.mxu1 %v4632_v21  ;;  %v5500_v1 = vpop.permute.xlu1 %5499  ;;  %4669 = vmatprep.mubr.bf16.mxu1 %v8440_v38  ;;  %v5459_v34 = vmax.f32 %v5449_v43, %v5457_v37  ;;  %vm8593_vm10 = vmmov %vm8581_vm2 }
 0x62b   :  { %5825 = vmatprep.subr.msk.bf16.mxu1 %vm282_vm4, %v7896_v24  ;;  %v5502_v63 = vpop.permute.xlu0 %5501  ;;  %v5487_v24 = vsel %vm8582_vm8, %v5483_v47, -inf  ;;  %vm8596_vm8 = vcmask 1041408  }
 0x62c   :  { %v5505_v13 = vsel %vm488_vm7, %v5500_v1, %v5502_v63  ;;  %v5476_v3 = vmax.f32 %v5459_v34, %v5474_v36  ;;  %v5491_v8 = vcombine.low %v5487_v24, %v5488_v42  ;;  %v4766_v34 = vsel %vm282_vm4, %v7902_v48, 0  ;;  %vm8597_vm13 = vmmov %vm8596_vm8 }
 0x62d   :  { %v5509_v39 = vsel %vm8584_vm14, %v5505_v13, -inf  ;;  %vm8598_vm14 = vcmask 31744  }
 0x62e   :  { %v5504_v7 = vpop.permute.xlu1 %5503  ;;  %v5493_v21 = vmax.f32 %v5476_v3, %v5491_v8 }
 0x62f   :  { %v5517_v0 = vpop.permute.xlu0 %5516  ;;  %v5506_v32 = vsel %vm488_vm7, %v5502_v63, %v5504_v7  ;;  %vm8585_vm7 = vmmov %vm8581_vm2 }
 0x630   :  { %v5510_v51 = vsel %vm8585_vm7, %v5506_v32, -inf }
 0x631   :  { %v5513_v40 = vcombine.low %v5509_v39, %v5510_v51 }
 0x632   :  { %v5519_v29 = vpop.permute.xlu1 %5518 }
 0x633   :  { %v5521_v52 = vpop.permute.xlu0 %5520  ;;  %v8051_v62 = vpop.f32.mrb[8].mxu1  ;;  %v5522_v59 = vsel %vm410_vm11, %v5517_v0, %v5519_v29  ;;  %v5515_v54 = vmax.f32 %v5493_v21, %v5513_v40  ;;  %v4897_v40 = vsel %vm282_vm4, %v7936_v56, 0  ;;  %v4964_v56 = vsel %vm282_vm4, %v7961_v28, 0 }
 0x634   :  { %v8053_v23 = vpop.f32.mrb[9].mxu1  ;;  %v5523_v35 = vsel %vm410_vm11, %v5519_v29, %v5521_v52  ;;  %v5526_v58 = vsel %vm8586_vm15, %v5522_v59, -inf  ;;  %vm8588_vm11 = vcmask 777216   ;;  %v5827_v59 = vld [vmem:[%s8262_s7 + $0x3c] sm:$0xf] }
 0x635   :  { %5823 = vmatmul.mubr.msk.bf16.vlgmr.msra.gmra.mrb[12].mxu1 %vm278_vm5, %v5821_v60  ;;  %v3732_v30 = vpop.f32.mrb[10].mxu1  ;;  %v5527_v53 = vsel %vm8587_vm6, %v5523_v35, -inf  ;;  %vm8589_vm0 = vmmov %vm8588_vm11 }
 0x636   :  { %4705 = vmatpush1.bf16.msra.mxu1 %v4699_v22  ;;  %v3733_v57 = vpop.f32.mrb[11].mxu1  ;;  %v5282_v33 = vpop.permute.xlu1 %5281  ;;  %4736 = vmatprep.mubr.bf16.mxu1 %v8440_v38  ;;  %v5530_v43 = vcombine.low %v5526_v58, %v5527_v53 }
 0x637   :  { %5828 = vmatprep.subr.msk.bf16.mxu1 %vm282_vm4, %v7905_v20  ;;  %v5534_v10 = vpop.permute.xlu0 %5533 }
 0x638   :  { %v5537_v37 = vrot.slane %v5534_v10, 4  ;;  %v5532_v4 = vmax.f32 %v5515_v54, %v5530_v43 }
 0x63a   :  { %v5286_v1 = vpop.permute.xlu1 %5285 }
 0x63b   :  { %v5544_v63 = vpop.permute.xlu0 %5543 }
 0x63e   :  { %v5536_v15 = vpop.permute.xlu1 %5535 }
 0x63f   :  { %v5284_v20 = vpop.permute.xlu0 %5283  ;;  %v5538_v47 = vrot.slane %v5536_v15, 4  ;;  %v8600_v15 = vld [vmem:[#allocation6_spill] sm:$0xff] }
 0x640   :  { %v8075_v7 = vsel %vm8588_vm11, %v5282_v33, %v5284_v20  ;;  %v8078_v0 = vsel %vm8589_vm0, %v5284_v20, %v5286_v1  ;;  %v4833_v33 = vsel %vm282_vm4, %v7920_v49, 0  ;;  %v5830_v49 = vld [vmem:[%s8262_s7 + $0x40] sm:$0xf] }
 0x641   :  { %v5539_v36 = vsel %vm282_vm4, %v5537_v37, %v5538_v47  ;;  %5826 = vmatmul.mubr.msk.bf16.vlgmr.msra.gmra.mrb[12].mxu1 %vm278_vm5, %v5824_v2 }
 0x642   :  { %v5540_v24 = vsel %vm785_vm9, %v5534_v10, %v5539_v36  ;;  %4772 = vmatpush1.bf16.msra.mxu1 %v4766_v34  ;;  %v5546_v42 = vpop.permute.xlu1 %5545  ;;  %4803 = vmatprep.mubr.bf16.mxu1 %v8440_v38  ;;  %vm8594_vm9 = vcmask 769024   ;;  %v5560_v10 = vld [vmem:[%s8263_s10] sm:$0xf] }
 0x643   :  { %5831 = vmatprep.subr.msk.bf16.mxu1 %vm282_vm4, %v7933_v45  ;;  %v5548_v13 = vpop.permute.xlu0 %5547  ;;  %v5549_v32 = vsel %vm8590_vm1, %v5544_v63, %v5546_v42  ;;  %v5542_v29 = vmax.f32 %v5532_v4, %v5540_v24  ;;  %vm8595_vm2 = vmmov %vm8594_vm9  ;;  %v5833_v63 = vld [vmem:[%s8262_s7 + $0x44] sm:$0xf] }
 0x644   :  { %v5550_v60 = vsel %vm8591_vm12, %v5546_v42, %v5548_v13  ;;  %v5553_v48 = vsel %vm8592_vm3, %v5549_v32, -inf }
 0x645   :  { %v5554_v52 = vsel %vm8593_vm10, %v5550_v60, -inf }
 0x646   :  { %v5557_v3 = vcombine.low %v5553_v48, %v5554_v52  ;;  %v5349_v8 = vpop.permute.xlu1 %5348 }
 0x647   :  { %v5351_v22 = vpop.permute.xlu0 %5350 }
 0x648   :  { %v5559_v39 = vmax.f32 %v5542_v29, %v5557_v3  ;;  %v8095_v51 = vsel %vm8594_vm9, %v5349_v8, %v5351_v22  ;;  %v5836_v8 = vld [vmem:[%s8262_s7 + $0x48] sm:$0xf] }
 0x64a   :  { %v5562_v45 = vcombine.high %v5559_v39, %v5559_v39  ;;  %v5353_v30 = vpop.permute.xlu1 %5352  ;;  %v5564_v35 = vpack.c.bf16 %v5559_v39, %v5559_v39 }
 0x64b   :  { %v8101_v12 = vsel %vm8595_vm2, %v5351_v22, %v5353_v30 }
 0x64c   :  { %v5565_v57 = vpack.c.bf16 %v5562_v45, %v5562_v45  ;;  %v5570_v14 = vsel %vm8596_vm8, %v5564_v35, 0 }
 0x64d   :  { %5829 = vmatmul.mubr.msk.bf16.vlgmr.msra.gmra.mrb[12].mxu1 %vm278_vm5, %v5827_v59 }
 0x64e   :  { %4839 = vmatpush1.bf16.msra.mxu1 %v4833_v33  ;;  %5859 = vmatprep.subr.msk.bf16.mxu0 %vm8597_vm13, %v5565_v57  ;;  %v5031_v57 = vsel %vm282_vm4, %v7986_v46, 0 }
 0x64f   :  { %5834 = vmatprep.subr.msk.bf16.mxu1 %vm282_vm4, %v7939_v50  ;;  %5576 = vmatpush1.bf16.msra.mxu0 %v5570_v14 }
 0x650   :  { %4870 = vmatprep.mubr.bf16.mxu1 %v8440_v38 }
 0x652   :  { %5860 = vmatmul.mubr.msk.bf16.vlgmr.msra.gmra.mrb[24].mxu0 %vm8598_vm14, %v5560_v10 }
 0x658   :  { %v176_v21 = vpop.permute.xlu0 %175 }
 0x659   :  { %5832 = vmatmul.mubr.msk.bf16.vlgmr.msra.gmra.mrb[12].mxu1 %vm278_vm5, %v5830_v49  ;;  %v189_v2 = vmul.f32 %v176_v21, %v8600_v15 }
 0x65a   :  { %4903 = vmatpush1.bf16.msra.mxu1 %v4897_v40  ;;  %4934 = vmatprep.mubr.bf16.mxu1 %v8440_v38 }
 0x65b   :  { %5837 = vmatprep.subr.msk.bf16.mxu1 %vm282_vm4, %v7964_v11  ;;  %v920_v50 = vpop.permute.xlu1 %919  ;;  %v8599_v11 = vld [vmem:[#allocation5_spill] sm:$0xff] }
 0x65c   :  { %v2771_v58 = vpop.permute.xlu0 %2770  ;;  %v188_v37 = vmul.f32 %v176_v21, %v8599_v11  ;;  %v922_v36 = vmul.f32 %v7428_v6, %v920_v50  ;;  %v923_v28 = vmul.f32 %v7431_v25, %v920_v50 }
 0x65d   :  { %v2773_v24 = vmul.f32 %v2771_v58, %v7333_v61  ;;  %v2774_v42 = vmul.f32 %v2771_v58, %v7335_v26  ;;  %v5839_v58 = vld [vmem:[%s8262_s7 + $0x4c] sm:$0xf] }
 0x65f   :  { %v2987_v53 = vpop.permute.xlu1 %2986 }
 0x660   :  { %v3090_v1 = vpop.permute.xlu0 %3089  ;;  %v2989_v61 = vmul.f32 %v2987_v53, %v7676_v9  ;;  %v2990_v26 = vmul.f32 %v2987_v53, %v7680_v19  ;;  %v5098_v53 = vsel %vm282_vm4, %v8000_v55, 0  ;;  %v5845_v55 = vld [vmem:[%s8262_s7 + $0x54] sm:$0xf] }
 0x661   :  { %v3102_v22 = vmul.f32 %v3090_v1, %v7337_v27  ;;  %v3103_v39 = vmul.f32 %v3090_v1, %v7339_v44  ;;  %v5842_v1 = vld [vmem:[%s8262_s7 + $0x50] sm:$0xf] }
 0x663   :  { %v3741_v54 = vpop.permute.xlu1 %3740 }
 0x664   :  { %v8127_v43 = vpop.permute.xlu0 %5411  ;;  %v3743_v14 = vmul.f32 %v3741_v54, %v8051_v62  ;;  %v3744_v33 = vmul.f32 %v3741_v54, %v8053_v23 }
 0x665   :  { %5835 = vmatmul.mubr.msk.bf16.vlgmr.msra.gmra.mrb[12].mxu1 %vm278_vm5, %v5833_v63  ;;  %v5165_v63 = vsel %vm282_vm4, %v8021_v18, 0  ;;  %v5848_v18 = vld [vmem:[%s8262_s7 + $0x58] sm:$0xf] }
 0x666   :  { %4970 = vmatpush1.bf16.msra.mxu1 %v4964_v56  ;;  %5001 = vmatprep.mubr.bf16.mxu1 %v8440_v38 }
 0x667   :  { %5840 = vmatprep.subr.msk.bf16.mxu1 %vm282_vm4, %v7989_v5  ;;  %v8137_v20 = vpop.permute.xlu1 %5619 }
 0x668   :  { %v200_v47 = vpop.permute.xlu0 %199 }
 0x669   :  { %v212_v4 = vadd.f32 %v200_v47, %v188_v37  ;;  %v213_v34 = vadd.f32 %v200_v47, %v189_v2 }
 0x66b   :  { %v218_v13 = vmax.f32 %v212_v4, 0.0  ;;  %v219_v32 = vmax.f32 %v213_v34, 0.0  ;;  %v928_v29 = vpop.permute.xlu1 %927 }
 0x66c   :  { %v2779_v60 = vpop.permute.xlu0 %2778  ;;  %v930_v48 = vadd.f32 %v928_v29, %v922_v36  ;;  %v931_v52 = vadd.f32 %v928_v29, %v923_v28 }
 0x66d   :  { %224 = vst [vmem:[%s8270_s13] sm:$0xff] %v218_v13  ;;  %225 = vst [vmem:[%s8270_s13 + $0x8] sm:$0xff] %v219_v32  ;;  %v2781_v6 = vadd.f32 %v2779_v60, %v2773_v24  ;;  %v2782_v25 = vadd.f32 %v2779_v60, %v2774_v42 }
 0x66e   :  { %v932_v5 = vmax.f32 %v930_v48, 0.0  ;;  %v933_v3 = vmax.f32 %v931_v52, 0.0 }
 0x66f   :  { %v2783_v45 = vmax.f32 %v2781_v6, 0.0  ;;  %v2784_v30 = vmax.f32 %v2782_v25, 0.0  ;;  %v2995_v59 = vpop.permute.xlu1 %2994 }
 0x670   :  { %934 = vst [vmem:[%s8270_s13 + $0x10] sm:$0xff] %v932_v5  ;;  %935 = vst [vmem:[%s8270_s13 + $0x18] sm:$0xff] %v933_v3  ;;  %v3114_v9 = vpop.permute.xlu0 %3113  ;;  %v2997_v19 = vadd.f32 %v2995_v59, %v2989_v61  ;;  %v2998_v35 = vadd.f32 %v2995_v59, %v2990_v26 }
 0x671   :  { %2785 = vst [vmem:[%s8270_s13 + $0x20] sm:$0xff] %v2783_v45  ;;  %2786 = vst [vmem:[%s8270_s13 + $0x28] sm:$0xff] %v2784_v30  ;;  %v3126_v27 = vadd.f32 %v3114_v9, %v3102_v22  ;;  %v3127_v44 = vadd.f32 %v3114_v9, %v3103_v39  ;;  %5838 = vmatmul.mubr.msk.bf16.vlgmr.msra.gmra.mrb[12].mxu1 %vm278_vm5, %v5836_v8 }
 0x672   :  { %v2999_v10 = vmax.f32 %v2997_v19, 0.0  ;;  %v3000_v49 = vmax.f32 %v2998_v35, 0.0  ;;  %5037 = vmatpush1.bf16.msra.mxu1 %v5031_v57  ;;  %5068 = vmatprep.mubr.bf16.mxu1 %v8440_v38 }
 0x673   :  { %v3132_v46 = vmax.f32 %v3126_v27, 0.0  ;;  %v3133_v21 = vmax.f32 %v3127_v44, 0.0  ;;  %5843 = vmatprep.subr.msk.bf16.mxu1 %vm282_vm4, %v8003_v17  ;;  %v3749_v40 = vpop.permute.xlu1 %3748 }
 0x674   :  { %3001 = vst [vmem:[%s8270_s13 + $0x30] sm:$0xff] %v2999_v10  ;;  %3002 = vst [vmem:[%s8270_s13 + $0x38] sm:$0xff] %v3000_v49  ;;  %v3751_v62 = vadd.f32 %v3749_v40, %v3743_v14  ;;  %v3752_v23 = vadd.f32 %v3749_v40, %v3744_v33  ;;  %v5420_v24 = vpop.permute.xlu0 %5419 }
 0x675   :  { %5753 = vst [vmem:[%s8270_s13 + $0x40] sm:$0xff] %v3132_v46  ;;  %5754 = vst [vmem:[%s8270_s13 + $0x48] sm:$0xff] %v3133_v21 }
 0x676   :  { %v3753_v17 = vmax.f32 %v3751_v62, 0.0  ;;  %v3754_v50 = vmax.f32 %v3752_v23, 0.0 }
 0x677   :  { %v5628_v11 = vpop.permute.xlu1 %5627 }
 0x678   :  { %5781 = vst [vmem:[%s8270_s13 + $0x50] sm:$0xff] %v3753_v17  ;;  %5782 = vst [vmem:[%s8270_s13 + $0x58] sm:$0xff] %v3754_v50 }
 0x67d   :  { %5841 = vmatmul.mubr.msk.bf16.vlgmr.msra.gmra.mrb[12].mxu1 %vm278_vm5, %v5839_v58 }
 0x67e   :  { %5104 = vmatpush1.bf16.msra.mxu1 %v5098_v53  ;;  %5135 = vmatprep.mubr.bf16.mxu1 %v8440_v38 }
 0x67f   :  { %5846 = vmatprep.subr.msk.bf16.mxu1 %vm282_vm4, %v8024_v41  ;;  %v5226_v41 = vsel %vm282_vm4, %v7974_v31, 0  ;;  %v5851_v31 = vld [vmem:[%s8262_s7 + $0x5c] sm:$0xf] }
 0x689   :  { %5844 = vmatmul.mubr.msk.bf16.vlgmr.msra.gmra.mrb[12].mxu1 %vm278_vm5, %v5842_v1 }
 0x68a   :  { %5171 = vmatpush1.bf16.msra.mxu1 %v5165_v63  ;;  %5202 = vmatprep.mubr.bf16.mxu1 %v8440_v38 }
 0x68b   :  { %5849 = vmatprep.subr.msk.bf16.mxu1 %vm282_vm4, %v7977_v16  ;;  %v5293_v16 = vsel %vm282_vm4, %v8075_v7, 0  ;;  %v5854_v7 = vld [vmem:[%s8262_s7 + $0x60] sm:$0xf] }
 0x695   :  { %5847 = vmatmul.mubr.msk.bf16.vlgmr.msra.gmra.mrb[12].mxu1 %vm278_vm5, %v5845_v55 }
 0x696   :  { %5232 = vmatpush1.bf16.msra.mxu1 %v5226_v41  ;;  %5263 = vmatprep.mubr.bf16.mxu1 %v8440_v38 }
 0x697   :  { %5852 = vmatprep.subr.msk.bf16.mxu1 %vm282_vm4, %v8078_v0  ;;  %v5360_v0 = vsel %vm282_vm4, %v8095_v51, 0 }
 0x6a1   :  { %5850 = vmatmul.mubr.msk.bf16.vlgmr.msra.gmra.mrb[12].mxu1 %vm278_vm5, %v5848_v18 }
 0x6a2   :  { %5299 = vmatpush1.bf16.msra.mxu1 %v5293_v16  ;;  %5330 = vmatprep.mubr.bf16.mxu1 %v8440_v38 }
 0x6a3   :  { %5855 = vmatprep.subr.msk.bf16.mxu1 %vm282_vm4, %v8101_v12 }
 0x6ad   :  { %5853 = vmatmul.mubr.msk.bf16.vlgmr.msra.gmra.mrb[12].mxu1 %vm278_vm5, %v5851_v31 }
 0x6ae   :  { %5366 = vmatpush1.bf16.msra.mxu1 %v5360_v0  ;;  %5397 = vmatprep.mubr.bf16.mxu1 %v8440_v38 }
 0x6b9   :  { %5856 = vmatmul.mubr.msk.bf16.vlgmr.msra.gmra.mrb[12].mxu1 %vm278_vm5, %v5854_v7 }
 0x725   :  { %v5609_v54 = vpop.f32.mrb[24].mxu0 }
 0x726   :  { %v5622_v12 = vmul.f32 %v8137_v20, %v5609_v54  ;;  %v5611_v56 = vpop.f32.mrb[25].mxu0 }
 0x727   :  { %v5623_v37 = vmul.f32 %v8137_v20, %v5611_v56  ;;  %v5613_v15 = vpop.f32.mrb[26].mxu0 }
 0x728   :  { %v5630_v51 = vadd.f32 %v5628_v11, %v5622_v12  ;;  %v5614_v2 = vpop.f32.mrb[27].mxu0 }
 0x729   :  { %v5631_v47 = vadd.f32 %v5628_v11, %v5623_v37 }
 0x72a   :  { %v5632_v4 = vmax.f32 %v5630_v51, 0.0 }
 0x72b   :  { %v5633_v34 = vmax.f32 %v5631_v47, 0.0 }
 0x72c   :  { %5861 = vst [vmem:[%s8270_s13 + $0x70] sm:$0xff] %v5632_v4 }
 0x72d   :  { %5862 = vst [vmem:[%s8270_s13 + $0x78] sm:$0xff] %v5633_v34 }
 0x78c   :  { %v5399_v38 = vpop.f32.mrb[12].mxu1 }
 0x78d   :  { %v5414_v36 = vmul.f32 %v8127_v43, %v5399_v38  ;;  %v5401_v28 = vpop.f32.mrb[13].mxu1 }
 0x78e   :  { %v5415_v20 = vmul.f32 %v8127_v43, %v5401_v28  ;;  %v5403_v42 = vpop.f32.mrb[14].mxu1 }
 0x78f   :  { %v5422_v13 = vadd.f32 %v5420_v24, %v5414_v36  ;;  %v5404_v32 = vpop.f32.mrb[15].mxu1 }
 0x790   :  { %v5423_v29 = vadd.f32 %v5420_v24, %v5415_v20 }
 0x791   :  { %v5424_v60 = vmax.f32 %v5422_v13, 0.0 }
 0x792   :  { %v5425_v48 = vmax.f32 %v5423_v29, 0.0 }
 0x793   :  { %5857 = vst [vmem:[%s8270_s13 + $0x60] sm:$0xff] %v5424_v60 }
 0x794   :  { %5858 = vst [vmem:[%s8270_s13 + $0x68] sm:$0xff] %v5425_v48 }

</bundles_post_ra>
